<compile_context>
chip_gen: v7x
topology: tpu7x:2x2x1
jax: 0.10.0
libtpu: 0.0.40
codegen_flags: <defaults>
</compile_context>

<pallas_src>
import functools

import jax
import jax.numpy as jnp
from jax.experimental import pallas as pl
from jax.experimental.pallas import tpu as pltpu

_EPS = 1e-5


def _fold_bn(gamma, beta, rmean, rvar, eps=_EPS):
    """Fold eval-mode BatchNorm into per-channel scale/shift, shape (1, C) f32."""
    scale = gamma / jnp.sqrt(rvar + eps)
    shift = beta - rmean * scale
    return (scale.reshape(1, -1).astype(jnp.float32),
            shift.reshape(1, -1).astype(jnp.float32))


def _build_sa_toeplitz(sa_w, W):
    """Banded weight matrix for the 7x7 (pad=3) spatial-attention conv.

    sa_w: (7, 7, 2) = [ky, kx, channel] with channel 0 = max map, 1 = avg map.
    Returns (14*(W+6), W): rows indexed by (channel, ky, padded-x), cols by x.
    """
    Wp = W + 6
    eye = jnp.eye(W, dtype=jnp.float32)
    T = jnp.zeros((2, 7, Wp, W), jnp.float32)
    for c in range(2):
        for ky in range(7):
            for kx in range(7):
                T = T.at[c, ky, kx:kx + W, :].add(eye * sa_w[ky, kx, c])
    return T.reshape(2 * 7 * Wp, W)


def _pick_batch_tile(B, H, W, Cin, Cmid, Cout, batch_tile=None):
    """Pick bt | B so that bt*H*W matmul rows are reasonably large within VMEM."""
    if batch_tile is not None:
        bt = int(max(1, min(batch_tile, B)))
    else:
        hw = H * W
        per_sample = (hw * Cin * 4 * 2            # input block (double buffered)
                      + hw * Cout * 4 * 2         # output block (double buffered)
                      + hw * 9 * Cmid * 2         # im2col scratch (bf16)
                      + (H + 2) * (W + 2) * Cmid * 2
                      + hw * Cout * 4 * 3)        # f32 intermediates headroom
        budget = 24 * 1024 * 1024
        bt = min(B, max(1, 512 // max(hw, 1)), max(1, budget // max(per_sample, 1)))
    bt = max(int(bt), 1)
    while B % bt:
        bt -= 1
    return max(bt, 1)


def _bottleneck_kernel(
    x_ref, w1_ref, s1_ref, t1_ref, w2_ref, s2_ref, t2_ref,
    w3_ref, s3_ref, t3_ref, caw1_ref, caw2_ref, saT_ref,
    wd_ref, sd_ref, td_ref,
    o_ref,
    pad2_ref, col_ref, pmax_ref, pavg_ref, sacol_ref,
    *, bt, H, W, Cin, Cmid, Cout, has_downsample,
):
    f32, bf16 = jnp.float32, jnp.bfloat16
    HW = H * W
    Wp, Hp2, Hp6 = W + 6, H + 2, H + 6

    # ---- conv1 (1x1) + folded BN1 + ReLU ---------------------------------
    xa = x_ref[...].reshape(bt * HW, Cin).astype(bf16)   # x re-read later (short live range)
    h = jnp.dot(xa, w1_ref[...], preferred_element_type=f32)
    h = jnp.maximum(h * s1_ref[...] + t1_ref[...], 0.0)              # (bt*HW, Cmid) f32

    # ---- conv2 (3x3, pad=1) as one batched im2col matmul -----------------
    hb = h.astype(bf16).reshape(bt * H, W, Cmid)
    zrow = jnp.zeros((1, W + 2, Cmid), bf16)              # hoisted out of the loop
    zcol = jnp.zeros((H, 1, Cmid), bf16)
    for b in range(bt):
        r0 = b * Hp2
        # zero only the 1-wide halo ring of this sample's padded slab
        pad2_ref[r0:r0 + 1, :, :] = zrow
        pad2_ref[r0 + H + 1:r0 + H + 2, :, :] = zrow
        pad2_ref[r0 + 1:r0 + 1 + H, 0:1, :] = zcol
        pad2_ref[r0 + 1:r0 + 1 + H, W + 1:W + 2, :] = zcol
        pad2_ref[r0 + 1:r0 + 1 + H, 1:W + 1, :] = hb[b * H:(b + 1) * H]
        for ky in range(3):
            for kx in range(3):
                j = ky * 3 + kx
                col_ref[b * H:(b + 1) * H, :, j * Cmid:(j + 1) * Cmid] = (
                    pad2_ref[r0 + ky:r0 + ky + H, kx:kx + W, :])
    h = jnp.dot(col_ref[...].reshape(bt * HW, 9 * Cmid), w2_ref[...],
                preferred_element_type=f32)
    h = jnp.maximum(h * s2_ref[...] + t2_ref[...], 0.0)              # (bt*HW, Cmid)

    # ---- conv3 (1x1) + folded BN3 ----------------------------------------
    h = jnp.dot(h.astype(bf16), w3_ref[...], preferred_element_type=f32)
    h = h * s3_ref[...] + t3_ref[...]                                 # (bt*HW, Cout)

    # ---- CBAM channel attention (all samples stacked -> single MLP pass) -
    rows = []
    for b in range(bt):
        hb_ = h[b * HW:(b + 1) * HW]
        rows.append(jnp.mean(hb_, axis=0, keepdims=True))
        rows.append(jnp.max(hb_, axis=0, keepdims=True))
    p = jnp.concatenate(rows, axis=0)                                 # (2*bt, Cout)
    q = jnp.maximum(jnp.dot(p.astype(bf16), caw1_ref[...],
                            preferred_element_type=f32), 0.0)
    q = jnp.dot(q.astype(bf16), caw2_ref[...], preferred_element_type=f32)

    # ---- CBAM spatial attention (canonical channel-wise max/mean) --------
    # TODO(synk): the source SpatialAttention pools to (1,1) before a 2-channel
    # 7x7 conv, which is channel-inconsistent for C != 1 (raises in PyTorch);
    # the canonical CBAM channel-wise max/mean formulation is implemented instead.
    pmax_ref[...] = jnp.zeros_like(pmax_ref)
    pavg_ref[...] = jnp.zeros_like(pavg_ref)
    oc_list = []
    for b in range(bt):
        ca = jax.nn.sigmoid(q[2 * b:2 * b + 1, :] + q[2 * b + 1:2 * b + 2, :])
        oc = (h[b * HW:(b + 1) * HW] * ca).reshape(H, W, Cout)        # (H, W, Cout)
        oc_list.append(oc)
        m0 = b * Hp6
        pmax_ref[m0 + 3:m0 + 3 + H, 3:3 + W] = jnp.max(oc, axis=-1)
        pavg_ref[m0 + 3:m0 + 3 + H, 3:3 + W] = jnp.mean(oc, axis=-1)
        for c, m_ref in enumerate((pmax_ref, pavg_ref)):
            for ky in range(7):
                j = c * 7 + ky
                sacol_ref[b * H:(b + 1) * H, j * Wp:(j + 1) * Wp] = (
                    m_ref[m0 + ky:m0 + ky + H, :].astype(bf16))
    out_ca = jnp.concatenate(oc_list, axis=0)                         # (bt*H, W, Cout)
    sa = jnp.dot(sacol_ref[...], saT_ref[...], preferred_element_type=f32)  # (bt*H, W)
    out_sa = out_ca * jax.nn.sigmoid(sa)[:, :, None]

    # ---- identity / downsample (x re-read late -> short live range) ------
    if has_downsample:
        xi = x_ref[...].reshape(bt * HW, Cin).astype(bf16)
        idn = jnp.dot(xi, wd_ref[...], preferred_element_type=f32)
        idn = (idn * sd_ref[...] + td_ref[...]).reshape(bt * H, W, Cout)
    else:
        idn = x_ref[...].astype(f32)

    o_ref[...] = jnp.maximum(out_sa + idn, 0.0).astype(o_ref.dtype)


def _full_spec(arr):
    zeros = (0,) * arr.ndim
    return pl.BlockSpec(arr.shape, lambda b, _z=zeros: _z)


def bottleneck_forward_nhwc(x, params, *, stride=1, out_dtype=None, batch_tile=None):
    """NHWC-native fused bottleneck. Chain these to stay NHWC across blocks."""
    if stride != 1:
        # 1x1 convs with stride s (conv1 and downsample) == spatial subsampling.
        x = x[:, ::stride, ::stride, :]
    B, H, W, Cin = x.shape
    Cmid = params["w1"].shape[1]
    Cout = params["w3"].shape[1]
    has_downsample = (stride != 1) or (Cin != Cout)
    out_dtype = x.dtype if out_dtype is None else out_dtype
    bf16 = jnp.bfloat16

    bt = _pick_batch_tile(B, H, W, Cin, Cmid, Cout, batch_tile)

    # Fold eval-mode BatchNorm into scale/shift.
    s1, t1 = _fold_bn(params["g1"], params["b1"], params["rm1"], params["rv1"])
    s2, t2 = _fold_bn(params["g2"], params["b2"], params["rm2"], params["rv2"])
    s3, t3 = _fold_bn(params["g3"], params["b3"], params["rm3"], params["rv3"])
    sd, td = _fold_bn(params["gd"], params["bd"], params["rmd"], params["rvd"])

    # Weights in bf16 matmul form (f32 accumulation inside the kernel).
    w1 = params["w1"].astype(bf16)
    w2 = params["w2"].astype(bf16).reshape(9 * Cmid, Cmid)
    w3 = params["w3"].astype(bf16)
    caw1 = params["ca_w1"].astype(bf16)
    caw2 = params["ca_w2"].astype(bf16)
    saT = _build_sa_toeplitz(params["sa_w"], W).astype(bf16)
    wd = params["wd"].astype(bf16)

    # Fold batch into the row axis so all kernel refs stay <= 3-D.
    xf = x.reshape(B * H, W, Cin)

    kernel = functools.partial(
        _bottleneck_kernel, bt=bt, H=H, W=W, Cin=Cin, Cmid=Cmid, Cout=Cout,
        has_downsample=has_downsample)

    inputs = (xf, w1, s1, t1, w2, s2, t2, w3, s3, t3, caw1, caw2, saT, wd, sd, td)
    in_specs = ([pl.BlockSpec((bt * H, W, Cin), lambda i: (i, 0, 0))]
                + [_full_spec(a) for a in inputs[1:]])
    out_specs = pl.BlockSpec((bt * H, W, Cout), lambda i: (i, 0, 0))

    grid_spec = pltpu.PrefetchScalarGridSpec(
        num_scalar_prefetch=0,
        grid=(B // bt,),
        in_specs=in_specs,
        out_specs=out_specs,
        scratch_shapes=[
            pltpu.VMEM((bt * (H + 2), W + 2, Cmid), jnp.bfloat16),   # conv2 padded input
            pltpu.VMEM((bt * H, W, 9 * Cmid), jnp.bfloat16),         # conv2 im2col matrix
            pltpu.VMEM((bt * (H + 6), W + 6), jnp.float32),          # padded channel-max map
            pltpu.VMEM((bt * (H + 6), W + 6), jnp.float32),          # padded channel-avg map
            pltpu.VMEM((bt * H, 14 * (W + 6)), jnp.bfloat16),        # spatial-attn im2col
        ])

    out = pl.pallas_call(
        kernel,
        out_shape=jax.ShapeDtypeStruct((B * H, W, Cout), out_dtype),
        grid_spec=grid_spec,
        compiler_params=pltpu.CompilerParams(
            dimension_semantics=("parallel",),          # megacore on v7x
            vmem_limit_bytes=48 * 1024 * 1024),         # fits v7x's 64 MiB VMEM
    )(*inputs)
    return out.reshape(B, H, W, Cout)


def bottleneck_forward(x_nchw, params, *, stride=1, out_dtype=None, batch_tile=None):
    """PyTorch-parity NCHW wrapper (single boundary transpose each way)."""
    x = jnp.transpose(x_nchw, (0, 2, 3, 1))
    out = bottleneck_forward_nhwc(x, params, stride=stride, out_dtype=out_dtype,
                                  batch_tile=batch_tile)
    return jnp.transpose(out, (0, 3, 1, 2))


def init_params(key, in_channels, out_channels, reduction_ratio=16):
    expansion = 4
    cmid = out_channels // expansion
    cr = max(out_channels // reduction_ratio, 1)
    keys = iter(jax.random.split(key, 32))

    def w(shape, fan_in):
        return jax.random.normal(next(keys), shape, jnp.float32) / jnp.sqrt(float(fan_in))

    def bn(c, sfx):
        return {
            "g" + sfx: 1.0 + 0.1 * jax.random.normal(next(keys), (c,), jnp.float32),
            "b" + sfx: 0.1 * jax.random.normal(next(keys), (c,), jnp.float32),
            "rm" + sfx: 0.1 * jax.random.normal(next(keys), (c,), jnp.float32),
            "rv" + sfx: jax.random.uniform(next(keys), (c,), jnp.float32,
                                           minval=0.5, maxval=1.5),
        }

    p = {
        "w1": w((in_channels, cmid), in_channels),            # conv1 1x1
        "w2": w((3, 3, cmid, cmid), 9 * cmid),                # conv2 3x3 (HWIO)
        "w3": w((cmid, out_channels), cmid),                  # conv3 1x1
        "ca_w1": w((out_channels, cr), out_channels),         # CA reduce 1x1
        "ca_w2": w((cr, out_channels), cr),                   # CA expand 1x1
        "sa_w": w((7, 7, 2), 98),                             # SA 7x7, ch0=max ch1=avg
        "wd": w((in_channels, out_channels), in_channels),    # downsample 1x1
    }
    p.update(bn(cmid, "1"))
    p.update(bn(cmid, "2"))
    p.update(bn(out_channels, "3"))
    p.update(bn(out_channels, "d"))
    return p


def bottleneck_reference(x_nchw, params, *, stride=1):
    """Pure-JAX reference mirroring the kernel's bf16-operand / f32-accum policy."""
    bf16, f32 = jnp.bfloat16, jnp.float32
    x = jnp.transpose(x_nchw, (0, 2, 3, 1)).astype(f32)
    if stride != 1:
        x = x[:, ::stride, ::stride, :]
    B, H, W, Cin = x.shape
    Cmid = params["w1"].shape[1]
    Cout = params["w3"].shape[1]
    has_downsample = (stride != 1) or (Cin != Cout)

    def fold(sfx):
        s = params["g" + sfx] / jnp.sqrt(params["rv" + sfx] + _EPS)
        return s, params["b" + sfx] - params["rm" + sfx] * s

    def mm(a, w):
        return jnp.dot(a.astype(bf16), w.astype(bf16), preferred_element_type=f32)

    s1, t1 = fold("1"); s2, t2 = fold("2"); s3, t3 = fold("3"); sd, td = fold("d")

    h = mm(x.reshape(-1, Cin), params["w1"])
    h = jnp.maximum(h * s1 + t1, 0.0).reshape(B, H, W, Cmid)
    h = jax.lax.conv_general_dilated(
        h.astype(bf16), params["w2"].astype(bf16), (1, 1), "SAME",
        dimension_numbers=("NHWC", "HWIO", "NHWC"), preferred_element_type=f32)
    h = jnp.maximum(h.reshape(-1, Cmid) * s2 + t2, 0.0)
    h = mm(h, params["w3"])
    h = (h * s3 + t3).reshape(B, H, W, Cout)

    hp = h.reshape(B, H * W, Cout)
    p = jnp.stack([jnp.mean(hp, axis=1), jnp.max(hp, axis=1)], axis=1)   # (B,2,Cout)
    q = jnp.maximum(mm(p.reshape(-1, Cout), params["ca_w1"]), 0.0)
    q = mm(q, params["ca_w2"]).reshape(B, 2, Cout)
    ca = jax.nn.sigmoid(q[:, 0] + q[:, 1])
    out_ca = h * ca[:, None, None, :]

    maps = jnp.stack([jnp.max(out_ca, axis=-1), jnp.mean(out_ca, axis=-1)], axis=-1)
    sa = jax.lax.conv_general_dilated(
        maps.astype(bf16), params["sa_w"][..., None].astype(bf16), (1, 1), "SAME",
        dimension_numbers=("NHWC", "HWIO", "NHWC"), preferred_element_type=f32)[..., 0]
    out_sa = out_ca * jax.nn.sigmoid(sa)[..., None]

    if has_downsample:
        idn = mm(x.reshape(-1, Cin), params["wd"])
        idn = (idn * sd + td).reshape(B, H, W, Cout)
    else:
        idn = x
    out = jnp.maximum(out_sa + idn, 0.0)
    return jnp.transpose(out, (0, 3, 1, 2))


if __name__ == "__main__":
    key = jax.random.PRNGKey(0)
    kx, kp = jax.random.split(key)

    # Case 1: Cin != Cout -> downsample path active (batch tile auto-picks bt=2).
    B, Cin, Cout, H = 2, 16, 32, 8
    x = jax.random.normal(kx, (B, Cin, H, H), jnp.float32)
    params = init_params(kp, Cin, Cout, reduction_ratio=16)

    out = jax.block_until_ready(bottleneck_forward(x, params, stride=1,
                                                   out_dtype=jnp.float32))
    ref = jax.block_until_ready(bottleneck_reference(x, params, stride=1))

    assert out.shape == (B, Cout, H, H), out.shape
    assert bool(jnp.all(jnp.isfinite(out)))
    assert bool(jnp.all(out >= 0.0))                      # final ReLU
    assert bool(jnp.allclose(out, ref, atol=2e-2, rtol=2e-2)), \
        float(jnp.max(jnp.abs(out - ref)))

    # Case 2: Cin == Cout -> identity residual path; also exercise bt=1.
    params2 = init_params(jax.random.PRNGKey(7), Cout, Cout, reduction_ratio=16)
    x2 = jax.random.normal(jax.random.PRNGKey(3), (B, Cout, H, H), jnp.float32)
    out2 = jax.block_until_ready(bottleneck_forward(x2, params2, stride=1,
                                                    out_dtype=jnp.float32))
    ref2 = bottleneck_reference(x2, params2, stride=1)
    assert bool(jnp.allclose(out2, ref2, atol=2e-2, rtol=2e-2))

    out3 = jax.block_until_ready(bottleneck_forward(x2, params2, stride=1,
                                                    out_dtype=jnp.float32,
                                                    batch_tile=1))
    assert bool(jnp.allclose(out3, ref2, atol=2e-2, rtol=2e-2))

    print("KERNEL_OK")
</pallas_src>

<mosaic_0001>
module attributes {stable_mosaic.version = 11 : i64} {
  func.func @_bottleneck_kernel(%arg0: i32, %arg1: memref<16x8x16xf32, #tpu.memory_space<vmem>>, %arg2: memref<16x8xbf16, #tpu.memory_space<vmem>>, %arg3: memref<1x8xf32, #tpu.memory_space<vmem>>, %arg4: memref<1x8xf32, #tpu.memory_space<vmem>>, %arg5: memref<72x8xbf16, #tpu.memory_space<vmem>>, %arg6: memref<1x8xf32, #tpu.memory_space<vmem>>, %arg7: memref<1x8xf32, #tpu.memory_space<vmem>>, %arg8: memref<8x32xbf16, #tpu.memory_space<vmem>>, %arg9: memref<1x32xf32, #tpu.memory_space<vmem>>, %arg10: memref<1x32xf32, #tpu.memory_space<vmem>>, %arg11: memref<32x2xbf16, #tpu.memory_space<vmem>>, %arg12: memref<2x32xbf16, #tpu.memory_space<vmem>>, %arg13: memref<196x8xbf16, #tpu.memory_space<vmem>>, %arg14: memref<16x32xbf16, #tpu.memory_space<vmem>>, %arg15: memref<1x32xf32, #tpu.memory_space<vmem>>, %arg16: memref<1x32xf32, #tpu.memory_space<vmem>>, %arg17: memref<16x8x32xf32, #tpu.memory_space<vmem>>, %arg18: memref<20x10x8xbf16, #tpu.memory_space<vmem>>, %arg19: memref<16x8x72xbf16, #tpu.memory_space<vmem>>, %arg20: memref<28x14xf32, #tpu.memory_space<vmem>>, %arg21: memref<28x14xf32, #tpu.memory_space<vmem>>, %arg22: memref<16x196xbf16, #tpu.memory_space<vmem>>) attributes {dimension_semantics = [#tpu.dimension_semantics<parallel>], iteration_bounds = array<i64: 1>, scalar_prefetch = 0 : i64, scratch_operands = 5 : i64, tpu.core_type = #tpu.core_type<tc>, window_params = [{transform_indices = @transform_0, window_bounds = array<i64: 16, 8, 16>}, {pipeline_mode = #tpu.pipeline_mode<synchronous>, transform_indices = @transform_1, window_bounds = array<i64: 16, 8>}, {pipeline_mode = #tpu.pipeline_mode<synchronous>, transform_indices = @transform_2, window_bounds = array<i64: 1, 8>}, {pipeline_mode = #tpu.pipeline_mode<synchronous>, transform_indices = @transform_3, window_bounds = array<i64: 1, 8>}, {pipeline_mode = #tpu.pipeline_mode<synchronous>, transform_indices = @transform_4, window_bounds = array<i64: 72, 8>}, {pipeline_mode = #tpu.pipeline_mode<synchronous>, transform_indices = @transform_5, window_bounds = array<i64: 1, 8>}, {pipeline_mode = #tpu.pipeline_mode<synchronous>, transform_indices = @transform_6, window_bounds = array<i64: 1, 8>}, {pipeline_mode = #tpu.pipeline_mode<synchronous>, transform_indices = @transform_7, window_bounds = array<i64: 8, 32>}, {pipeline_mode = #tpu.pipeline_mode<synchronous>, transform_indices = @transform_8, window_bounds = array<i64: 1, 32>}, {pipeline_mode = #tpu.pipeline_mode<synchronous>, transform_indices = @transform_9, window_bounds = array<i64: 1, 32>}, {pipeline_mode = #tpu.pipeline_mode<synchronous>, transform_indices = @transform_10, window_bounds = array<i64: 32, 2>}, {pipeline_mode = #tpu.pipeline_mode<synchronous>, transform_indices = @transform_11, window_bounds = array<i64: 2, 32>}, {pipeline_mode = #tpu.pipeline_mode<synchronous>, transform_indices = @transform_12, window_bounds = array<i64: 196, 8>}, {pipeline_mode = #tpu.pipeline_mode<synchronous>, transform_indices = @transform_13, window_bounds = array<i64: 16, 32>}, {pipeline_mode = #tpu.pipeline_mode<synchronous>, transform_indices = @transform_14, window_bounds = array<i64: 1, 32>}, {pipeline_mode = #tpu.pipeline_mode<synchronous>, transform_indices = @transform_15, window_bounds = array<i64: 1, 32>}, {transform_indices = @transform_16, window_bounds = array<i64: 16, 8, 32>}]} {
    %c0 = arith.constant 0 : index
    %c0_0 = arith.constant 0 : index
    %c0_1 = arith.constant 0 : index
    %0 = vector.load %arg1[%c0, %c0_0, %c0_1] : memref<16x8x16xf32, #tpu.memory_space<vmem>>, vector<16x8x16xf32>
    %1 = vector.shape_cast %0 : vector<16x8x16xf32> to vector<128x16xf32>
    %2 = arith.truncf %1 : vector<128x16xf32> to vector<128x16xbf16>
    %c0_2 = arith.constant 0 : index
    %c0_3 = arith.constant 0 : index
    %3 = vector.load %arg2[%c0_2, %c0_3] : memref<16x8xbf16, #tpu.memory_space<vmem>>, vector<16x8xbf16>
    %cst = arith.constant dense<0.000000e+00> : vector<128x8xf32>
    %4 = tpu.matmul %2, %3, %cst {dimension_numbers = #tpu.dot_dimension_numbers<[1], [0], [0], [1], [0, 0, 1, 1], [], []>} : vector<128x16xbf16>, vector<16x8xbf16>, vector<128x8xf32> -> vector<128x8xf32>
    %c0_4 = arith.constant 0 : index
    %c0_5 = arith.constant 0 : index
    %5 = vector.load %arg3[%c0_4, %c0_5] : memref<1x8xf32, #tpu.memory_space<vmem>>, vector<1x8xf32>
    %6 = vector.broadcast %5 : vector<1x8xf32> to vector<128x8xf32>
    %7 = arith.mulf %4, %6 : vector<128x8xf32>
    %c0_6 = arith.constant 0 : index
    %c0_7 = arith.constant 0 : index
    %8 = vector.load %arg4[%c0_6, %c0_7] : memref<1x8xf32, #tpu.memory_space<vmem>>, vector<1x8xf32>
    %9 = vector.broadcast %8 : vector<1x8xf32> to vector<128x8xf32>
    %10 = arith.addf %7, %9 : vector<128x8xf32>
    %cst_8 = arith.constant 0.000000e+00 : f32
    %11 = vector.broadcast %cst_8 : f32 to vector<128x8xf32>
    %12 = arith.maximumf %10, %11 : vector<128x8xf32>
    %13 = arith.truncf %12 : vector<128x8xf32> to vector<128x8xbf16>
    %14 = vector.shape_cast %13 : vector<128x8xbf16> to vector<16x8x8xbf16>
    %cst_9 = arith.constant 0.000000e+00 : bf16
    %15 = vector.broadcast %cst_9 : bf16 to vector<1x10x8xbf16>
    %cst_10 = arith.constant 0.000000e+00 : bf16
    %16 = vector.broadcast %cst_10 : bf16 to vector<8x1x8xbf16>
    %c0_11 = arith.constant 0 : index
    %c0_12 = arith.constant 0 : index
    %c0_13 = arith.constant 0 : index
    %17 = vector.load %arg18[%c0_11, %c0_12, %c0_13] : memref<20x10x8xbf16, #tpu.memory_space<vmem>>, vector<1x10x8xbf16>
    tpu.vector_store %arg18[%c0_11, %c0_12, %c0_13], %15 {strides = array<i32>} : memref<20x10x8xbf16, #tpu.memory_space<vmem>>, vector<1x10x8xbf16>,
    %c9 = arith.constant 9 : index
    %c0_14 = arith.constant 0 : index
    %c0_15 = arith.constant 0 : index
    %18 = vector.load %arg18[%c9, %c0_14, %c0_15] : memref<20x10x8xbf16, #tpu.memory_space<vmem>>, vector<1x10x8xbf16>
    tpu.vector_store %arg18[%c9, %c0_14, %c0_15], %15 {strides = array<i32>} : memref<20x10x8xbf16, #tpu.memory_space<vmem>>, vector<1x10x8xbf16>,
    %c1 = arith.constant 1 : index
    %c0_16 = arith.constant 0 : index
    %c0_17 = arith.constant 0 : index
    %19 = vector.load %arg18[%c1, %c0_16, %c0_17] : memref<20x10x8xbf16, #tpu.memory_space<vmem>>, vector<8x1x8xbf16>
    tpu.vector_store %arg18[%c1, %c0_16, %c0_17], %16 {strides = array<i32>} : memref<20x10x8xbf16, #tpu.memory_space<vmem>>, vector<8x1x8xbf16>,
    %c1_18 = arith.constant 1 : index
    %c9_19 = arith.constant 9 : index
    %c0_20 = arith.constant 0 : index
    %20 = vector.load %arg18[%c1_18, %c9_19, %c0_20] : memref<20x10x8xbf16, #tpu.memory_space<vmem>>, vector<8x1x8xbf16>
    tpu.vector_store %arg18[%c1_18, %c9_19, %c0_20], %16 {strides = array<i32>} : memref<20x10x8xbf16, #tpu.memory_space<vmem>>, vector<8x1x8xbf16>,
    %21 = vector.extract_strided_slice %14 {offsets = [0, 0, 0], sizes = [8, 8, 8], strides = [1, 1, 1]} : vector<16x8x8xbf16> to vector<8x8x8xbf16>
    %c1_21 = arith.constant 1 : index
    %c1_22 = arith.constant 1 : index
    %c0_23 = arith.constant 0 : index
    %22 = vector.load %arg18[%c1_21, %c1_22, %c0_23] : memref<20x10x8xbf16, #tpu.memory_space<vmem>>, vector<8x8x8xbf16>
    tpu.vector_store %arg18[%c1_21, %c1_22, %c0_23], %21 {strides = array<i32>} : memref<20x10x8xbf16, #tpu.memory_space<vmem>>, vector<8x8x8xbf16>,
    %c0_24 = arith.constant 0 : index
    %c0_25 = arith.constant 0 : index
    %c0_26 = arith.constant 0 : index
    %23 = vector.load %arg18[%c0_24, %c0_25, %c0_26] : memref<20x10x8xbf16, #tpu.memory_space<vmem>>, vector<8x8x8xbf16>
    %c0_27 = arith.constant 0 : index
    %c0_28 = arith.constant 0 : index
    %c0_29 = arith.constant 0 : index
    %24 = vector.load %arg19[%c0_27, %c0_28, %c0_29] : memref<16x8x72xbf16, #tpu.memory_space<vmem>>, vector<8x8x8xbf16>
    tpu.vector_store %arg19[%c0_27, %c0_28, %c0_29], %23 {strides = array<i32>} : memref<16x8x72xbf16, #tpu.memory_space<vmem>>, vector<8x8x8xbf16>,
    %c0_30 = arith.constant 0 : index
    %c1_31 = arith.constant 1 : index
    %c0_32 = arith.constant 0 : index
    %25 = vector.load %arg18[%c0_30, %c1_31, %c0_32] : memref<20x10x8xbf16, #tpu.memory_space<vmem>>, vector<8x8x8xbf16>
    %c0_33 = arith.constant 0 : index
    %c0_34 = arith.constant 0 : index
    %c8 = arith.constant 8 : index
    %26 = vector.load %arg19[%c0_33, %c0_34, %c8] : memref<16x8x72xbf16, #tpu.memory_space<vmem>>, vector<8x8x8xbf16>
    tpu.vector_store %arg19[%c0_33, %c0_34, %c8], %25 {strides = array<i32>} : memref<16x8x72xbf16, #tpu.memory_space<vmem>>, vector<8x8x8xbf16>,
    %c0_35 = arith.constant 0 : index
    %c2 = arith.constant 2 : index
    %c0_36 = arith.constant 0 : index
    %27 = vector.load %arg18[%c0_35, %c2, %c0_36] : memref<20x10x8xbf16, #tpu.memory_space<vmem>>, vector<8x8x8xbf16>
    %c0_37 = arith.constant 0 : index
    %c0_38 = arith.constant 0 : index
    %c16 = arith.constant 16 : index
    %28 = vector.load %arg19[%c0_37, %c0_38, %c16] : memref<16x8x72xbf16, #tpu.memory_space<vmem>>, vector<8x8x8xbf16>
    tpu.vector_store %arg19[%c0_37, %c0_38, %c16], %27 {strides = array<i32>} : memref<16x8x72xbf16, #tpu.memory_space<vmem>>, vector<8x8x8xbf16>,
    %c1_39 = arith.constant 1 : index
    %c0_40 = arith.constant 0 : index
    %c0_41 = arith.constant 0 : index
    %29 = vector.load %arg18[%c1_39, %c0_40, %c0_41] : memref<20x10x8xbf16, #tpu.memory_space<vmem>>, vector<8x8x8xbf16>
    %c0_42 = arith.constant 0 : index
    %c0_43 = arith.constant 0 : index
    %c24 = arith.constant 24 : index
    %30 = vector.load %arg19[%c0_42, %c0_43, %c24] : memref<16x8x72xbf16, #tpu.memory_space<vmem>>, vector<8x8x8xbf16>
    tpu.vector_store %arg19[%c0_42, %c0_43, %c24], %29 {strides = array<i32>} : memref<16x8x72xbf16, #tpu.memory_space<vmem>>, vector<8x8x8xbf16>,
    %c1_44 = arith.constant 1 : index
    %c1_45 = arith.constant 1 : index
    %c0_46 = arith.constant 0 : index
    %31 = vector.load %arg18[%c1_44, %c1_45, %c0_46] : memref<20x10x8xbf16, #tpu.memory_space<vmem>>, vector<8x8x8xbf16>
    %c0_47 = arith.constant 0 : index
    %c0_48 = arith.constant 0 : index
    %c32 = arith.constant 32 : index
    %32 = vector.load %arg19[%c0_47, %c0_48, %c32] : memref<16x8x72xbf16, #tpu.memory_space<vmem>>, vector<8x8x8xbf16>
    tpu.vector_store %arg19[%c0_47, %c0_48, %c32], %31 {strides = array<i32>} : memref<16x8x72xbf16, #tpu.memory_space<vmem>>, vector<8x8x8xbf16>,
    %c1_49 = arith.constant 1 : index
    %c2_50 = arith.constant 2 : index
    %c0_51 = arith.constant 0 : index
    %33 = vector.load %arg18[%c1_49, %c2_50, %c0_51] : memref<20x10x8xbf16, #tpu.memory_space<vmem>>, vector<8x8x8xbf16>
    %c0_52 = arith.constant 0 : index
    %c0_53 = arith.constant 0 : index
    %c40 = arith.constant 40 : index
    %34 = vector.load %arg19[%c0_52, %c0_53, %c40] : memref<16x8x72xbf16, #tpu.memory_space<vmem>>, vector<8x8x8xbf16>
    tpu.vector_store %arg19[%c0_52, %c0_53, %c40], %33 {strides = array<i32>} : memref<16x8x72xbf16, #tpu.memory_space<vmem>>, vector<8x8x8xbf16>,
    %c2_54 = arith.constant 2 : index
    %c0_55 = arith.constant 0 : index
    %c0_56 = arith.constant 0 : index
    %35 = vector.load %arg18[%c2_54, %c0_55, %c0_56] : memref<20x10x8xbf16, #tpu.memory_space<vmem>>, vector<8x8x8xbf16>
    %c0_57 = arith.constant 0 : index
    %c0_58 = arith.constant 0 : index
    %c48 = arith.constant 48 : index
    %36 = vector.load %arg19[%c0_57, %c0_58, %c48] : memref<16x8x72xbf16, #tpu.memory_space<vmem>>, vector<8x8x8xbf16>
    tpu.vector_store %arg19[%c0_57, %c0_58, %c48], %35 {strides = array<i32>} : memref<16x8x72xbf16, #tpu.memory_space<vmem>>, vector<8x8x8xbf16>,
    %c2_59 = arith.constant 2 : index
    %c1_60 = arith.constant 1 : index
    %c0_61 = arith.constant 0 : index
    %37 = vector.load %arg18[%c2_59, %c1_60, %c0_61] : memref<20x10x8xbf16, #tpu.memory_space<vmem>>, vector<8x8x8xbf16>
    %c0_62 = arith.constant 0 : index
    %c0_63 = arith.constant 0 : index
    %c56 = arith.constant 56 : index
    %38 = vector.load %arg19[%c0_62, %c0_63, %c56] : memref<16x8x72xbf16, #tpu.memory_space<vmem>>, vector<8x8x8xbf16>
    tpu.vector_store %arg19[%c0_62, %c0_63, %c56], %37 {strides = array<i32>} : memref<16x8x72xbf16, #tpu.memory_space<vmem>>, vector<8x8x8xbf16>,
    %c2_64 = arith.constant 2 : index
    %c2_65 = arith.constant 2 : index
    %c0_66 = arith.constant 0 : index
    %39 = vector.load %arg18[%c2_64, %c2_65, %c0_66] : memref<20x10x8xbf16, #tpu.memory_space<vmem>>, vector<8x8x8xbf16>
    %c0_67 = arith.constant 0 : index
    %c0_68 = arith.constant 0 : index
    %c64 = arith.constant 64 : index
    %40 = vector.load %arg19[%c0_67, %c0_68, %c64] : memref<16x8x72xbf16, #tpu.memory_space<vmem>>, vector<8x8x8xbf16>
    tpu.vector_store %arg19[%c0_67, %c0_68, %c64], %39 {strides = array<i32>} : memref<16x8x72xbf16, #tpu.memory_space<vmem>>, vector<8x8x8xbf16>,
    %c10 = arith.constant 10 : index
    %c0_69 = arith.constant 0 : index
    %c0_70 = arith.constant 0 : index
    %41 = vector.load %arg18[%c10, %c0_69, %c0_70] : memref<20x10x8xbf16, #tpu.memory_space<vmem>>, vector<1x10x8xbf16>
    tpu.vector_store %arg18[%c10, %c0_69, %c0_70], %15 {strides = array<i32>} : memref<20x10x8xbf16, #tpu.memory_space<vmem>>, vector<1x10x8xbf16>,
    %c19 = arith.constant 19 : index
    %c0_71 = arith.constant 0 : index
    %c0_72 = arith.constant 0 : index
    %42 = vector.load %arg18[%c19, %c0_71, %c0_72] : memref<20x10x8xbf16, #tpu.memory_space<vmem>>, vector<1x10x8xbf16>
    tpu.vector_store %arg18[%c19, %c0_71, %c0_72], %15 {strides = array<i32>} : memref<20x10x8xbf16, #tpu.memory_space<vmem>>, vector<1x10x8xbf16>,
    %c11 = arith.constant 11 : index
    %c0_73 = arith.constant 0 : index
    %c0_74 = arith.constant 0 : index
    %43 = vector.load %arg18[%c11, %c0_73, %c0_74] : memref<20x10x8xbf16, #tpu.memory_space<vmem>>, vector<8x1x8xbf16>
    tpu.vector_store %arg18[%c11, %c0_73, %c0_74], %16 {strides = array<i32>} : memref<20x10x8xbf16, #tpu.memory_space<vmem>>, vector<8x1x8xbf16>,
    %c11_75 = arith.constant 11 : index
    %c9_76 = arith.constant 9 : index
    %c0_77 = arith.constant 0 : index
    %44 = vector.load %arg18[%c11_75, %c9_76, %c0_77] : memref<20x10x8xbf16, #tpu.memory_space<vmem>>, vector<8x1x8xbf16>
    tpu.vector_store %arg18[%c11_75, %c9_76, %c0_77], %16 {strides = array<i32>} : memref<20x10x8xbf16, #tpu.memory_space<vmem>>, vector<8x1x8xbf16>,
    %45 = vector.extract_strided_slice %14 {offsets = [8, 0, 0], sizes = [8, 8, 8], strides = [1, 1, 1]} : vector<16x8x8xbf16> to vector<8x8x8xbf16>
    %c11_78 = arith.constant 11 : index
    %c1_79 = arith.constant 1 : index
    %c0_80 = arith.constant 0 : index
    %46 = vector.load %arg18[%c11_78, %c1_79, %c0_80] : memref<20x10x8xbf16, #tpu.memory_space<vmem>>, vector<8x8x8xbf16>
    tpu.vector_store %arg18[%c11_78, %c1_79, %c0_80], %45 {strides = array<i32>} : memref<20x10x8xbf16, #tpu.memory_space<vmem>>, vector<8x8x8xbf16>,
    %c10_81 = arith.constant 10 : index
    %c0_82 = arith.constant 0 : index
    %c0_83 = arith.constant 0 : index
    %47 = vector.load %arg18[%c10_81, %c0_82, %c0_83] : memref<20x10x8xbf16, #tpu.memory_space<vmem>>, vector<8x8x8xbf16>
    %c8_84 = arith.constant 8 : index
    %c0_85 = arith.constant 0 : index
    %c0_86 = arith.constant 0 : index
    %48 = vector.load %arg19[%c8_84, %c0_85, %c0_86] : memref<16x8x72xbf16, #tpu.memory_space<vmem>>, vector<8x8x8xbf16>
    tpu.vector_store %arg19[%c8_84, %c0_85, %c0_86], %47 {strides = array<i32>} : memref<16x8x72xbf16, #tpu.memory_space<vmem>>, vector<8x8x8xbf16>,
    %c10_87 = arith.constant 10 : index
    %c1_88 = arith.constant 1 : index
    %c0_89 = arith.constant 0 : index
    %49 = vector.load %arg18[%c10_87, %c1_88, %c0_89] : memref<20x10x8xbf16, #tpu.memory_space<vmem>>, vector<8x8x8xbf16>
    %c8_90 = arith.constant 8 : index
    %c0_91 = arith.constant 0 : index
    %c8_92 = arith.constant 8 : index
    %50 = vector.load %arg19[%c8_90, %c0_91, %c8_92] : memref<16x8x72xbf16, #tpu.memory_space<vmem>>, vector<8x8x8xbf16>
    tpu.vector_store %arg19[%c8_90, %c0_91, %c8_92], %49 {strides = array<i32>} : memref<16x8x72xbf16, #tpu.memory_space<vmem>>, vector<8x8x8xbf16>,
    %c10_93 = arith.constant 10 : index
    %c2_94 = arith.constant 2 : index
    %c0_95 = arith.constant 0 : index
    %51 = vector.load %arg18[%c10_93, %c2_94, %c0_95] : memref<20x10x8xbf16, #tpu.memory_space<vmem>>, vector<8x8x8xbf16>
    %c8_96 = arith.constant 8 : index
    %c0_97 = arith.constant 0 : index
    %c16_98 = arith.constant 16 : index
    %52 = vector.load %arg19[%c8_96, %c0_97, %c16_98] : memref<16x8x72xbf16, #tpu.memory_space<vmem>>, vector<8x8x8xbf16>
    tpu.vector_store %arg19[%c8_96, %c0_97, %c16_98], %51 {strides = array<i32>} : memref<16x8x72xbf16, #tpu.memory_space<vmem>>, vector<8x8x8xbf16>,
    %c11_99 = arith.constant 11 : index
    %c0_100 = arith.constant 0 : index
    %c0_101 = arith.constant 0 : index
    %53 = vector.load %arg18[%c11_99, %c0_100, %c0_101] : memref<20x10x8xbf16, #tpu.memory_space<vmem>>, vector<8x8x8xbf16>
    %c8_102 = arith.constant 8 : index
    %c0_103 = arith.constant 0 : index
    %c24_104 = arith.constant 24 : index
    %54 = vector.load %arg19[%c8_102, %c0_103, %c24_104] : memref<16x8x72xbf16, #tpu.memory_space<vmem>>, vector<8x8x8xbf16>
    tpu.vector_store %arg19[%c8_102, %c0_103, %c24_104], %53 {strides = array<i32>} : memref<16x8x72xbf16, #tpu.memory_space<vmem>>, vector<8x8x8xbf16>,
    %c11_105 = arith.constant 11 : index
    %c1_106 = arith.constant 1 : index
    %c0_107 = arith.constant 0 : index
    %55 = vector.load %arg18[%c11_105, %c1_106, %c0_107] : memref<20x10x8xbf16, #tpu.memory_space<vmem>>, vector<8x8x8xbf16>
    %c8_108 = arith.constant 8 : index
    %c0_109 = arith.constant 0 : index
    %c32_110 = arith.constant 32 : index
    %56 = vector.load %arg19[%c8_108, %c0_109, %c32_110] : memref<16x8x72xbf16, #tpu.memory_space<vmem>>, vector<8x8x8xbf16>
    tpu.vector_store %arg19[%c8_108, %c0_109, %c32_110], %55 {strides = array<i32>} : memref<16x8x72xbf16, #tpu.memory_space<vmem>>, vector<8x8x8xbf16>,
    %c11_111 = arith.constant 11 : index
    %c2_112 = arith.constant 2 : index
    %c0_113 = arith.constant 0 : index
    %57 = vector.load %arg18[%c11_111, %c2_112, %c0_113] : memref<20x10x8xbf16, #tpu.memory_space<vmem>>, vector<8x8x8xbf16>
    %c8_114 = arith.constant 8 : index
    %c0_115 = arith.constant 0 : index
    %c40_116 = arith.constant 40 : index
    %58 = vector.load %arg19[%c8_114, %c0_115, %c40_116] : memref<16x8x72xbf16, #tpu.memory_space<vmem>>, vector<8x8x8xbf16>
    tpu.vector_store %arg19[%c8_114, %c0_115, %c40_116], %57 {strides = array<i32>} : memref<16x8x72xbf16, #tpu.memory_space<vmem>>, vector<8x8x8xbf16>,
    %c12 = arith.constant 12 : index
    %c0_117 = arith.constant 0 : index
    %c0_118 = arith.constant 0 : index
    %59 = vector.load %arg18[%c12, %c0_117, %c0_118] : memref<20x10x8xbf16, #tpu.memory_space<vmem>>, vector<8x8x8xbf16>
    %c8_119 = arith.constant 8 : index
    %c0_120 = arith.constant 0 : index
    %c48_121 = arith.constant 48 : index
    %60 = vector.load %arg19[%c8_119, %c0_120, %c48_121] : memref<16x8x72xbf16, #tpu.memory_space<vmem>>, vector<8x8x8xbf16>
    tpu.vector_store %arg19[%c8_119, %c0_120, %c48_121], %59 {strides = array<i32>} : memref<16x8x72xbf16, #tpu.memory_space<vmem>>, vector<8x8x8xbf16>,
    %c12_122 = arith.constant 12 : index
    %c1_123 = arith.constant 1 : index
    %c0_124 = arith.constant 0 : index
    %61 = vector.load %arg18[%c12_122, %c1_123, %c0_124] : memref<20x10x8xbf16, #tpu.memory_space<vmem>>, vector<8x8x8xbf16>
    %c8_125 = arith.constant 8 : index
    %c0_126 = arith.constant 0 : index
    %c56_127 = arith.constant 56 : index
    %62 = vector.load %arg19[%c8_125, %c0_126, %c56_127] : memref<16x8x72xbf16, #tpu.memory_space<vmem>>, vector<8x8x8xbf16>
    tpu.vector_store %arg19[%c8_125, %c0_126, %c56_127], %61 {strides = array<i32>} : memref<16x8x72xbf16, #tpu.memory_space<vmem>>, vector<8x8x8xbf16>,
    %c12_128 = arith.constant 12 : index
    %c2_129 = arith.constant 2 : index
    %c0_130 = arith.constant 0 : index
    %63 = vector.load %arg18[%c12_128, %c2_129, %c0_130] : memref<20x10x8xbf16, #tpu.memory_space<vmem>>, vector<8x8x8xbf16>
    %c8_131 = arith.constant 8 : index
    %c0_132 = arith.constant 0 : index
    %c64_133 = arith.constant 64 : index
    %64 = vector.load %arg19[%c8_131, %c0_132, %c64_133] : memref<16x8x72xbf16, #tpu.memory_space<vmem>>, vector<8x8x8xbf16>
    tpu.vector_store %arg19[%c8_131, %c0_132, %c64_133], %63 {strides = array<i32>} : memref<16x8x72xbf16, #tpu.memory_space<vmem>>, vector<8x8x8xbf16>,
    %c0_134 = arith.constant 0 : index
    %c0_135 = arith.constant 0 : index
    %c0_136 = arith.constant 0 : index
    %65 = vector.load %arg19[%c0_134, %c0_135, %c0_136] : memref<16x8x72xbf16, #tpu.memory_space<vmem>>, vector<16x8x72xbf16>
    %66 = vector.shape_cast %65 : vector<16x8x72xbf16> to vector<128x72xbf16>
    %c0_137 = arith.constant 0 : index
    %c0_138 = arith.constant 0 : index
    %67 = vector.load %arg5[%c0_137, %c0_138] : memref<72x8xbf16, #tpu.memory_space<vmem>>, vector<72x8xbf16>
    %cst_139 = arith.constant dense<0.000000e+00> : vector<128x8xf32>
    %68 = tpu.matmul %66, %67, %cst_139 {dimension_numbers = #tpu.dot_dimension_numbers<[1], [0], [0], [1], [0, 0, 1, 1], [], []>} : vector<128x72xbf16>, vector<72x8xbf16>, vector<128x8xf32> -> vector<128x8xf32>
    %c0_140 = arith.constant 0 : index
    %c0_141 = arith.constant 0 : index
    %69 = vector.load %arg6[%c0_140, %c0_141] : memref<1x8xf32, #tpu.memory_space<vmem>>, vector<1x8xf32>
    %70 = vector.broadcast %69 : vector<1x8xf32> to vector<128x8xf32>
    %71 = arith.mulf %68, %70 : vector<128x8xf32>
    %c0_142 = arith.constant 0 : index
    %c0_143 = arith.constant 0 : index
    %72 = vector.load %arg7[%c0_142, %c0_143] : memref<1x8xf32, #tpu.memory_space<vmem>>, vector<1x8xf32>
    %73 = vector.broadcast %72 : vector<1x8xf32> to vector<128x8xf32>
    %74 = arith.addf %71, %73 : vector<128x8xf32>
    %cst_144 = arith.constant 0.000000e+00 : f32
    %75 = vector.broadcast %cst_144 : f32 to vector<128x8xf32>
    %76 = arith.maximumf %74, %75 : vector<128x8xf32>
    %77 = arith.truncf %76 : vector<128x8xf32> to vector<128x8xbf16>
    %c0_145 = arith.constant 0 : index
    %c0_146 = arith.constant 0 : index
    %78 = vector.load %arg8[%c0_145, %c0_146] : memref<8x32xbf16, #tpu.memory_space<vmem>>, vector<8x32xbf16>
    %cst_147 = arith.constant dense<0.000000e+00> : vector<128x32xf32>
    %79 = tpu.matmul %77, %78, %cst_147 {dimension_numbers = #tpu.dot_dimension_numbers<[1], [0], [0], [1], [0, 0, 1, 1], [], []>} : vector<128x8xbf16>, vector<8x32xbf16>, vector<128x32xf32> -> vector<128x32xf32>
    %c0_148 = arith.constant 0 : index
    %c0_149 = arith.constant 0 : index
    %80 = vector.load %arg9[%c0_148, %c0_149] : memref<1x32xf32, #tpu.memory_space<vmem>>, vector<1x32xf32>
    %81 = vector.broadcast %80 : vector<1x32xf32> to vector<128x32xf32>
    %82 = arith.mulf %79, %81 : vector<128x32xf32>
    %c0_150 = arith.constant 0 : index
    %c0_151 = arith.constant 0 : index
    %83 = vector.load %arg10[%c0_150, %c0_151] : memref<1x32xf32, #tpu.memory_space<vmem>>, vector<1x32xf32>
    %84 = vector.broadcast %83 : vector<1x32xf32> to vector<128x32xf32>
    %85 = arith.addf %82, %84 : vector<128x32xf32>
    %86 = vector.extract_strided_slice %85 {offsets = [0, 0], sizes = [64, 32], strides = [1, 1]} : vector<128x32xf32> to vector<64x32xf32>
    %cst_152 = arith.constant dense<0.000000e+00> : vector<32xf32>
    %87 = vector.multi_reduction <add>, %86, %cst_152 [0] : vector<64x32xf32> to vector<32xf32>
    %88 = vector.shape_cast %87 : vector<32xf32> to vector<1x32xf32>
    %cst_153 = arith.constant 6.400000e+01 : f32
    %89 = vector.broadcast %cst_153 : f32 to vector<1x32xf32>
    %90 = arith.divf %88, %89 : vector<1x32xf32>
    %cst_154 = arith.constant dense<0xFF800000> : vector<32xf32>
    %91 = vector.multi_reduction <maximumf>, %86, %cst_154 [0] : vector<64x32xf32> to vector<32xf32>
    %92 = vector.shape_cast %91 : vector<32xf32> to vector<1x32xf32>
    %93 = vector.extract_strided_slice %85 {offsets = [64, 0], sizes = [64, 32], strides = [1, 1]} : vector<128x32xf32> to vector<64x32xf32>
    %cst_155 = arith.constant dense<0.000000e+00> : vector<32xf32>
    %94 = vector.multi_reduction <add>, %93, %cst_155 [0] : vector<64x32xf32> to vector<32xf32>
    %95 = vector.shape_cast %94 : vector<32xf32> to vector<1x32xf32>
    %cst_156 = arith.constant 6.400000e+01 : f32
    %96 = vector.broadcast %cst_156 : f32 to vector<1x32xf32>
    %97 = arith.divf %95, %96 : vector<1x32xf32>
    %cst_157 = arith.constant dense<0xFF800000> : vector<32xf32>
    %98 = vector.multi_reduction <maximumf>, %93, %cst_157 [0] : vector<64x32xf32> to vector<32xf32>
    %99 = vector.shape_cast %98 : vector<32xf32> to vector<1x32xf32>
    %100 = tpu.concatenate %90, %92, %97, %99 in 0 : vector<1x32xf32>, vector<1x32xf32>, vector<1x32xf32>, vector<1x32xf32> -> vector<4x32xf32>
    %101 = arith.truncf %100 : vector<4x32xf32> to vector<4x32xbf16>
    %c0_158 = arith.constant 0 : index
    %c0_159 = arith.constant 0 : index
    %102 = vector.load %arg11[%c0_158, %c0_159] : memref<32x2xbf16, #tpu.memory_space<vmem>>, vector<32x2xbf16>
    %cst_160 = arith.constant dense<0.000000e+00> : vector<4x2xf32>
    %103 = tpu.matmul %101, %102, %cst_160 {dimension_numbers = #tpu.dot_dimension_numbers<[1], [0], [0], [1], [0, 0, 1, 1], [], []>} : vector<4x32xbf16>, vector<32x2xbf16>, vector<4x2xf32> -> vector<4x2xf32>
    %cst_161 = arith.constant 0.000000e+00 : f32
    %104 = vector.broadcast %cst_161 : f32 to vector<4x2xf32>
    %105 = arith.maximumf %103, %104 : vector<4x2xf32>
    %106 = arith.truncf %105 : vector<4x2xf32> to vector<4x2xbf16>
    %c0_162 = arith.constant 0 : index
    %c0_163 = arith.constant 0 : index
    %107 = vector.load %arg12[%c0_162, %c0_163] : memref<2x32xbf16, #tpu.memory_space<vmem>>, vector<2x32xbf16>
    %cst_164 = arith.constant dense<0.000000e+00> : vector<4x32xf32>
    %108 = tpu.matmul %106, %107, %cst_164 {dimension_numbers = #tpu.dot_dimension_numbers<[1], [0], [0], [1], [0, 0, 1, 1], [], []>} : vector<4x2xbf16>, vector<2x32xbf16>, vector<4x32xf32> -> vector<4x32xf32>
    %cst_165 = arith.constant 0.000000e+00 : f32
    %109 = vector.broadcast %cst_165 : f32 to vector<28x14xf32>
    %c0_166 = arith.constant 0 : index
    %c0_167 = arith.constant 0 : index
    %110 = vector.load %arg20[%c0_166, %c0_167] : memref<28x14xf32, #tpu.memory_space<vmem>>, vector<28x14xf32>
    tpu.vector_store %arg20[%c0_166, %c0_167], %109 {strides = array<i32>} : memref<28x14xf32, #tpu.memory_space<vmem>>, vector<28x14xf32>,
    %cst_168 = arith.constant 0.000000e+00 : f32
    %111 = vector.broadcast %cst_168 : f32 to vector<28x14xf32>
    %c0_169 = arith.constant 0 : index
    %c0_170 = arith.constant 0 : index
    %112 = vector.load %arg21[%c0_169, %c0_170] : memref<28x14xf32, #tpu.memory_space<vmem>>, vector<28x14xf32>
    tpu.vector_store %arg21[%c0_169, %c0_170], %111 {strides = array<i32>} : memref<28x14xf32, #tpu.memory_space<vmem>>, vector<28x14xf32>,
    %113 = vector.extract_strided_slice %108 {offsets = [0, 0], sizes = [1, 32], strides = [1, 1]} : vector<4x32xf32> to vector<1x32xf32>
    %114 = vector.extract_strided_slice %108 {offsets = [1, 0], sizes = [1, 32], strides = [1, 1]} : vector<4x32xf32> to vector<1x32xf32>
    %115 = arith.addf %113, %114 : vector<1x32xf32>
    %116 = arith.negf %115 : vector<1x32xf32>
    %117 = math.exp %116 : vector<1x32xf32>
    %cst_171 = arith.constant 1.000000e+00 : f32
    %118 = vector.broadcast %cst_171 : f32 to vector<1x32xf32>
    %119 = arith.addf %118, %117 : vector<1x32xf32>
    %120 = arith.divf %118, %119 : vector<1x32xf32>
    %121 = vector.extract_strided_slice %85 {offsets = [0, 0], sizes = [64, 32], strides = [1, 1]} : vector<128x32xf32> to vector<64x32xf32>
    %122 = vector.broadcast %120 : vector<1x32xf32> to vector<64x32xf32>
    %123 = arith.mulf %121, %122 : vector<64x32xf32>
    %124 = vector.shape_cast %123 : vector<64x32xf32> to vector<8x8x32xf32>
    %cst_172 = arith.constant dense<0xFF800000> : vector<8x8xf32>
    %125 = vector.multi_reduction <maximumf>, %124, %cst_172 [2] : vector<8x8x32xf32> to vector<8x8xf32>
    %c3 = arith.constant 3 : index
    %c3_173 = arith.constant 3 : index
    %126 = vector.load %arg20[%c3, %c3_173] : memref<28x14xf32, #tpu.memory_space<vmem>>, vector<8x8xf32>
    tpu.vector_store %arg20[%c3, %c3_173], %125 {strides = array<i32>} : memref<28x14xf32, #tpu.memory_space<vmem>>, vector<8x8xf32>,
    %cst_174 = arith.constant dense<0.000000e+00> : vector<8x8xf32>
    %127 = vector.multi_reduction <add>, %124, %cst_174 [2] : vector<8x8x32xf32> to vector<8x8xf32>
    %cst_175 = arith.constant 3.200000e+01 : f32
    %128 = vector.broadcast %cst_175 : f32 to vector<8x8xf32>
    %129 = arith.divf %127, %128 : vector<8x8xf32>
    %c3_176 = arith.constant 3 : index
    %c3_177 = arith.constant 3 : index
    %130 = vector.load %arg21[%c3_176, %c3_177] : memref<28x14xf32, #tpu.memory_space<vmem>>, vector<8x8xf32>
    tpu.vector_store %arg21[%c3_176, %c3_177], %129 {strides = array<i32>} : memref<28x14xf32, #tpu.memory_space<vmem>>, vector<8x8xf32>,
    %c0_178 = arith.constant 0 : index
    %c0_179 = arith.constant 0 : index
    %131 = vector.load %arg20[%c0_178, %c0_179] : memref<28x14xf32, #tpu.memory_space<vmem>>, vector<8x14xf32>
    %132 = arith.truncf %131 : vector<8x14xf32> to vector<8x14xbf16>
    %c0_180 = arith.constant 0 : index
    %c0_181 = arith.constant 0 : index
    %133 = vector.load %arg22[%c0_180, %c0_181] : memref<16x196xbf16, #tpu.memory_space<vmem>>, vector<8x14xbf16>
    tpu.vector_store %arg22[%c0_180, %c0_181], %132 {strides = array<i32>} : memref<16x196xbf16, #tpu.memory_space<vmem>>, vector<8x14xbf16>,
    %c1_182 = arith.constant 1 : index
    %c0_183 = arith.constant 0 : index
    %134 = vector.load %arg20[%c1_182, %c0_183] : memref<28x14xf32, #tpu.memory_space<vmem>>, vector<8x14xf32>
    %135 = arith.truncf %134 : vector<8x14xf32> to vector<8x14xbf16>
    %c0_184 = arith.constant 0 : index
    %c14 = arith.constant 14 : index
    %136 = vector.load %arg22[%c0_184, %c14] : memref<16x196xbf16, #tpu.memory_space<vmem>>, vector<8x14xbf16>
    tpu.vector_store %arg22[%c0_184, %c14], %135 {strides = array<i32>} : memref<16x196xbf16, #tpu.memory_space<vmem>>, vector<8x14xbf16>,
    %c2_185 = arith.constant 2 : index
    %c0_186 = arith.constant 0 : index
    %137 = vector.load %arg20[%c2_185, %c0_186] : memref<28x14xf32, #tpu.memory_space<vmem>>, vector<8x14xf32>
    %138 = arith.truncf %137 : vector<8x14xf32> to vector<8x14xbf16>
    %c0_187 = arith.constant 0 : index
    %c28 = arith.constant 28 : index
    %139 = vector.load %arg22[%c0_187, %c28] : memref<16x196xbf16, #tpu.memory_space<vmem>>, vector<8x14xbf16>
    tpu.vector_store %arg22[%c0_187, %c28], %138 {strides = array<i32>} : memref<16x196xbf16, #tpu.memory_space<vmem>>, vector<8x14xbf16>,
    %c3_188 = arith.constant 3 : index
    %c0_189 = arith.constant 0 : index
    %140 = vector.load %arg20[%c3_188, %c0_189] : memref<28x14xf32, #tpu.memory_space<vmem>>, vector<8x14xf32>
    %141 = arith.truncf %140 : vector<8x14xf32> to vector<8x14xbf16>
    %c0_190 = arith.constant 0 : index
    %c42 = arith.constant 42 : index
    %142 = vector.load %arg22[%c0_190, %c42] : memref<16x196xbf16, #tpu.memory_space<vmem>>, vector<8x14xbf16>
    tpu.vector_store %arg22[%c0_190, %c42], %141 {strides = array<i32>} : memref<16x196xbf16, #tpu.memory_space<vmem>>, vector<8x14xbf16>,
    %c4 = arith.constant 4 : index
    %c0_191 = arith.constant 0 : index
    %143 = vector.load %arg20[%c4, %c0_191] : memref<28x14xf32, #tpu.memory_space<vmem>>, vector<8x14xf32>
    %144 = arith.truncf %143 : vector<8x14xf32> to vector<8x14xbf16>
    %c0_192 = arith.constant 0 : index
    %c56_193 = arith.constant 56 : index
    %145 = vector.load %arg22[%c0_192, %c56_193] : memref<16x196xbf16, #tpu.memory_space<vmem>>, vector<8x14xbf16>
    tpu.vector_store %arg22[%c0_192, %c56_193], %144 {strides = array<i32>} : memref<16x196xbf16, #tpu.memory_space<vmem>>, vector<8x14xbf16>,
    %c5 = arith.constant 5 : index
    %c0_194 = arith.constant 0 : index
    %146 = vector.load %arg20[%c5, %c0_194] : memref<28x14xf32, #tpu.memory_space<vmem>>, vector<8x14xf32>
    %147 = arith.truncf %146 : vector<8x14xf32> to vector<8x14xbf16>
    %c0_195 = arith.constant 0 : index
    %c70 = arith.constant 70 : index
    %148 = vector.load %arg22[%c0_195, %c70] : memref<16x196xbf16, #tpu.memory_space<vmem>>, vector<8x14xbf16>
    tpu.vector_store %arg22[%c0_195, %c70], %147 {strides = array<i32>} : memref<16x196xbf16, #tpu.memory_space<vmem>>, vector<8x14xbf16>,
    %c6 = arith.constant 6 : index
    %c0_196 = arith.constant 0 : index
    %149 = vector.load %arg20[%c6, %c0_196] : memref<28x14xf32, #tpu.memory_space<vmem>>, vector<8x14xf32>
    %150 = arith.truncf %149 : vector<8x14xf32> to vector<8x14xbf16>
    %c0_197 = arith.constant 0 : index
    %c84 = arith.constant 84 : index
    %151 = vector.load %arg22[%c0_197, %c84] : memref<16x196xbf16, #tpu.memory_space<vmem>>, vector<8x14xbf16>
    tpu.vector_store %arg22[%c0_197, %c84], %150 {strides = array<i32>} : memref<16x196xbf16, #tpu.memory_space<vmem>>, vector<8x14xbf16>,
    %c0_198 = arith.constant 0 : index
    %c0_199 = arith.constant 0 : index
    %152 = vector.load %arg21[%c0_198, %c0_199] : memref<28x14xf32, #tpu.memory_space<vmem>>, vector<8x14xf32>
    %153 = arith.truncf %152 : vector<8x14xf32> to vector<8x14xbf16>
    %c0_200 = arith.constant 0 : index
    %c98 = arith.constant 98 : index
    %154 = vector.load %arg22[%c0_200, %c98] : memref<16x196xbf16, #tpu.memory_space<vmem>>, vector<8x14xbf16>
    tpu.vector_store %arg22[%c0_200, %c98], %153 {strides = array<i32>} : memref<16x196xbf16, #tpu.memory_space<vmem>>, vector<8x14xbf16>,
    %c1_201 = arith.constant 1 : index
    %c0_202 = arith.constant 0 : index
    %155 = vector.load %arg21[%c1_201, %c0_202] : memref<28x14xf32, #tpu.memory_space<vmem>>, vector<8x14xf32>
    %156 = arith.truncf %155 : vector<8x14xf32> to vector<8x14xbf16>
    %c0_203 = arith.constant 0 : index
    %c112 = arith.constant 112 : index
    %157 = vector.load %arg22[%c0_203, %c112] : memref<16x196xbf16, #tpu.memory_space<vmem>>, vector<8x14xbf16>
    tpu.vector_store %arg22[%c0_203, %c112], %156 {strides = array<i32>} : memref<16x196xbf16, #tpu.memory_space<vmem>>, vector<8x14xbf16>,
    %c2_204 = arith.constant 2 : index
    %c0_205 = arith.constant 0 : index
    %158 = vector.load %arg21[%c2_204, %c0_205] : memref<28x14xf32, #tpu.memory_space<vmem>>, vector<8x14xf32>
    %159 = arith.truncf %158 : vector<8x14xf32> to vector<8x14xbf16>
    %c0_206 = arith.constant 0 : index
    %c126 = arith.constant 126 : index
    %160 = vector.load %arg22[%c0_206, %c126] : memref<16x196xbf16, #tpu.memory_space<vmem>>, vector<8x14xbf16>
    tpu.vector_store %arg22[%c0_206, %c126], %159 {strides = array<i32>} : memref<16x196xbf16, #tpu.memory_space<vmem>>, vector<8x14xbf16>,
    %c3_207 = arith.constant 3 : index
    %c0_208 = arith.constant 0 : index
    %161 = vector.load %arg21[%c3_207, %c0_208] : memref<28x14xf32, #tpu.memory_space<vmem>>, vector<8x14xf32>
    %162 = arith.truncf %161 : vector<8x14xf32> to vector<8x14xbf16>
    %c0_209 = arith.constant 0 : index
    %c140 = arith.constant 140 : index
    %163 = vector.load %arg22[%c0_209, %c140] : memref<16x196xbf16, #tpu.memory_space<vmem>>, vector<8x14xbf16>
    tpu.vector_store %arg22[%c0_209, %c140], %162 {strides = array<i32>} : memref<16x196xbf16, #tpu.memory_space<vmem>>, vector<8x14xbf16>,
    %c4_210 = arith.constant 4 : index
    %c0_211 = arith.constant 0 : index
    %164 = vector.load %arg21[%c4_210, %c0_211] : memref<28x14xf32, #tpu.memory_space<vmem>>, vector<8x14xf32>
    %165 = arith.truncf %164 : vector<8x14xf32> to vector<8x14xbf16>
    %c0_212 = arith.constant 0 : index
    %c154 = arith.constant 154 : index
    %166 = vector.load %arg22[%c0_212, %c154] : memref<16x196xbf16, #tpu.memory_space<vmem>>, vector<8x14xbf16>
    tpu.vector_store %arg22[%c0_212, %c154], %165 {strides = array<i32>} : memref<16x196xbf16, #tpu.memory_space<vmem>>, vector<8x14xbf16>,
    %c5_213 = arith.constant 5 : index
    %c0_214 = arith.constant 0 : index
    %167 = vector.load %arg21[%c5_213, %c0_214] : memref<28x14xf32, #tpu.memory_space<vmem>>, vector<8x14xf32>
    %168 = arith.truncf %167 : vector<8x14xf32> to vector<8x14xbf16>
    %c0_215 = arith.constant 0 : index
    %c168 = arith.constant 168 : index
    %169 = vector.load %arg22[%c0_215, %c168] : memref<16x196xbf16, #tpu.memory_space<vmem>>, vector<8x14xbf16>
    tpu.vector_store %arg22[%c0_215, %c168], %168 {strides = array<i32>} : memref<16x196xbf16, #tpu.memory_space<vmem>>, vector<8x14xbf16>,
    %c6_216 = arith.constant 6 : index
    %c0_217 = arith.constant 0 : index
    %170 = vector.load %arg21[%c6_216, %c0_217] : memref<28x14xf32, #tpu.memory_space<vmem>>, vector<8x14xf32>
    %171 = arith.truncf %170 : vector<8x14xf32> to vector<8x14xbf16>
    %c0_218 = arith.constant 0 : index
    %c182 = arith.constant 182 : index
    %172 = vector.load %arg22[%c0_218, %c182] : memref<16x196xbf16, #tpu.memory_space<vmem>>, vector<8x14xbf16>
    tpu.vector_store %arg22[%c0_218, %c182], %171 {strides = array<i32>} : memref<16x196xbf16, #tpu.memory_space<vmem>>, vector<8x14xbf16>,
    %173 = vector.extract_strided_slice %108 {offsets = [2, 0], sizes = [1, 32], strides = [1, 1]} : vector<4x32xf32> to vector<1x32xf32>
    %174 = vector.extract_strided_slice %108 {offsets = [3, 0], sizes = [1, 32], strides = [1, 1]} : vector<4x32xf32> to vector<1x32xf32>
    %175 = arith.addf %173, %174 : vector<1x32xf32>
    %176 = arith.negf %175 : vector<1x32xf32>
    %177 = math.exp %176 : vector<1x32xf32>
    %cst_219 = arith.constant 1.000000e+00 : f32
    %178 = vector.broadcast %cst_219 : f32 to vector<1x32xf32>
    %179 = arith.addf %178, %177 : vector<1x32xf32>
    %180 = arith.divf %178, %179 : vector<1x32xf32>
    %181 = vector.extract_strided_slice %85 {offsets = [64, 0], sizes = [64, 32], strides = [1, 1]} : vector<128x32xf32> to vector<64x32xf32>
    %182 = vector.broadcast %180 : vector<1x32xf32> to vector<64x32xf32>
    %183 = arith.mulf %181, %182 : vector<64x32xf32>
    %184 = vector.shape_cast %183 : vector<64x32xf32> to vector<8x8x32xf32>
    %cst_220 = arith.constant dense<0xFF800000> : vector<8x8xf32>
    %185 = vector.multi_reduction <maximumf>, %184, %cst_220 [2] : vector<8x8x32xf32> to vector<8x8xf32>
    %c17 = arith.constant 17 : index
    %c3_221 = arith.constant 3 : index
    %186 = vector.load %arg20[%c17, %c3_221] : memref<28x14xf32, #tpu.memory_space<vmem>>, vector<8x8xf32>
    tpu.vector_store %arg20[%c17, %c3_221], %185 {strides = array<i32>} : memref<28x14xf32, #tpu.memory_space<vmem>>, vector<8x8xf32>,
    %cst_222 = arith.constant dense<0.000000e+00> : vector<8x8xf32>
    %187 = vector.multi_reduction <add>, %184, %cst_222 [2] : vector<8x8x32xf32> to vector<8x8xf32>
    %cst_223 = arith.constant 3.200000e+01 : f32
    %188 = vector.broadcast %cst_223 : f32 to vector<8x8xf32>
    %189 = arith.divf %187, %188 : vector<8x8xf32>
    %c17_224 = arith.constant 17 : index
    %c3_225 = arith.constant 3 : index
    %190 = vector.load %arg21[%c17_224, %c3_225] : memref<28x14xf32, #tpu.memory_space<vmem>>, vector<8x8xf32>
    tpu.vector_store %arg21[%c17_224, %c3_225], %189 {strides = array<i32>} : memref<28x14xf32, #tpu.memory_space<vmem>>, vector<8x8xf32>,
    %c14_226 = arith.constant 14 : index
    %c0_227 = arith.constant 0 : index
    %191 = vector.load %arg20[%c14_226, %c0_227] : memref<28x14xf32, #tpu.memory_space<vmem>>, vector<8x14xf32>
    %192 = arith.truncf %191 : vector<8x14xf32> to vector<8x14xbf16>
    %c8_228 = arith.constant 8 : index
    %c0_229 = arith.constant 0 : index
    %193 = vector.load %arg22[%c8_228, %c0_229] : memref<16x196xbf16, #tpu.memory_space<vmem>>, vector<8x14xbf16>
    tpu.vector_store %arg22[%c8_228, %c0_229], %192 {strides = array<i32>} : memref<16x196xbf16, #tpu.memory_space<vmem>>, vector<8x14xbf16>,
    %c15 = arith.constant 15 : index
    %c0_230 = arith.constant 0 : index
    %194 = vector.load %arg20[%c15, %c0_230] : memref<28x14xf32, #tpu.memory_space<vmem>>, vector<8x14xf32>
    %195 = arith.truncf %194 : vector<8x14xf32> to vector<8x14xbf16>
    %c8_231 = arith.constant 8 : index
    %c14_232 = arith.constant 14 : index
    %196 = vector.load %arg22[%c8_231, %c14_232] : memref<16x196xbf16, #tpu.memory_space<vmem>>, vector<8x14xbf16>
    tpu.vector_store %arg22[%c8_231, %c14_232], %195 {strides = array<i32>} : memref<16x196xbf16, #tpu.memory_space<vmem>>, vector<8x14xbf16>,
    %c16_233 = arith.constant 16 : index
    %c0_234 = arith.constant 0 : index
    %197 = vector.load %arg20[%c16_233, %c0_234] : memref<28x14xf32, #tpu.memory_space<vmem>>, vector<8x14xf32>
    %198 = arith.truncf %197 : vector<8x14xf32> to vector<8x14xbf16>
    %c8_235 = arith.constant 8 : index
    %c28_236 = arith.constant 28 : index
    %199 = vector.load %arg22[%c8_235, %c28_236] : memref<16x196xbf16, #tpu.memory_space<vmem>>, vector<8x14xbf16>
    tpu.vector_store %arg22[%c8_235, %c28_236], %198 {strides = array<i32>} : memref<16x196xbf16, #tpu.memory_space<vmem>>, vector<8x14xbf16>,
    %c17_237 = arith.constant 17 : index
    %c0_238 = arith.constant 0 : index
    %200 = vector.load %arg20[%c17_237, %c0_238] : memref<28x14xf32, #tpu.memory_space<vmem>>, vector<8x14xf32>
    %201 = arith.truncf %200 : vector<8x14xf32> to vector<8x14xbf16>
    %c8_239 = arith.constant 8 : index
    %c42_240 = arith.constant 42 : index
    %202 = vector.load %arg22[%c8_239, %c42_240] : memref<16x196xbf16, #tpu.memory_space<vmem>>, vector<8x14xbf16>
    tpu.vector_store %arg22[%c8_239, %c42_240], %201 {strides = array<i32>} : memref<16x196xbf16, #tpu.memory_space<vmem>>, vector<8x14xbf16>,
    %c18 = arith.constant 18 : index
    %c0_241 = arith.constant 0 : index
    %203 = vector.load %arg20[%c18, %c0_241] : memref<28x14xf32, #tpu.memory_space<vmem>>, vector<8x14xf32>
    %204 = arith.truncf %203 : vector<8x14xf32> to vector<8x14xbf16>
    %c8_242 = arith.constant 8 : index
    %c56_243 = arith.constant 56 : index
    %205 = vector.load %arg22[%c8_242, %c56_243] : memref<16x196xbf16, #tpu.memory_space<vmem>>, vector<8x14xbf16>
    tpu.vector_store %arg22[%c8_242, %c56_243], %204 {strides = array<i32>} : memref<16x196xbf16, #tpu.memory_space<vmem>>, vector<8x14xbf16>,
    %c19_244 = arith.constant 19 : index
    %c0_245 = arith.constant 0 : index
    %206 = vector.load %arg20[%c19_244, %c0_245] : memref<28x14xf32, #tpu.memory_space<vmem>>, vector<8x14xf32>
    %207 = arith.truncf %206 : vector<8x14xf32> to vector<8x14xbf16>
    %c8_246 = arith.constant 8 : index
    %c70_247 = arith.constant 70 : index
    %208 = vector.load %arg22[%c8_246, %c70_247] : memref<16x196xbf16, #tpu.memory_space<vmem>>, vector<8x14xbf16>
    tpu.vector_store %arg22[%c8_246, %c70_247], %207 {strides = array<i32>} : memref<16x196xbf16, #tpu.memory_space<vmem>>, vector<8x14xbf16>,
    %c20 = arith.constant 20 : index
    %c0_248 = arith.constant 0 : index
    %209 = vector.load %arg20[%c20, %c0_248] : memref<28x14xf32, #tpu.memory_space<vmem>>, vector<8x14xf32>
    %210 = arith.truncf %209 : vector<8x14xf32> to vector<8x14xbf16>
    %c8_249 = arith.constant 8 : index
    %c84_250 = arith.constant 84 : index
    %211 = vector.load %arg22[%c8_249, %c84_250] : memref<16x196xbf16, #tpu.memory_space<vmem>>, vector<8x14xbf16>
    tpu.vector_store %arg22[%c8_249, %c84_250], %210 {strides = array<i32>} : memref<16x196xbf16, #tpu.memory_space<vmem>>, vector<8x14xbf16>,
    %c14_251 = arith.constant 14 : index
    %c0_252 = arith.constant 0 : index
    %212 = vector.load %arg21[%c14_251, %c0_252] : memref<28x14xf32, #tpu.memory_space<vmem>>, vector<8x14xf32>
    %213 = arith.truncf %212 : vector<8x14xf32> to vector<8x14xbf16>
    %c8_253 = arith.constant 8 : index
    %c98_254 = arith.constant 98 : index
    %214 = vector.load %arg22[%c8_253, %c98_254] : memref<16x196xbf16, #tpu.memory_space<vmem>>, vector<8x14xbf16>
    tpu.vector_store %arg22[%c8_253, %c98_254], %213 {strides = array<i32>} : memref<16x196xbf16, #tpu.memory_space<vmem>>, vector<8x14xbf16>,
    %c15_255 = arith.constant 15 : index
    %c0_256 = arith.constant 0 : index
    %215 = vector.load %arg21[%c15_255, %c0_256] : memref<28x14xf32, #tpu.memory_space<vmem>>, vector<8x14xf32>
    %216 = arith.truncf %215 : vector<8x14xf32> to vector<8x14xbf16>
    %c8_257 = arith.constant 8 : index
    %c112_258 = arith.constant 112 : index
    %217 = vector.load %arg22[%c8_257, %c112_258] : memref<16x196xbf16, #tpu.memory_space<vmem>>, vector<8x14xbf16>
    tpu.vector_store %arg22[%c8_257, %c112_258], %216 {strides = array<i32>} : memref<16x196xbf16, #tpu.memory_space<vmem>>, vector<8x14xbf16>,
    %c16_259 = arith.constant 16 : index
    %c0_260 = arith.constant 0 : index
    %218 = vector.load %arg21[%c16_259, %c0_260] : memref<28x14xf32, #tpu.memory_space<vmem>>, vector<8x14xf32>
    %219 = arith.truncf %218 : vector<8x14xf32> to vector<8x14xbf16>
    %c8_261 = arith.constant 8 : index
    %c126_262 = arith.constant 126 : index
    %220 = vector.load %arg22[%c8_261, %c126_262] : memref<16x196xbf16, #tpu.memory_space<vmem>>, vector<8x14xbf16>
    tpu.vector_store %arg22[%c8_261, %c126_262], %219 {strides = array<i32>} : memref<16x196xbf16, #tpu.memory_space<vmem>>, vector<8x14xbf16>,
    %c17_263 = arith.constant 17 : index
    %c0_264 = arith.constant 0 : index
    %221 = vector.load %arg21[%c17_263, %c0_264] : memref<28x14xf32, #tpu.memory_space<vmem>>, vector<8x14xf32>
    %222 = arith.truncf %221 : vector<8x14xf32> to vector<8x14xbf16>
    %c8_265 = arith.constant 8 : index
    %c140_266 = arith.constant 140 : index
    %223 = vector.load %arg22[%c8_265, %c140_266] : memref<16x196xbf16, #tpu.memory_space<vmem>>, vector<8x14xbf16>
    tpu.vector_store %arg22[%c8_265, %c140_266], %222 {strides = array<i32>} : memref<16x196xbf16, #tpu.memory_space<vmem>>, vector<8x14xbf16>,
    %c18_267 = arith.constant 18 : index
    %c0_268 = arith.constant 0 : index
    %224 = vector.load %arg21[%c18_267, %c0_268] : memref<28x14xf32, #tpu.memory_space<vmem>>, vector<8x14xf32>
    %225 = arith.truncf %224 : vector<8x14xf32> to vector<8x14xbf16>
    %c8_269 = arith.constant 8 : index
    %c154_270 = arith.constant 154 : index
    %226 = vector.load %arg22[%c8_269, %c154_270] : memref<16x196xbf16, #tpu.memory_space<vmem>>, vector<8x14xbf16>
    tpu.vector_store %arg22[%c8_269, %c154_270], %225 {strides = array<i32>} : memref<16x196xbf16, #tpu.memory_space<vmem>>, vector<8x14xbf16>,
    %c19_271 = arith.constant 19 : index
    %c0_272 = arith.constant 0 : index
    %227 = vector.load %arg21[%c19_271, %c0_272] : memref<28x14xf32, #tpu.memory_space<vmem>>, vector<8x14xf32>
    %228 = arith.truncf %227 : vector<8x14xf32> to vector<8x14xbf16>
    %c8_273 = arith.constant 8 : index
    %c168_274 = arith.constant 168 : index
    %229 = vector.load %arg22[%c8_273, %c168_274] : memref<16x196xbf16, #tpu.memory_space<vmem>>, vector<8x14xbf16>
    tpu.vector_store %arg22[%c8_273, %c168_274], %228 {strides = array<i32>} : memref<16x196xbf16, #tpu.memory_space<vmem>>, vector<8x14xbf16>,
    %c20_275 = arith.constant 20 : index
    %c0_276 = arith.constant 0 : index
    %230 = vector.load %arg21[%c20_275, %c0_276] : memref<28x14xf32, #tpu.memory_space<vmem>>, vector<8x14xf32>
    %231 = arith.truncf %230 : vector<8x14xf32> to vector<8x14xbf16>
    %c8_277 = arith.constant 8 : index
    %c182_278 = arith.constant 182 : index
    %232 = vector.load %arg22[%c8_277, %c182_278] : memref<16x196xbf16, #tpu.memory_space<vmem>>, vector<8x14xbf16>
    tpu.vector_store %arg22[%c8_277, %c182_278], %231 {strides = array<i32>} : memref<16x196xbf16, #tpu.memory_space<vmem>>, vector<8x14xbf16>,
    %233 = tpu.concatenate %124, %184 in 0 : vector<8x8x32xf32>, vector<8x8x32xf32> -> vector<16x8x32xf32>
    %c0_279 = arith.constant 0 : index
    %c0_280 = arith.constant 0 : index
    %234 = vector.load %arg22[%c0_279, %c0_280] : memref<16x196xbf16, #tpu.memory_space<vmem>>, vector<16x196xbf16>
    %c0_281 = arith.constant 0 : index
    %c0_282 = arith.constant 0 : index
    %235 = vector.load %arg13[%c0_281, %c0_282] : memref<196x8xbf16, #tpu.memory_space<vmem>>, vector<196x8xbf16>
    %cst_283 = arith.constant dense<0.000000e+00> : vector<16x8xf32>
    %236 = tpu.matmul %234, %235, %cst_283 {dimension_numbers = #tpu.dot_dimension_numbers<[1], [0], [0], [1], [0, 0, 1, 1], [], []>} : vector<16x196xbf16>, vector<196x8xbf16>, vector<16x8xf32> -> vector<16x8xf32>
    %237 = arith.negf %236 : vector<16x8xf32>
    %238 = math.exp %237 : vector<16x8xf32>
    %cst_284 = arith.constant 1.000000e+00 : f32
    %239 = vector.broadcast %cst_284 : f32 to vector<16x8xf32>
    %240 = arith.addf %239, %238 : vector<16x8xf32>
    %241 = arith.divf %239, %240 : vector<16x8xf32>
    %242 = vector.shape_cast %241 : vector<16x8xf32> to vector<16x8x1xf32>
    %243 = vector.broadcast %242 : vector<16x8x1xf32> to vector<16x8x32xf32>
    %244 = arith.mulf %233, %243 : vector<16x8x32xf32>
    %c0_285 = arith.constant 0 : index
    %c0_286 = arith.constant 0 : index
    %c0_287 = arith.constant 0 : index
    %245 = vector.load %arg1[%c0_285, %c0_286, %c0_287] : memref<16x8x16xf32, #tpu.memory_space<vmem>>, vector<16x8x16xf32>
    %246 = vector.shape_cast %245 : vector<16x8x16xf32> to vector<128x16xf32>
    %247 = arith.truncf %246 : vector<128x16xf32> to vector<128x16xbf16>
    %c0_288 = arith.constant 0 : index
    %c0_289 = arith.constant 0 : index
    %248 = vector.load %arg14[%c0_288, %c0_289] : memref<16x32xbf16, #tpu.memory_space<vmem>>, vector<16x32xbf16>
    %cst_290 = arith.constant dense<0.000000e+00> : vector<128x32xf32>
    %249 = tpu.matmul %247, %248, %cst_290 {dimension_numbers = #tpu.dot_dimension_numbers<[1], [0], [0], [1], [0, 0, 1, 1], [], []>} : vector<128x16xbf16>, vector<16x32xbf16>, vector<128x32xf32> -> vector<128x32xf32>
    %c0_291 = arith.constant 0 : index
    %c0_292 = arith.constant 0 : index
    %250 = vector.load %arg15[%c0_291, %c0_292] : memref<1x32xf32, #tpu.memory_space<vmem>>, vector<1x32xf32>
    %251 = vector.broadcast %250 : vector<1x32xf32> to vector<128x32xf32>
    %252 = arith.mulf %249, %251 : vector<128x32xf32>
    %c0_293 = arith.constant 0 : index
    %c0_294 = arith.constant 0 : index
    %253 = vector.load %arg16[%c0_293, %c0_294] : memref<1x32xf32, #tpu.memory_space<vmem>>, vector<1x32xf32>
    %254 = vector.broadcast %253 : vector<1x32xf32> to vector<128x32xf32>
    %255 = arith.addf %252, %254 : vector<128x32xf32>
    %256 = vector.shape_cast %255 : vector<128x32xf32> to vector<16x8x32xf32>
    %257 = arith.addf %244, %256 : vector<16x8x32xf32>
    %cst_295 = arith.constant 0.000000e+00 : f32
    %258 = vector.broadcast %cst_295 : f32 to vector<16x8x32xf32>
    %259 = arith.maximumf %257, %258 : vector<16x8x32xf32>
    %c0_296 = arith.constant 0 : index
    %c0_297 = arith.constant 0 : index
    %c0_298 = arith.constant 0 : index
    %260 = vector.load %arg17[%c0_296, %c0_297, %c0_298] : memref<16x8x32xf32, #tpu.memory_space<vmem>>, vector<16x8x32xf32>
    tpu.vector_store %arg17[%c0_296, %c0_297, %c0_298], %259 {strides = array<i32>} : memref<16x8x32xf32, #tpu.memory_space<vmem>>, vector<16x8x32xf32>,
    return
  }
  func.func @transform_0(%arg0: i32) -> (i32, i32, i32) {
    %c0_i32 = arith.constant 0 : i32
    %c0_i32_0 = arith.constant 0 : i32
    %c0_i32_1 = arith.constant 0 : i32
    return %arg0, %c0_i32, %c0_i32_0 : i32, i32, i32
  }
  func.func @transform_1(%arg0: i32) -> (i32, i32) {
    %c0_i32 = arith.constant 0 : i32
    %c0_i32_0 = arith.constant 0 : i32
    %c0_i32_1 = arith.constant 0 : i32
    return %c0_i32, %c0_i32_0 : i32, i32
  }
  func.func @transform_2(%arg0: i32) -> (i32, i32) {
    %c0_i32 = arith.constant 0 : i32
    %c0_i32_0 = arith.constant 0 : i32
    %c0_i32_1 = arith.constant 0 : i32
    return %c0_i32, %c0_i32_0 : i32, i32
  }
  func.func @transform_3(%arg0: i32) -> (i32, i32) {
    %c0_i32 = arith.constant 0 : i32
    %c0_i32_0 = arith.constant 0 : i32
    %c0_i32_1 = arith.constant 0 : i32
    return %c0_i32, %c0_i32_0 : i32, i32
  }
  func.func @transform_4(%arg0: i32) -> (i32, i32) {
    %c0_i32 = arith.constant 0 : i32
    %c0_i32_0 = arith.constant 0 : i32
    %c0_i32_1 = arith.constant 0 : i32
    return %c0_i32, %c0_i32_0 : i32, i32
  }
  func.func @transform_5(%arg0: i32) -> (i32, i32) {
    %c0_i32 = arith.constant 0 : i32
    %c0_i32_0 = arith.constant 0 : i32
    %c0_i32_1 = arith.constant 0 : i32
    return %c0_i32, %c0_i32_0 : i32, i32
  }
  func.func @transform_6(%arg0: i32) -> (i32, i32) {
    %c0_i32 = arith.constant 0 : i32
    %c0_i32_0 = arith.constant 0 : i32
    %c0_i32_1 = arith.constant 0 : i32
    return %c0_i32, %c0_i32_0 : i32, i32
  }
  func.func @transform_7(%arg0: i32) -> (i32, i32) {
    %c0_i32 = arith.constant 0 : i32
    %c0_i32_0 = arith.constant 0 : i32
    %c0_i32_1 = arith.constant 0 : i32
    return %c0_i32, %c0_i32_0 : i32, i32
  }
  func.func @transform_8(%arg0: i32) -> (i32, i32) {
    %c0_i32 = arith.constant 0 : i32
    %c0_i32_0 = arith.constant 0 : i32
    %c0_i32_1 = arith.constant 0 : i32
    return %c0_i32, %c0_i32_0 : i32, i32
  }
  func.func @transform_9(%arg0: i32) -> (i32, i32) {
    %c0_i32 = arith.constant 0 : i32
    %c0_i32_0 = arith.constant 0 : i32
    %c0_i32_1 = arith.constant 0 : i32
    return %c0_i32, %c0_i32_0 : i32, i32
  }
  func.func @transform_10(%arg0: i32) -> (i32, i32) {
    %c0_i32 = arith.constant 0 : i32
    %c0_i32_0 = arith.constant 0 : i32
    %c0_i32_1 = arith.constant 0 : i32
    return %c0_i32, %c0_i32_0 : i32, i32
  }
  func.func @transform_11(%arg0: i32) -> (i32, i32) {
    %c0_i32 = arith.constant 0 : i32
    %c0_i32_0 = arith.constant 0 : i32
    %c0_i32_1 = arith.constant 0 : i32
    return %c0_i32, %c0_i32_0 : i32, i32
  }
  func.func @transform_12(%arg0: i32) -> (i32, i32) {
    %c0_i32 = arith.constant 0 : i32
    %c0_i32_0 = arith.constant 0 : i32
    %c0_i32_1 = arith.constant 0 : i32
    return %c0_i32, %c0_i32_0 : i32, i32
  }
  func.func @transform_13(%arg0: i32) -> (i32, i32) {
    %c0_i32 = arith.constant 0 : i32
    %c0_i32_0 = arith.constant 0 : i32
    %c0_i32_1 = arith.constant 0 : i32
    return %c0_i32, %c0_i32_0 : i32, i32
  }
  func.func @transform_14(%arg0: i32) -> (i32, i32) {
    %c0_i32 = arith.constant 0 : i32
    %c0_i32_0 = arith.constant 0 : i32
    %c0_i32_1 = arith.constant 0 : i32
    return %c0_i32, %c0_i32_0 : i32, i32
  }
  func.func @transform_15(%arg0: i32) -> (i32, i32) {
    %c0_i32 = arith.constant 0 : i32
    %c0_i32_0 = arith.constant 0 : i32
    %c0_i32_1 = arith.constant 0 : i32
    return %c0_i32, %c0_i32_0 : i32, i32
  }
  func.func @transform_16(%arg0: i32) -> (i32, i32, i32) {
    %c0_i32 = arith.constant 0 : i32
    %c0_i32_0 = arith.constant 0 : i32
    %c0_i32_1 = arith.constant 0 : i32
    return %arg0, %c0_i32, %c0_i32_0 : i32, i32, i32
  }
}

</mosaic_0001>

<bundles_post_ra>
// kernel: tpu_custom_call.1
= control target key start
LH: loop header
LB: loop body
LE: loop exit
PB: predicated region body
PF: predicated region fallthrough
CT: control target
= control target key end

     0   :  { %s6559_s0 = inlined_call_operand.vmem [shape: f32[16,8,16], index: 0, kind: input, shape index: {}]   ;;  %s6560_s1 = inlined_call_operand.vmem [shape: bf16[16,8], index: 1, kind: input, shape index: {}]   ;;  %s6561_s2 = inlined_call_operand.vmem [shape: f32[1,8], index: 2, kind: input, shape index: {}]   ;;  %s6562_s3 = inlined_call_operand.vmem [shape: f32[1,8], index: 3, kind: input, shape index: {}]   ;;  %s6563_s4 = inlined_call_operand.vmem [shape: bf16[72,8], index: 4, kind: input, shape index: {}]   ;;  %s6564_s5 = inlined_call_operand.vmem [shape: f32[1,8], index: 5, kind: input, shape index: {}]   ;;  %s6565_s6 = inlined_call_operand.vmem [shape: f32[1,8], index: 6, kind: input, shape index: {}]   ;;  %s6566_s7 = inlined_call_operand.vmem [shape: bf16[8,32], index: 7, kind: input, shape index: {}]   ;;  %s6567_s8 = inlined_call_operand.vmem [shape: f32[1,32], index: 8, kind: input, shape index: {}]   ;;  %s6568_s9 = inlined_call_operand.vmem [shape: f32[1,32], index: 9, kind: input, shape index: {}]   ;;  %s6569_s10 = inlined_call_operand.vmem [shape: bf16[32,2], index: 10, kind: input, shape index: {}]   ;;  %s6570_s11 = inlined_call_operand.vmem [shape: bf16[2,32], index: 11, kind: input, shape index: {}]   ;;  %s6571_s12 = inlined_call_operand.vmem [shape: bf16[196,8], index: 12, kind: input, shape index: {}]   ;;  %s6572_s13 = inlined_call_operand.vmem [shape: bf16[16,32], index: 13, kind: input, shape index: {}]   ;;  %s6573_s14 = inlined_call_operand.vmem [shape: f32[1,32], index: 14, kind: input, shape index: {}]   ;;  %s6574_s15 = inlined_call_operand.vmem [shape: f32[1,32], index: 15, kind: input, shape index: {}]   ;;  %s6575_s16 = inlined_call_operand.hbm [shape: f32[16,8,32], index: 16, kind: output, shape index: {}]  }
   0x1   :  { %6577 = sst [smem:[#allocation10_spill]] %s6559_s0 }
   0x2   :  { %v4607_v0 = vld [vmem:[%s6560_s1] sm:$0xff]   ;;  %vm87_vm0 = vcmask 130048   ;;  %s6578_s25 = sld [smem:[#allocation10_spill]]  ;;  %vm319_vm1 = vcmask 60416   ;;  %vm321_vm2 = vcmask 57344   ;;  %v4673_v8 = vmov 0  }
   0x3   :  { %4487 = vmatprep.subr.bf16.mxu0 %v4607_v0  ;;  %320 = vst.msk [vmem:[#allocation2] sm:$0xf] %vm319_vm1, %v4673_v8  ;;  %324 = vst.msk [vmem:[#allocation2 + $0x48] sm:$0xf] %vm319_vm1, %v4673_v8  ;;  %vm722_vm3 = vcmask 1042432   ;;  %vm723_vm4 = vcmask 1046532  }
   0x4   :  { %322 = vst.msk [vmem:[#allocation2 + $0x4] sm:$0x1] %vm321_vm2, %v4673_v8  ;;  %325 = vst.msk [vmem:[#allocation2 + $0x4c] sm:$0x1] %vm321_vm2, %v4673_v8  ;;  %4488 = vmatpush3.bf16.msra.mxu0 %v4607_v0  ;;  %s4674_s17 = smov 16  }
   0x5   :  { %1406 = vst.msk [vmem:[#allocation2 + $0x50] sm:$0xf] %vm319_vm1, %v4673_v8  ;;  %1409 = vst.msk [vmem:[#allocation2 + $0x98] sm:$0xf] %vm319_vm1, %v4673_v8 }
   0x6   :  { %1407 = vst.msk [vmem:[#allocation2 + $0x54] sm:$0x1] %vm321_vm2, %v4673_v8  ;;  %1410 = vst.msk [vmem:[#allocation2 + $0x9c] sm:$0x1] %vm321_vm2, %v4673_v8 }
   0x7   :  { %vm4835_vm5 = vmor %vm722_vm3, %vm723_vm4 }
   0x8   :  { %v55_v1 = vld [vmem:[%s6578_s25] sm:$0xff]  ;;  %v56_v2 = vld [vmem:[%s6578_s25 + $0x8] sm:$0xff]  ;;  %v57_v3 = vld [vmem:[%s6578_s25 + $0x10] sm:$0xff] }
   0x9   :  { %v71_v4 = vpack.c.bf16 %v56_v2, %v55_v1  ;;  %v58_v5 = vld [vmem:[%s6578_s25 + $0x18] sm:$0xff]  ;;  %v59_v6 = vld [vmem:[%s6578_s25 + $0x20] sm:$0xff]  ;;  %v60_v7 = vld [vmem:[%s6578_s25 + $0x28] sm:$0xff] }
   0xa   :  { %v72_v9 = vpack.c.bf16 %v58_v5, %v57_v3  ;;  %v73_v10 = vpack.c.bf16 %v60_v7, %v59_v6  ;;  %v61_v11 = vld [vmem:[%s6578_s25 + $0x30] sm:$0xff]  ;;  %v62_v12 = vld [vmem:[%s6578_s25 + $0x38] sm:$0xff]  ;;  %v63_v13 = vld [vmem:[%s6578_s25 + $0x40] sm:$0xff] }
   0xb   :  { %4489 = vmatprep.mubr.msk.bf16.mxu0 %vm87_vm0, %v71_v4  ;;  %v64_v14 = vld [vmem:[%s6578_s25 + $0x48] sm:$0xff]  ;;  %v690_v16 = vld [vmem:[#allocation2] sm:$0xe]  ;;  %v691_v17 = vld [vmem:[#allocation2 + $0x4] sm:$0x1]  ;;  %v74_v18 = vpack.c.bf16 %v62_v12, %v61_v11 }
   0xc   :  { %4490 = vmatmul.mubr.msk.bf16.vlgmr.msra.gmra.mrb[0].mxu0 %vm87_vm0, %v72_v9  ;;  %v4313_v19 = vrot.slane %v690_v16, 9  ;;  %v727_v20 = vrot.slane %v691_v17, 5  ;;  %v75_v21 = vpack.c.bf16 %v64_v14, %v63_v13  ;;  %v65_v23 = vld [vmem:[%s6578_s25 + $0x50] sm:$0xff]  ;;  %v66_v24 = vld [vmem:[%s6578_s25 + $0x58] sm:$0xff]  ;;  %v67_v25 = vld [vmem:[%s6578_s25 + $0x60] sm:$0xff] }
   0xd   :  { %4493 = vmatprep.mubr.msk.bf16.mxu0 %vm87_vm0, %v73_v10  ;;  %v68_v26 = vld [vmem:[%s6578_s25 + $0x68] sm:$0xff]  ;;  %v76_v27 = vpack.c.bf16 %v66_v24, %v65_v23 }
   0xe   :  { %v728_v22 = vsel %vm4835_vm5, %v4313_v19, %v727_v20  ;;  %v77_v28 = vpack.c.bf16 %v68_v26, %v67_v25 }
   0xf   :  { %757 = vrot.lane.b32.xlu0 %v728_v22, %s4674_s17 }
  0x14   :  { %4494 = vmatmul.mubr.msk.bf16.gmra.mrb[4].mxu0 %vm87_vm0, %v74_v18 }
  0x15   :  { %4497 = vmatprep.mubr.msk.bf16.mxu0 %vm87_vm0, %v75_v21 }
  0x16   :  { %21 = vsyncpa [#allocation8], 0  ;;  %v69_v29 = vld [vmem:[%s6578_s25 + $0x70] sm:$0xff]  ;;  %v70_v30 = vld [vmem:[%s6578_s25 + $0x78] sm:$0xff]  ;;  %vm328_vm6 = vsmask.f32 256 }
  0x17   :  { %v78_v31 = vpack.c.bf16 %v70_v30, %v69_v29  ;;  %v526_v32 = vld [vmem:[#allocation2] sm:$0xf]  ;;  %vm354_vm7 = vsmask.f32 7938  ;;  %v1765_v35 = vld [vmem:[#allocation2 + $0x50] sm:$0xe]  ;;  %vm4866_vm8 = vmand %vm321_vm2, %vm328_vm6 }
  0x18   :  { %v546_v33 = vshrl.u32 %v526_v32, 16  ;;  %v549_v34 = vshll.u32 %v526_v32, 16  ;;  %v1766_v36 = vld [vmem:[#allocation2 + $0x54] sm:$0x1]  ;;  %v4337_v37 = vrot.slane %v1765_v35, 9  ;;  %vm4874_vm9 = vmand %vm321_vm2, %vm354_vm7  ;;  %s4675_s27 = smov 48  }
  0x19   :  { %v1799_v38 = vrot.slane %v1766_v36, 5  ;;  %v527_v41 = vld [vmem:[#allocation2 + $0x4] sm:$0x1]  ;;  %v1605_v42 = vld [vmem:[#allocation2 + $0x50] sm:$0xf]  ;;  %s4676_s28 = smov 8   ;;  %vm4979_vm14 = vmand %vm319_vm1, %vm354_vm7 }
  0x1a   :  { %v548_v39 = vrot.slane %v546_v33, 4  ;;  %v551_v40 = vrot.slane %v549_v34, 5  ;;  %v555_v46 = vshll.u32 %v527_v41, 16  ;;  %v1622_v47 = vshrl.u32 %v1605_v42, 16  ;;  %v1105_v49 = vld [vmem:[#allocation2 + $0x48] sm:$0xf] }
  0x1b   :  { %v1800_v44 = vsel %vm4835_vm5, %v4337_v37, %v1799_v38  ;;  %v1625_v50 = vshll.u32 %v1605_v42, 16  ;;  %1128 = vrot.lane.b32.xlu1 %v1105_v49, %s4675_s27  ;;  %vm542_vm10 = vsmask.f32 3328  ;;  %vm543_vm11 = vsmask.f32 7440  ;;  %s4677_s29 = smov 64  }
  0x1c   :  { %4498 = vmatmul.mubr.msk.bf16.gmra.mrb[8].mxu0 %vm87_vm0, %v76_v27  ;;  %v552_v45 = vor.u32 %v551_v40, %v548_v39  ;;  %1829 = vrot.lane.b32.xlu0 %v1800_v44, %s4674_s17  ;;  %v557_v52 = vrot.slane %v555_v46, 5  ;;  %v336_v53 = vld [vmem:[#allocation2 + $0x18] sm:$0x1]  ;;  %v362_v54 = vld [vmem:[#allocation2 + $0x1c] sm:$0x1]  ;;  %vm4880_vm12 = vmor %vm542_vm10, %vm543_vm11  ;;  %v1624_v56 = vrot.slane %v1622_v47, 4 }
  0x1d   :  { %4501 = vmatprep.mubr.msk.bf16.mxu0 %vm87_vm0, %v77_v28  ;;  %v1627_v57 = vrot.slane %v1625_v50, 5  ;;  %v337_v58 = vsel %vm4866_vm8, 0, %v336_v53  ;;  %v363_v59 = vsel %vm4874_vm9, 0, %v362_v54  ;;  %v330_v60 = vld [vmem:[#allocation2 + $0x8] sm:$0x1]  ;;  %s4678_s30 = smov 56  }
  0x1e   :  { %v553_v51 = vrot.slane %v552_v45, 4  ;;  %v356_v61 = vld [vmem:[#allocation2 + $0xc] sm:$0x1]  ;;  %338 = vst [vmem:[#allocation2 + $0x18] sm:$0x1] %v337_v58  ;;  %v331_v62 = vsel %vm4866_vm8, 0, %v330_v60 }
  0x1f   :  { %364 = vst [vmem:[#allocation2 + $0x1c] sm:$0x1] %v363_v59  ;;  %v357_v63 = vsel %vm4874_vm9, 0, %v356_v61  ;;  %v339_v0 = vld [vmem:[#allocation2 + $0x20] sm:$0x1]  ;;  %v1628_v3 = vor.u32 %v1627_v57, %v1624_v56  ;;  %vm681_vm13 = vcmask 126016  }
  0x20   :  { %v365_v1 = vld [vmem:[#allocation2 + $0x24] sm:$0x1]  ;;  %v558_v2 = vsel %vm4880_vm12, %v553_v51, %v557_v52  ;;  %332 = vst [vmem:[#allocation2 + $0x8] sm:$0x1] %v331_v62  ;;  %358 = vst [vmem:[#allocation2 + $0xc] sm:$0x1] %v357_v63 }
  0x21   :  { %v340_v4 = vsel %vm4866_vm8, 0, %v339_v0  ;;  %v366_v5 = vsel %vm4874_vm9, 0, %v365_v1  ;;  %v333_v6 = vld [vmem:[#allocation2 + $0x10] sm:$0x1]  ;;  %v359_v7 = vld [vmem:[#allocation2 + $0x14] sm:$0x1]  ;;  %657 = vrot.lane.b32.xlu0 %v558_v2, %s4676_s28 }
  0x22   :  { %341 = vst [vmem:[#allocation2 + $0x20] sm:$0x1] %v340_v4  ;;  %367 = vst [vmem:[#allocation2 + $0x24] sm:$0x1] %v366_v5  ;;  %v334_v9 = vsel %vm4866_vm8, 0, %v333_v6  ;;  %v360_v10 = vsel %vm4874_vm9, 0, %v359_v7 }
  0x23   :  { %v2173_v11 = vld [vmem:[#allocation2 + $0x98] sm:$0xf]  ;;  %v1629_v12 = vrot.slane %v1628_v3, 4  ;;  %335 = vst [vmem:[#allocation2 + $0x10] sm:$0x1] %v334_v9  ;;  %s4681_s20 = smov 32  }
  0x24   :  { %4502 = vmatmul.mubr.msk.bf16.gmra.mrb[12].mxu0 %vm87_vm0, %v78_v31  ;;  %361 = vst [vmem:[#allocation2 + $0x14] sm:$0x1] %v360_v10  ;;  %2196 = vrot.lane.b32.xlu1 %v2173_v11, %s4675_s27  ;;  %v1606_v13 = vld [vmem:[#allocation2 + $0x54] sm:$0x1]  ;;  %v1322_v14 = vld [vmem:[#allocation2 + $0x48] sm:$0xe] }
  0x25   :  { %v1323_v16 = vld [vmem:[#allocation2 + $0x4c] sm:$0x1]  ;;  %v1631_v17 = vshll.u32 %v1606_v13, 16  ;;  %v4336_v18 = vrot.slane %v1322_v14, 9  ;;  %v1161_v20 = vld [vmem:[#allocation2 + $0x48] sm:$0xf] }
  0x26   :  { %v1370_v19 = vrot.slane %v1323_v16, 5  ;;  %v1162_v21 = vld [vmem:[#allocation2 + $0x4c] sm:$0x1]  ;;  %v1262_v22 = vshrl.u32 %v1161_v20, 16  ;;  %v1265_v23 = vshll.u32 %v1161_v20, 16  ;;  %vm781_vm15 = vcmask 191616  }
  0x27   :  { %v2228_v24 = vld [vmem:[#allocation2 + $0x98] sm:$0xf]  ;;  %v1633_v25 = vrot.slane %v1631_v17, 5  ;;  %v1271_v27 = vshll.u32 %v1162_v21, 16  ;;  %v2229_v34 = vld [vmem:[#allocation2 + $0x9c] sm:$0x1] }
  0x28   :  { %v1371_v26 = vsel %vm4835_vm5, %v4336_v18, %v1370_v19  ;;  %v2329_v28 = vshrl.u32 %v2228_v24, 16  ;;  %v1264_v29 = vrot.slane %v1262_v22, 4  ;;  %v1267_v30 = vrot.slane %v1265_v23, 5  ;;  %v348_v46 = vld [vmem:[#allocation2 + $0x38] sm:$0x1]  ;;  %s4684_s19 = smov 42  }
  0x29   :  { %1386 = vrot.lane.b32.xlu1 %v1371_v26, %s4677_s29  ;;  %v1634_v31 = vsel %vm4880_vm12, %v1629_v12, %v1633_v25  ;;  %v1273_v33 = vrot.slane %v1271_v27, 5  ;;  %v2332_v36 = vshll.u32 %v2228_v24, 16  ;;  %v2338_v38 = vshll.u32 %v2229_v34, 16  ;;  %v374_v47 = vld [vmem:[#allocation2 + $0x3c] sm:$0x1]  ;;  %s4685_s21 = smov 14  }
  0x2a   :  { %1733 = vrot.lane.b32.xlu0 %v1634_v31, %s4676_s28  ;;  %v1268_v32 = vor.u32 %v1267_v30, %v1264_v29  ;;  %v2331_v35 = vrot.slane %v2329_v28, 4  ;;  %v342_v49 = vld [vmem:[#allocation2 + $0x28] sm:$0x1]  ;;  %v349_v50 = vsel %vm4866_vm8, 0, %v348_v46  ;;  %v375_v51 = vsel %vm4874_vm9, 0, %v374_v47  ;;  %s4689_s24 = smov 126  }
  0x2b   :  { %v2334_v39 = vrot.slane %v2332_v36, 5  ;;  %v2340_v42 = vrot.slane %v2338_v38, 5  ;;  %v343_v52 = vsel %vm4866_vm8, 0, %v342_v49  ;;  %v368_v53 = vld [vmem:[#allocation2 + $0x2c] sm:$0x1]  ;;  %vm830_vm2 = vcmask 257216  }
  0x2c   :  { %v1269_v37 = vrot.slane %v1268_v32, 4  ;;  %350 = vst [vmem:[#allocation2 + $0x38] sm:$0x1] %v349_v50  ;;  %376 = vst [vmem:[#allocation2 + $0x3c] sm:$0x1] %v375_v51  ;;  %v369_v54 = vsel %vm4874_vm9, 0, %v368_v53 }
  0x2d   :  { %v2335_v41 = vor.u32 %v2334_v39, %v2331_v35  ;;  %344 = vst [vmem:[#allocation2 + $0x28] sm:$0x1] %v343_v52  ;;  %v351_v56 = vld [vmem:[#allocation2 + $0x40] sm:$0x1]  ;;  %v377_v57 = vld [vmem:[#allocation2 + $0x44] sm:$0x1] }
  0x2e   :  { %v1274_v40 = vsel %vm4880_vm12, %v1269_v37, %v1273_v33  ;;  %370 = vst [vmem:[#allocation2 + $0x2c] sm:$0x1] %v369_v54  ;;  %v352_v58 = vsel %vm4866_vm8, 0, %v351_v56  ;;  %v378_v59 = vsel %vm4874_vm9, 0, %v377_v57  ;;  %v345_v60 = vld [vmem:[#allocation2 + $0x30] sm:$0x1] }
  0x2f   :  { %1289 = vrot.lane.b32.xlu1 %v1274_v40, %s4678_s30  ;;  %v2336_v44 = vrot.slane %v2335_v41, 4  ;;  %353 = vst [vmem:[#allocation2 + $0x40] sm:$0x1] %v352_v58  ;;  %379 = vst [vmem:[#allocation2 + $0x44] sm:$0x1] %v378_v59  ;;  %v346_v62 = vsel %vm4866_vm8, 0, %v345_v60 }
  0x30   :  { %v371_v61 = vld [vmem:[#allocation2 + $0x34] sm:$0x1]  ;;  %347 = vst [vmem:[#allocation2 + $0x30] sm:$0x1] %v346_v62  ;;  %v1418_v0 = vld [vmem:[#allocation2 + $0x68] sm:$0x1] }
  0x31   :  { %v2341_v45 = vsel %vm4880_vm12, %v2336_v44, %v2340_v42  ;;  %v372_v63 = vsel %vm4874_vm9, 0, %v371_v61  ;;  %v1442_v1 = vld [vmem:[#allocation2 + $0x6c] sm:$0x1]  ;;  %v1412_v2 = vld [vmem:[#allocation2 + $0x58] sm:$0x1]  ;;  %v1419_v3 = vsel %vm4866_vm8, 0, %v1418_v0 }
  0x32   :  { %373 = vst [vmem:[#allocation2 + $0x34] sm:$0x1] %v372_v63  ;;  %v1443_v4 = vsel %vm4874_vm9, 0, %v1442_v1  ;;  %v1413_v5 = vsel %vm4866_vm8, 0, %v1412_v2  ;;  %v1436_v6 = vld [vmem:[#allocation2 + $0x5c] sm:$0x1] }
  0x33   :  { %2356 = vrot.lane.b32.xlu1 %v2341_v45, %s4678_s30  ;;  %1420 = vst [vmem:[#allocation2 + $0x68] sm:$0x1] %v1419_v3  ;;  %1444 = vst [vmem:[#allocation2 + $0x6c] sm:$0x1] %v1443_v4  ;;  %v1437_v7 = vsel %vm4874_vm9, 0, %v1436_v6  ;;  %vm2587_vm4 = vcmask 1043456  }
  0x34   :  { %1414 = vst [vmem:[#allocation2 + $0x58] sm:$0x1] %v1413_v5  ;;  %v1421_v9 = vld [vmem:[#allocation2 + $0x70] sm:$0x1]  ;;  %v1445_v10 = vld [vmem:[#allocation2 + $0x74] sm:$0x1] }
  0x35   :  { %1438 = vst [vmem:[#allocation2 + $0x5c] sm:$0x1] %v1437_v7  ;;  %v1422_v11 = vsel %vm4866_vm8, 0, %v1421_v9  ;;  %v1446_v12 = vsel %vm4874_vm9, 0, %v1445_v10  ;;  %v1415_v13 = vld [vmem:[#allocation2 + $0x60] sm:$0x1] }
  0x36   :  { %1423 = vst [vmem:[#allocation2 + $0x70] sm:$0x1] %v1422_v11  ;;  %1447 = vst [vmem:[#allocation2 + $0x74] sm:$0x1] %v1446_v12  ;;  %v1439_v14 = vld [vmem:[#allocation2 + $0x64] sm:$0x1] }
  0x37   :  { %v1416_v16 = vsel %vm4866_vm8, 0, %v1415_v13  ;;  %v1440_v17 = vsel %vm4874_vm9, 0, %v1439_v14  ;;  %v510_v20 = vld [vmem:[#allocation2] sm:$0xf]  ;;  %v1588_v22 = vld [vmem:[#allocation2 + $0x50] sm:$0xf] }
  0x38   :  { %1417 = vst [vmem:[#allocation2 + $0x60] sm:$0x1] %v1416_v16  ;;  %1441 = vst [vmem:[#allocation2 + $0x64] sm:$0x1] %v1440_v17  ;;  %v4958_v23 = vld [vmem:[%s6561_s2] ss:$0 sm:$0xff] }
  0x39   :  { %518 = vst.msk [vmem:[#allocation3] sm:$0xf] %vm319_vm1, %v510_v20  ;;  %1597 = vst.msk [vmem:[#allocation3 + $0x20] sm:$0xf] %vm319_vm1, %v1588_v22  ;;  %v4963_v25 = vld [vmem:[%s6562_s3] ss:$0 sm:$0xff] }
  0x3a   :  { %v474_v52 = vld [vmem:[#allocation2 + $0x18] sm:$0xf]  ;;  %v477_v53 = vld [vmem:[#allocation2 + $0x1c] sm:$0x1]  ;;  %v462_v61 = vld [vmem:[#allocation2 + $0x8] sm:$0xf] }
  0x3b   :  { %v465_v4 = vld [vmem:[#allocation2 + $0xc] sm:$0x1]  ;;  %v480_v12 = vld [vmem:[#allocation2 + $0x20] sm:$0xf]  ;;  %v483_v17 = vld [vmem:[#allocation2 + $0x24] sm:$0x1] }
  0x3c   :  { %s4679_s2 = smov 24   ;;  %s4680_s3 = smov 40   ;;  %vm991_vm6 = vcmask 322816   ;;  %vm1088_vm7 = vcmask 388416   ;;  %vm2562_vm10 = vcmask 588800   ;;  %vm4683_vm11 = vmmov 0  }
  0x3d   :  { %s4692_s18 = smov 54  }
  0x81   :  { %v4948_v18 = vpop.permute.xlu0 %757 }
  0x8e   :  { %v4950_v19 = vpop.permute.xlu0 %1829 }
  0x93   :  { %v658_v21 = vpop.permute.xlu0 %657 }
  0x94   :  { %682 = vst.msk [vmem:[#allocation3] sm:$0xf] %vm681_vm13, %v658_v21 }
  0x95   :  { %782 = vst.msk [vmem:[#allocation3] sm:$0xf] %vm781_vm15, %v4948_v18 }
  0x9c   :  { %v1734_v30 = vpop.permute.xlu0 %1733 }
  0x9d   :  { %1757 = vst.msk [vmem:[#allocation3 + $0x20] sm:$0xf] %vm681_vm13, %v1734_v30 }
  0x9e   :  { %1853 = vst.msk [vmem:[#allocation3 + $0x20] sm:$0xf] %vm781_vm15, %v4950_v19 }
  0xdf   :  { %v4491_v24 = vpop.f32.mrb[0].mxu0 }
  0xe0   :  { %v218_v26 = vmul.f32 %v4491_v24, %v4958_v23  ;;  %v146_v27 = vpop.f32.mrb[1].mxu0 }
  0xe1   :  { %v216_v28 = vmul.f32 %v4958_v23, %v146_v27  ;;  %v4492_v29 = vpop.f32.mrb[2].mxu0 }
  0xe2   :  { %v241_v31 = vadd.f32 %v4963_v25, %v218_v26  ;;  %v219_v32 = vmul.f32 %v4492_v29, %v4958_v23  ;;  %v149_v33 = vpop.f32.mrb[3].mxu0  ;;  %v471_v29 = vld [vmem:[#allocation2 + $0x14] sm:$0x1] }
  0xe3   :  { %v239_v34 = vadd.f32 %v4963_v25, %v216_v28  ;;  %v217_v35 = vmul.f32 %v4958_v23, %v149_v33  ;;  %v468_v28 = vld [vmem:[#allocation2 + $0x10] sm:$0xf] }
  0xe4   :  { %v257_v36 = vmax.f32 %v241_v31, 0.0  ;;  %v242_v37 = vadd.f32 %v4963_v25, %v219_v32 }
  0xe5   :  { %v255_v38 = vmax.f32 %v239_v34, 0.0  ;;  %v240_v39 = vadd.f32 %v4963_v25, %v217_v35 }
  0xe6   :  { %v4428_v40 = vpack.c.bf16 %v257_v36, %v257_v36  ;;  %v258_v41 = vmax.f32 %v242_v37, 0.0 }
  0xe7   :  { %v4426_v42 = vpack.c.bf16 %v255_v38, %v255_v38  ;;  %v256_v44 = vmax.f32 %v240_v39, 0.0  ;;  %v4495_v45 = vpop.f32.mrb[4].mxu0 }
  0xe8   :  { %v397_v46 = vshrl.u32 %v4428_v40, 16  ;;  %v400_v47 = vshll.u32 %v4428_v40, 16  ;;  %v4429_v49 = vpack.c.bf16 %v258_v41, %v258_v41  ;;  %v222_v50 = vmul.f32 %v4495_v45, %v4958_v23  ;;  %v162_v51 = vpop.f32.mrb[5].mxu0 }
  0xe9   :  { %v381_v54 = vshrl.u32 %v4426_v42, 16  ;;  %v384_v56 = vshll.u32 %v4426_v42, 16  ;;  %v4427_v57 = vpack.c.bf16 %v256_v44, %v256_v44  ;;  %v220_v58 = vmul.f32 %v4958_v23, %v162_v51  ;;  %v4496_v59 = vpop.f32.mrb[6].mxu0 }
  0xea   :  { %v399_v60 = vrot.slane %v397_v46, 7  ;;  %v405_v62 = vshrl.u32 %v4429_v49, 16  ;;  %v408_v63 = vshll.u32 %v4429_v49, 16  ;;  %v245_v0 = vadd.f32 %v4963_v25, %v222_v50  ;;  %v165_v1 = vpop.f32.mrb[7].mxu0 }
  0xeb   :  { %v383_v3 = vrot.slane %v381_v54, 7  ;;  %v389_v5 = vshrl.u32 %v4427_v57, 16  ;;  %v392_v6 = vshll.u32 %v4427_v57, 16  ;;  %v243_v7 = vadd.f32 %v4963_v25, %v220_v58  ;;  %v501_v57 = vld [vmem:[#allocation2 + $0x3c] sm:$0x1] }
  0xec   :  { %v402_v9 = vor.u32 %v400_v47, %v399_v60  ;;  %v403_v10 = vrot.slane %v399_v60, 4  ;;  %v407_v11 = vrot.slane %v405_v62, 7  ;;  %v261_v13 = vmax.f32 %v245_v0, 0.0  ;;  %v489_v60 = vld [vmem:[#allocation2 + $0x2c] sm:$0x1] }
  0xed   :  { %v386_v14 = vor.u32 %v384_v56, %v383_v3  ;;  %v387_v16 = vrot.slane %v383_v3, 4  ;;  %v391_v20 = vrot.slane %v389_v5, 7  ;;  %v259_v21 = vmax.f32 %v243_v7, 0.0  ;;  %v498_v56 = vld [vmem:[#allocation2 + $0x38] sm:$0xf] }
  0xee   :  { %v475_v22 = vsel %vm4979_vm14, %v402_v9, %v474_v52  ;;  %v478_v24 = vsel %vm4866_vm8, %v403_v10, %v477_v53  ;;  %v410_v26 = vor.u32 %v408_v63, %v407_v11  ;;  %v411_v27 = vrot.slane %v407_v11, 4 }
  0xef   :  { %476 = vst [vmem:[#allocation2 + $0x18] sm:$0xf] %v475_v22  ;;  %479 = vst [vmem:[#allocation2 + $0x1c] sm:$0x1] %v478_v24  ;;  %v463_v30 = vsel %vm4979_vm14, %v386_v14, %v462_v61  ;;  %v466_v31 = vsel %vm4866_vm8, %v387_v16, %v465_v4  ;;  %v394_v32 = vor.u32 %v392_v6, %v391_v20  ;;  %v395_v33 = vrot.slane %v391_v20, 4  ;;  %v4992_v34 = vpop.f32.mrb[8].mxu0 }
  0xf0   :  { %464 = vst [vmem:[#allocation2 + $0x8] sm:$0xf] %v463_v30  ;;  %467 = vst [vmem:[#allocation2 + $0xc] sm:$0x1] %v466_v31  ;;  %v481_v35 = vsel %vm4979_vm14, %v410_v26, %v480_v12  ;;  %v484_v36 = vsel %vm4866_vm8, %v411_v27, %v483_v17  ;;  %v4432_v37 = vpack.c.bf16 %v261_v13, %v261_v13  ;;  %v4998_v39 = vpop.f32.mrb[9].mxu0 }
  0xf1   :  { %v4430_v38 = vpack.c.bf16 %v259_v21, %v259_v21  ;;  %482 = vst [vmem:[#allocation2 + $0x20] sm:$0xf] %v481_v35  ;;  %485 = vst [vmem:[#allocation2 + $0x24] sm:$0x1] %v484_v36  ;;  %v469_v40 = vsel %vm4979_vm14, %v394_v32, %v468_v28  ;;  %v472_v41 = vsel %vm4866_vm8, %v395_v33, %v471_v29  ;;  %v5006_v45 = vpop.f32.mrb[10].mxu0 }
  0xf2   :  { %v223_v42 = vmul.f32 %v4496_v59, %v4958_v23  ;;  %v221_v44 = vmul.f32 %v4958_v23, %v165_v1  ;;  %470 = vst [vmem:[#allocation2 + $0x10] sm:$0xf] %v469_v40  ;;  %473 = vst [vmem:[#allocation2 + $0x14] sm:$0x1] %v472_v41  ;;  %v429_v46 = vshrl.u32 %v4432_v37, 16  ;;  %v432_v47 = vshll.u32 %v4432_v37, 16 }
  0xf3   :  { %v413_v49 = vshrl.u32 %v4430_v38, 16  ;;  %v416_v50 = vshll.u32 %v4430_v38, 16  ;;  %v5008_v51 = vpop.f32.mrb[11].mxu0  ;;  %v486_v59 = vld [vmem:[#allocation2 + $0x28] sm:$0xf] }
  0xf4   :  { %v246_v52 = vadd.f32 %v4963_v25, %v223_v42  ;;  %v244_v53 = vadd.f32 %v4963_v25, %v221_v44  ;;  %v431_v54 = vrot.slane %v429_v46, 7  ;;  %v504_v30 = vld [vmem:[#allocation2 + $0x40] sm:$0xf]  ;;  %v507_v32 = vld [vmem:[#allocation2 + $0x44] sm:$0x1] }
  0xf5   :  { %v415_v58 = vrot.slane %v413_v49, 7  ;;  %v492_v35 = vld [vmem:[#allocation2 + $0x30] sm:$0xf]  ;;  %v495_v38 = vld [vmem:[#allocation2 + $0x34] sm:$0x1] }
  0xf6   :  { %v262_v61 = vmax.f32 %v246_v52, 0.0  ;;  %v260_v62 = vmax.f32 %v244_v53, 0.0  ;;  %v1099_v63 = vld [vmem:[#allocation2 + $0x18] sm:$0xf]  ;;  %v434_v1 = vor.u32 %v432_v47, %v431_v54  ;;  %v435_v3 = vrot.slane %v431_v54, 4 }
  0xf7   :  { %v792_v0 = vld [vmem:[#allocation2 + $0x18] sm:$0xf]  ;;  %v418_v4 = vor.u32 %v416_v50, %v415_v58  ;;  %v419_v5 = vrot.slane %v415_v58, 4  ;;  %1116 = vrot.lane.b32.xlu1 %v1099_v63, %s4675_s27  ;;  %v697_v9 = vld [vmem:[#allocation2 + $0x1c] sm:$0x1]  ;;  %v4503_v41 = vpop.f32.mrb[12].mxu0 }
  0xf8   :  { %810 = vrot.lane.b32.xlu0 %v792_v0, %s4679_s2  ;;  %v4433_v6 = vpack.c.bf16 %v262_v61, %v262_v61  ;;  %v696_v7 = vld [vmem:[#allocation2 + $0x18] sm:$0xe]  ;;  %v4431_v10 = vpack.c.bf16 %v260_v62, %v260_v62  ;;  %v499_v11 = vsel %vm4979_vm14, %v434_v1, %v498_v56  ;;  %v502_v12 = vsel %vm4866_vm8, %v435_v3, %v501_v57  ;;  %v790_v16 = vld [vmem:[#allocation2 + $0x8] sm:$0xf]  ;;  %v793_v17 = vld [vmem:[#allocation2 + $0x20] sm:$0xf] }
  0xf9   :  { %v487_v13 = vsel %vm4979_vm14, %v418_v4, %v486_v59  ;;  %v490_v14 = vsel %vm4866_vm8, %v419_v5, %v489_v60  ;;  %500 = vst [vmem:[#allocation2 + $0x38] sm:$0xf] %v499_v11  ;;  %503 = vst [vmem:[#allocation2 + $0x3c] sm:$0x1] %v502_v12  ;;  %v4316_v22 = vrot.slane %v696_v7, 9  ;;  %v739_v24 = vrot.slane %v697_v9, 5 }
  0xfa   :  { %488 = vst [vmem:[#allocation2 + $0x28] sm:$0xf] %v487_v13  ;;  %491 = vst [vmem:[#allocation2 + $0x2c] sm:$0x1] %v490_v14  ;;  %v437_v20 = vshrl.u32 %v4433_v6, 16  ;;  %v440_v21 = vshll.u32 %v4433_v6, 16  ;;  %v226_v56 = vmul.f32 %v4992_v34, %v4958_v23  ;;  %v230_v3 = vmul.f32 %v4503_v41, %v4958_v23 }
  0xfb   :  { %v421_v26 = vshrl.u32 %v4431_v10, 16  ;;  %v424_v27 = vshll.u32 %v4431_v10, 16  ;;  %v1004_v28 = vld [vmem:[#allocation2 + $0x18] sm:$0xe]  ;;  %812 = vrot.lane.b32.xlu1 %v793_v17, %s4679_s2  ;;  %v1005_v31 = vld [vmem:[#allocation2 + $0x1c] sm:$0x1]  ;;  %v740_v44 = vsel %vm4835_vm5, %v4316_v22, %v739_v24 }
  0xfc   :  { %806 = vrot.lane.b32.xlu0 %v790_v16, %s4679_s2  ;;  %v439_v29 = vrot.slane %v437_v20, 7  ;;  %v4323_v40 = vrot.slane %v1004_v28, 9  ;;  %v1100_v42 = vld [vmem:[#allocation2 + $0x20] sm:$0xf]  ;;  %v1042_v49 = vrot.slane %v1005_v31, 5  ;;  %v194_v57 = vpop.f32.mrb[13].mxu0  ;;  %v249_v6 = vadd.f32 %v4963_v25, %v226_v56 }
  0xfd   :  { %v423_v33 = vrot.slane %v421_v26, 7  ;;  %v1310_v53 = vld [vmem:[#allocation2 + $0x18] sm:$0xe]  ;;  %v1311_v54 = vld [vmem:[#allocation2 + $0x1c] sm:$0x1]  ;;  %v4504_v60 = vpop.f32.mrb[14].mxu0  ;;  %v5045_v9 = vadd.f32 %v4963_v25, %v230_v3  ;;  %v228_v10 = vmul.f32 %v4958_v23, %v194_v57 }
  0xfe   :  { %v442_v36 = vor.u32 %v440_v21, %v439_v29  ;;  %v443_v37 = vrot.slane %v439_v29, 4  ;;  %v791_v61 = vld [vmem:[#allocation2 + $0x10] sm:$0xf]  ;;  %v1043_v62 = vsel %vm4835_vm5, %v4323_v40, %v1042_v49  ;;  %v4330_v63 = vrot.slane %v1310_v53, 9  ;;  %v1000_v1 = vld [vmem:[#allocation2 + $0x8] sm:$0xe] }
  0xff   :  { %v426_v46 = vor.u32 %v424_v27, %v423_v33  ;;  %v427_v47 = vrot.slane %v423_v33, 4  ;;  %763 = vrot.lane.b32.xlu1 %v740_v44, %s4674_s17  ;;  %v1346_v0 = vrot.slane %v1311_v54, 5  ;;  %v1001_v34 = vld [vmem:[#allocation2 + $0xc] sm:$0x1]  ;;  %v692_v4 = vld [vmem:[#allocation2 + $0x8] sm:$0xe]  ;;  %v231_v16 = vmul.f32 %v4504_v60, %v4958_v23 }
 0x100   :  { %v505_v50 = vsel %vm4979_vm14, %v442_v36, %v504_v30  ;;  %v508_v52 = vsel %vm4866_vm8, %v443_v37, %v507_v32  ;;  %1118 = vrot.lane.b32.xlu0 %v1100_v42, %s4675_s27  ;;  %v693_v5 = vld [vmem:[#allocation2 + $0xc] sm:$0x1]  ;;  %v1098_v7 = vld [vmem:[#allocation2 + $0x10] sm:$0xf]  ;;  %v4321_v11 = vrot.slane %v1000_v1, 9  ;;  %v1034_v12 = vrot.slane %v1001_v34, 5 }
 0x101   :  { %506 = vst [vmem:[#allocation2 + $0x40] sm:$0xf] %v505_v50  ;;  %509 = vst [vmem:[#allocation2 + $0x44] sm:$0x1] %v508_v52  ;;  %v493_v58 = vsel %vm4979_vm14, %v426_v46, %v492_v35  ;;  %v496_v59 = vsel %vm4866_vm8, %v427_v47, %v495_v38  ;;  %v1312_v13 = vld [vmem:[#allocation2 + $0x20] sm:$0xe]  ;;  %v1347_v17 = vsel %vm4835_vm5, %v4330_v63, %v1346_v0 }
 0x102   :  { %494 = vst [vmem:[#allocation2 + $0x30] sm:$0xf] %v493_v58  ;;  %497 = vst [vmem:[#allocation2 + $0x34] sm:$0x1] %v496_v59  ;;  %v1313_v14 = vld [vmem:[#allocation2 + $0x24] sm:$0x1]  ;;  %v5052_v26 = vadd.f32 %v4963_v25, %v228_v10  ;;  %v5057_v30 = vadd.f32 %v4963_v25, %v231_v16  ;;  %v1035_v37 = vsel %vm4835_vm5, %v4321_v11, %v1034_v12 }
 0x103   :  { %808 = vrot.lane.b32.xlu1 %v791_v61, %s4679_s2  ;;  %v4314_v20 = vrot.slane %v692_v4, 9  ;;  %v731_v21 = vrot.slane %v693_v5, 5  ;;  %v1006_v22 = vld [vmem:[#allocation2 + $0x20] sm:$0xe]  ;;  %v1007_v24 = vld [vmem:[#allocation2 + $0x24] sm:$0x1]  ;;  %v227_v10 = vmul.f32 %v5006_v45, %v4958_v23 }
 0x104   :  { %1068 = vrot.lane.b32.xlu0 %v1043_v62, %s4680_s3  ;;  %v532_v27 = vld [vmem:[#allocation2 + $0x18] sm:$0xf]  ;;  %v265_v28 = vmax.f32 %v249_v6, 0.0  ;;  %v197_v29 = vpop.f32.mrb[15].mxu0  ;;  %v4331_v32 = vrot.slane %v1312_v13, 9  ;;  %v1350_v33 = vrot.slane %v1313_v14, 5  ;;  %v225_v14 = vmul.f32 %v4958_v23, %v5008_v51 }
 0x105   :  { %v229_v31 = vmul.f32 %v4958_v23, %v197_v29  ;;  %v4324_v35 = vrot.slane %v1006_v22, 9  ;;  %v1046_v36 = vrot.slane %v1007_v24, 5  ;;  %v732_v38 = vsel %vm4835_vm5, %v4314_v20, %v731_v21  ;;  %v698_v40 = vld [vmem:[#allocation2 + $0x20] sm:$0xe]  ;;  %v699_v41 = vld [vmem:[#allocation2 + $0x24] sm:$0x1] }
 0x106   :  { %v588_v42 = vshrl.u32 %v532_v27, 16  ;;  %v591_v44 = vshll.u32 %v532_v27, 16  ;;  %v1002_v46 = vld [vmem:[#allocation2 + $0x10] sm:$0xe]  ;;  %v1003_v47 = vld [vmem:[#allocation2 + $0x14] sm:$0x1]  ;;  %v5066_v49 = vpack.c.bf16 %v265_v28, %v265_v28  ;;  %v1351_v52 = vsel %vm4835_vm5, %v4331_v32, %v1350_v33 }
 0x107   :  { %1374 = vrot.lane.b32.xlu1 %v1347_v17, %s4677_s29  ;;  %v5069_v50 = vadd.f32 %v4963_v25, %v229_v31  ;;  %v1047_v53 = vsel %vm4835_vm5, %v4324_v35, %v1046_v36  ;;  %v4317_v54 = vrot.slane %v698_v40, 9  ;;  %v743_v56 = vrot.slane %v699_v41, 5  ;;  %v694_v57 = vld [vmem:[#allocation2 + $0x10] sm:$0xe]  ;;  %v843_v58 = vld [vmem:[#allocation2 + $0x18] sm:$0xf] }
 0x108   :  { %1114 = vrot.lane.b32.xlu0 %v1098_v7, %s4675_s27  ;;  %v4322_v59 = vrot.slane %v1002_v46, 9  ;;  %v1038_v60 = vrot.slane %v1003_v47, 5  ;;  %v695_v61 = vld [vmem:[#allocation2 + $0x14] sm:$0x1]  ;;  %v590_v62 = vrot.slane %v588_v42, 4  ;;  %v593_v63 = vrot.slane %v591_v44, 5 }
 0x109   :  { %v1308_v0 = vld [vmem:[#allocation2 + $0x10] sm:$0xe]  ;;  %v1149_v1 = vld [vmem:[#allocation2 + $0x18] sm:$0xf]  ;;  %v1477_v34 = vshrl.u32 %v5066_v49, 16  ;;  %v884_v5 = vshrl.u32 %v843_v58, 16  ;;  %v224_v7 = vmul.f32 %v4958_v23, %v4998_v39  ;;  %v744_v11 = vsel %vm4835_vm5, %v4317_v54, %v743_v56 }
 0x10a   :  { %v1309_v3 = vld [vmem:[#allocation2 + $0x14] sm:$0x1]  ;;  %v533_v4 = vld [vmem:[#allocation2 + $0x1c] sm:$0x1]  ;;  %v887_v6 = vshll.u32 %v843_v58, 16  ;;  %v4315_v12 = vrot.slane %v694_v57, 9  ;;  %v1039_v16 = vsel %vm4835_vm5, %v4322_v59, %v1038_v60  ;;  %v594_v17 = vor.u32 %v593_v63, %v590_v62 }
 0x10b   :  { %759 = vrot.lane.b32.xlu1 %v732_v38, %s4674_s17  ;;  %v735_v13 = vrot.slane %v695_v61, 5  ;;  %v844_v20 = vld [vmem:[#allocation2 + $0x1c] sm:$0x1]  ;;  %v1178_v21 = vshrl.u32 %v1149_v1, 16  ;;  %v1181_v22 = vshll.u32 %v1149_v1, 16  ;;  %v4329_v45 = vrot.slane %v1308_v0, 9 }
 0x10c   :  { %1064 = vrot.lane.b32.xlu0 %v1035_v37, %s4680_s3  ;;  %v1103_v39 = vld [vmem:[#allocation2 + $0x38] sm:$0xf]  ;;  %v1342_v24 = vrot.slane %v1309_v3, 5  ;;  %v597_v27 = vshll.u32 %v533_v4, 16  ;;  %v886_v28 = vrot.slane %v884_v5, 4  ;;  %v889_v29 = vrot.slane %v887_v6, 5 }
 0x10d   :  { %v528_v31 = vld [vmem:[#allocation2 + $0x8] sm:$0xf]  ;;  %v1479_v32 = vrot.slane %v1477_v34, 7  ;;  %v1480_v23 = vshll.u32 %v5066_v49, 16  ;;  %v893_v51 = vshll.u32 %v844_v20, 16  ;;  %v247_v36 = vadd.f32 %v4963_v25, %v224_v7 }
 0x10e   :  { %v1150_v33 = vld [vmem:[#allocation2 + $0x1c] sm:$0x1]  ;;  %v845_v35 = vld [vmem:[#allocation2 + $0x20] sm:$0xf]  ;;  %v250_v37 = vadd.f32 %v4963_v25, %v227_v10  ;;  %v5094_v38 = vadd.f32 %v4963_v25, %v225_v14  ;;  %v736_v40 = vsel %vm4835_vm5, %v4315_v12, %v735_v13  ;;  %v595_v41 = vrot.slane %v594_v17, 4 }
 0x10f   :  { %1070 = vrot.lane.b32.xlu1 %v1047_v53, %s4680_s3  ;;  %v1180_v42 = vrot.slane %v1178_v21, 4  ;;  %v1183_v44 = vrot.slane %v1181_v22, 5  ;;  %v1343_v46 = vsel %vm4835_vm5, %v4329_v45, %v1342_v24  ;;  %v599_v47 = vrot.slane %v597_v27, 5  ;;  %v1552_v53 = vld [vmem:[#allocation2 + $0x68] sm:$0xf] }
 0x110   :  { %1376 = vrot.lane.b32.xlu0 %v1351_v52, %s4677_s29  ;;  %v560_v49 = vshrl.u32 %v528_v31, 16  ;;  %v563_v52 = vshll.u32 %v528_v31, 16  ;;  %v890_v54 = vor.u32 %v889_v29, %v886_v28  ;;  %v1187_v25 = vshll.u32 %v1150_v33, 16  ;;  %v1555_v58 = vld [vmem:[#allocation2 + $0x6c] sm:$0x1] }
 0x111   :  { %v898_v56 = vshrl.u32 %v845_v35, 16  ;;  %v1482_v57 = vor.u32 %v1480_v23, %v1479_v32  ;;  %v895_v59 = vrot.slane %v893_v51, 5  ;;  %v901_v60 = vshll.u32 %v845_v35, 16  ;;  %v839_v61 = vld [vmem:[#allocation2 + $0x8] sm:$0xf] }
 0x112   :  { %v1483_v62 = vrot.slane %v1479_v32, 4  ;;  %v263_v63 = vmax.f32 %v247_v36, 0.0  ;;  %v600_v0 = vsel %vm4880_vm12, %v595_v41, %v599_v47  ;;  %v1184_v1 = vor.u32 %v1183_v44, %v1180_v42  ;;  %v529_v4 = vld [vmem:[#allocation2 + $0xc] sm:$0x1]  ;;  %v5110_v12 = vld [vmem:[#allocation2 + $0x24] sm:$0x1] }
 0x113   :  { %1066 = vrot.lane.b32.xlu1 %v1039_v16, %s4680_s3  ;;  %v1553_v34 = vsel %vm4979_vm14, %v1482_v57, %v1552_v53  ;;  %v266_v3 = vmax.f32 %v250_v37, 0.0  ;;  %v562_v5 = vrot.slane %v560_v49, 4  ;;  %v565_v6 = vrot.slane %v563_v52, 5  ;;  %v796_v17 = vld [vmem:[#allocation2 + $0x38] sm:$0xf] }
 0x114   :  { %765 = vrot.lane.b32.xlu0 %v744_v11, %s4674_s17  ;;  %1554 = vst [vmem:[#allocation2 + $0x68] sm:$0xf] %v1553_v34  ;;  %v1556_v7 = vsel %vm4866_vm8, %v1483_v62, %v1555_v58  ;;  %v4434_v10 = vpack.c.bf16 %v263_v63, %v263_v63  ;;  %v891_v11 = vrot.slane %v890_v54, 4  ;;  %v900_v13 = vrot.slane %v898_v56, 4  ;;  %v1101_v45 = vld [vmem:[#allocation2 + $0x28] sm:$0xf] }
 0x115   :  { %v856_v14 = vshrl.u32 %v839_v61, 16  ;;  %1557 = vst [vmem:[#allocation2 + $0x6c] sm:$0x1] %v1556_v7  ;;  %v4437_v16 = vpack.c.bf16 %v266_v3, %v266_v3  ;;  %v903_v20 = vrot.slane %v901_v60, 5  ;;  %v859_v21 = vshll.u32 %v839_v61, 16 }
 0x116   :  { %v1461_v22 = vshrl.u32 %v4434_v10, 16  ;;  %v1185_v24 = vrot.slane %v1184_v1, 4  ;;  %v1189_v27 = vrot.slane %v1187_v25, 5  ;;  %v1540_v28 = vld [vmem:[#allocation2 + $0x58] sm:$0xf]  ;;  %v566_v32 = vor.u32 %v565_v6, %v562_v5 }
 0x117   :  { %1124 = vrot.lane.b32.xlu1 %v1103_v39, %s4675_s27  ;;  %v1464_v39 = vshll.u32 %v4434_v10, 16  ;;  %v1485_v29 = vshrl.u32 %v4437_v16, 16  ;;  %v1488_v31 = vshll.u32 %v4437_v16, 16  ;;  %v569_v23 = vshll.u32 %v529_v4, 16  ;;  %v1543_v35 = vld [vmem:[#allocation2 + $0x5c] sm:$0x1] }
 0x118   :  { %761 = vrot.lane.b32.xlu0 %v736_v40, %s4674_s17  ;;  %v907_v51 = vshll.u32 %v5110_v12, 16  ;;  %v1463_v33 = vrot.slane %v1461_v22, 7  ;;  %v896_v36 = vsel %vm4880_vm12, %v891_v11, %v895_v59  ;;  %v858_v37 = vrot.slane %v856_v14, 4  ;;  %v1151_v40 = vld [vmem:[#allocation2 + $0x20] sm:$0xf] }
 0x119   :  { %v1487_v41 = vrot.slane %v1485_v29, 7  ;;  %v264_v42 = vmax.f32 %v5094_v38, 0.0  ;;  %v904_v44 = vor.u32 %v903_v20, %v900_v13  ;;  %v1558_v52 = vld [vmem:[#allocation2 + $0x70] sm:$0xf]  ;;  %v1561_v53 = vld [vmem:[#allocation2 + $0x74] sm:$0x1]  ;;  %v1190_v54 = vsel %vm4880_vm12, %v1185_v24, %v1189_v27 }
 0x11a   :  { %v1466_v47 = vor.u32 %v1464_v39, %v1463_v33  ;;  %v1467_v49 = vrot.slane %v1463_v33, 4  ;;  %v567_v58 = vrot.slane %v566_v32, 4  ;;  %v840_v59 = vld [vmem:[#allocation2 + $0xc] sm:$0x1]  ;;  %v1192_v38 = vshrl.u32 %v1151_v40, 16 }
 0x11b   :  { %663 = vrot.lane.b32.xlu1 %v600_v0, %s4676_s28  ;;  %v1490_v25 = vor.u32 %v1488_v31, %v1487_v41  ;;  %v1491_v56 = vrot.slane %v1487_v41, 4  ;;  %v4435_v57 = vpack.c.bf16 %v264_v42, %v264_v42  ;;  %v704_v62 = vld [vmem:[#allocation2 + $0x38] sm:$0xe]  ;;  %v705_v63 = vld [vmem:[#allocation2 + $0x3c] sm:$0x1]  ;;  %v1195_v0 = vshll.u32 %v1151_v40, 16 }
 0x11c   :  { %1372 = vrot.lane.b32.xlu0 %v1343_v46, %s4677_s29  ;;  %v861_v46 = vrot.slane %v859_v21, 5  ;;  %v1541_v60 = vsel %vm4979_vm14, %v1466_v47, %v1540_v28  ;;  %v1544_v61 = vsel %vm4866_vm8, %v1467_v49, %v1543_v35  ;;  %v794_v4 = vld [vmem:[#allocation2 + $0x28] sm:$0xf]  ;;  %v571_v5 = vrot.slane %v569_v23, 5  ;;  %v1546_v11 = vld [vmem:[#allocation2 + $0x60] sm:$0xf] }
 0x11d   :  { %1542 = vst [vmem:[#allocation2 + $0x58] sm:$0xf] %v1541_v60  ;;  %1545 = vst [vmem:[#allocation2 + $0x5c] sm:$0x1] %v1544_v61  ;;  %v1559_v1 = vsel %vm4979_vm14, %v1490_v25, %v1558_v52  ;;  %v1562_v34 = vsel %vm4866_vm8, %v1491_v56, %v1561_v53  ;;  %v1469_v3 = vshrl.u32 %v4435_v57, 16  ;;  %v905_v6 = vrot.slane %v904_v44, 4 }
 0x11e   :  { %v862_v7 = vor.u32 %v861_v46, %v858_v37  ;;  %1560 = vst [vmem:[#allocation2 + $0x70] sm:$0xf] %v1559_v1  ;;  %1563 = vst [vmem:[#allocation2 + $0x74] sm:$0x1] %v1562_v34  ;;  %v1472_v10 = vshll.u32 %v4435_v57, 16  ;;  %v909_v14 = vrot.slane %v907_v51, 5  ;;  %v572_v20 = vsel %vm4880_vm12, %v567_v58, %v571_v5 }
 0x11f   :  { %1120 = vrot.lane.b32.xlu1 %v1101_v45, %s4675_s27  ;;  %v1549_v12 = vld [vmem:[#allocation2 + $0x64] sm:$0x1]  ;;  %v797_v13 = vld [vmem:[#allocation2 + $0x40] sm:$0xf]  ;;  %v865_v21 = vshll.u32 %v840_v59, 16  ;;  %v4320_v22 = vrot.slane %v704_v62, 9 }
 0x120   :  { %818 = vrot.lane.b32.xlu0 %v796_v17, %s4679_s2  ;;  %v534_v16 = vld [vmem:[#allocation2 + $0x20] sm:$0xf]  ;;  %v1471_v17 = vrot.slane %v1469_v3, 7  ;;  %v755_v39 = vrot.slane %v705_v63, 5  ;;  %v530_v45 = vld [vmem:[#allocation2 + $0x10] sm:$0xf]  ;;  %v910_v31 = vsel %vm4880_vm12, %v905_v6, %v909_v14 }
 0x121   :  { %v1194_v24 = vrot.slane %v1192_v38, 4  ;;  %v1197_v27 = vrot.slane %v1195_v0, 5  ;;  %v863_v32 = vrot.slane %v862_v7, 4  ;;  %v1152_v23 = vld [vmem:[#allocation2 + $0x24] sm:$0x1]  ;;  %v602_v51 = vshrl.u32 %v534_v16, 16 }
 0x122   :  { %v1474_v28 = vor.u32 %v1472_v10, %v1471_v17  ;;  %v1475_v29 = vrot.slane %v1471_v17, 4  ;;  %v605_v33 = vshll.u32 %v534_v16, 16  ;;  %v574_v35 = vshrl.u32 %v530_v45, 16  ;;  %v841_v42 = vld [vmem:[#allocation2 + $0x10] sm:$0xf] }
 0x123   :  { %1277 = vrot.lane.b32.xlu1 %v1190_v54, %s4678_s30  ;;  %v867_v41 = vrot.slane %v865_v21, 5  ;;  %v1198_v44 = vor.u32 %v1197_v27, %v1194_v24  ;;  %v1201_v46 = vshll.u32 %v1152_v23, 16  ;;  %v1318_v47 = vld [vmem:[#allocation2 + $0x38] sm:$0xe]  ;;  %v756_v52 = vsel %vm4835_vm5, %v4320_v22, %v755_v39  ;;  %v1319_v53 = vld [vmem:[#allocation2 + $0x3c] sm:$0x1] }
 0x124   :  { %971 = vrot.lane.b32.xlu0 %v896_v36, %s4681_s20  ;;  %v577_v36 = vshll.u32 %v530_v45, 16  ;;  %v1547_v37 = vsel %vm4979_vm14, %v1474_v28, %v1546_v11  ;;  %v1550_v40 = vsel %vm4866_vm8, %v1475_v29, %v1549_v12  ;;  %v535_v54 = vld [vmem:[#allocation2 + $0x24] sm:$0x1]  ;;  %v604_v25 = vrot.slane %v602_v51, 4  ;;  %v1147_v60 = vld [vmem:[#allocation2 + $0x10] sm:$0xf] }
 0x125   :  { %1548 = vst [vmem:[#allocation2 + $0x60] sm:$0xf] %v1547_v37  ;;  %1551 = vst [vmem:[#allocation2 + $0x64] sm:$0x1] %v1550_v40  ;;  %v868_v49 = vsel %vm4880_vm12, %v863_v32, %v867_v41  ;;  %v607_v56 = vrot.slane %v605_v33, 5  ;;  %v576_v57 = vrot.slane %v574_v35, 4 }
 0x126   :  { %v579_v58 = vrot.slane %v577_v36, 5  ;;  %v870_v59 = vshrl.u32 %v841_v42, 16  ;;  %v873_v38 = vshll.u32 %v841_v42, 16  ;;  %v1199_v61 = vrot.slane %v1198_v44, 4  ;;  %v531_v0 = vld [vmem:[#allocation2 + $0x14] sm:$0x1] }
 0x127   :  { %820 = vrot.lane.b32.xlu1 %v797_v13, %s4679_s2  ;;  %v4334_v62 = vrot.slane %v1318_v47, 9  ;;  %v1362_v63 = vrot.slane %v1319_v53, 5  ;;  %v1104_v1 = vld [vmem:[#allocation2 + $0x40] sm:$0xf]  ;;  %v608_v34 = vor.u32 %v607_v56, %v604_v25  ;;  %v611_v3 = vshll.u32 %v535_v54, 16 }
 0x128   :  { %814 = vrot.lane.b32.xlu0 %v794_v4, %s4679_s2  ;;  %v1164_v4 = vshrl.u32 %v1147_v60, 16  ;;  %v1167_v5 = vshll.u32 %v1147_v60, 16  ;;  %v795_v6 = vld [vmem:[#allocation2 + $0x30] sm:$0xf]  ;;  %v1203_v7 = vrot.slane %v1201_v46, 5  ;;  %v580_v10 = vor.u32 %v579_v58, %v576_v57 }
 0x129   :  { %v872_v11 = vrot.slane %v870_v59, 4  ;;  %v875_v12 = vrot.slane %v873_v38, 5  ;;  %v583_v13 = vshll.u32 %v531_v0, 16  ;;  %v1012_v14 = vld [vmem:[#allocation2 + $0x38] sm:$0xe]  ;;  %v609_v22 = vrot.slane %v608_v34, 4 }
 0x12a   :  { %v1013_v16 = vld [vmem:[#allocation2 + $0x3c] sm:$0x1]  ;;  %v1204_v17 = vsel %vm4880_vm12, %v1199_v61, %v1203_v7  ;;  %v842_v21 = vld [vmem:[#allocation2 + $0x14] sm:$0x1]  ;;  %v613_v39 = vrot.slane %v611_v3, 5  ;;  %v1166_v27 = vrot.slane %v1164_v4, 4 }
 0x12b   :  { %973 = vrot.lane.b32.xlu1 %v910_v31, %s4681_s20  ;;  %v1314_v45 = vld [vmem:[#allocation2 + $0x28] sm:$0xe]  ;;  %v1315_v24 = vld [vmem:[#allocation2 + $0x2c] sm:$0x1]  ;;  %v1169_v28 = vrot.slane %v1167_v5, 5  ;;  %v581_v29 = vrot.slane %v580_v10, 4  ;;  %v876_v23 = vor.u32 %v875_v12, %v872_v11 }
 0x12c   :  { %659 = vrot.lane.b32.xlu0 %v572_v20, %s4676_s28  ;;  %v1363_v20 = vsel %vm4835_vm5, %v4334_v62, %v1362_v63  ;;  %v4327_v31 = vrot.slane %v1012_v14, 9  ;;  %v1058_v32 = vrot.slane %v1013_v16, 5  ;;  %v1148_v51 = vld [vmem:[#allocation2 + $0x14] sm:$0x1]  ;;  %v585_v33 = vrot.slane %v583_v13, 5 }
 0x12d   :  { %v879_v35 = vshll.u32 %v842_v21, 16  ;;  %v700_v36 = vld [vmem:[#allocation2 + $0x28] sm:$0xe]  ;;  %v701_v37 = vld [vmem:[#allocation2 + $0x2c] sm:$0x1]  ;;  %v614_v44 = vsel %vm4880_vm12, %v609_v22, %v613_v39  ;;  %v1170_v46 = vor.u32 %v1169_v28, %v1166_v27  ;;  %v877_v54 = vrot.slane %v876_v23, 4 }
 0x12e   :  { %v1008_v40 = vld [vmem:[#allocation2 + $0x28] sm:$0xe]  ;;  %v1009_v41 = vld [vmem:[#allocation2 + $0x2c] sm:$0x1]  ;;  %v1014_v42 = vld [vmem:[#allocation2 + $0x40] sm:$0xe]  ;;  %v586_v53 = vsel %vm4880_vm12, %v581_v29, %v585_v33  ;;  %v1059_v7 = vsel %vm4835_vm5, %v4327_v31, %v1058_v32 }
 0x12f   :  { %771 = vrot.lane.b32.xlu1 %v756_v52, %s4674_s17  ;;  %v1015_v47 = vld [vmem:[#allocation2 + $0x44] sm:$0x1]  ;;  %v4332_v25 = vrot.slane %v1314_v45, 9  ;;  %v1354_v56 = vrot.slane %v1315_v24, 5  ;;  %v1010_v57 = vld [vmem:[#allocation2 + $0x30] sm:$0xe] }
 0x130   :  { %967 = vrot.lane.b32.xlu0 %v868_v49, %s4681_s20  ;;  %v1320_v49 = vld [vmem:[#allocation2 + $0x40] sm:$0xe]  ;;  %v1321_v52 = vld [vmem:[#allocation2 + $0x44] sm:$0x1]  ;;  %v881_v58 = vrot.slane %v879_v35, 5  ;;  %v1173_v59 = vshll.u32 %v1148_v51, 16 }
 0x131   :  { %v4318_v38 = vrot.slane %v700_v36, 9  ;;  %v747_v60 = vrot.slane %v701_v37, 5  ;;  %v1011_v61 = vld [vmem:[#allocation2 + $0x34] sm:$0x1]  ;;  %v4325_v62 = vrot.slane %v1008_v40, 9  ;;  %v1050_v63 = vrot.slane %v1009_v41, 5 }
 0x132   :  { %v4328_v0 = vrot.slane %v1014_v42, 9  ;;  %v540_v34 = vld [vmem:[#allocation2 + $0x38] sm:$0xf]  ;;  %v5162_v3 = vrot.slane %v1170_v46, 4  ;;  %v4335_v4 = vrot.slane %v1320_v49, 9  ;;  %v1366_v5 = vrot.slane %v1321_v52, 5 }
 0x133   :  { %816 = vrot.lane.b32.xlu1 %v795_v6, %s4679_s2  ;;  %v5164_v6 = vld [vmem:[#allocation2 + $0x30] sm:$0xe]  ;;  %v882_v10 = vsel %vm4880_vm12, %v877_v54, %v881_v58  ;;  %v4326_v11 = vrot.slane %v1010_v57, 9  ;;  %v1054_v12 = vrot.slane %v1011_v61, 5  ;;  %v5170_v13 = vld [vmem:[#allocation2 + $0x34] sm:$0x1]  ;;  %v748_v45 = vsel %vm4835_vm5, %v4318_v38, %v747_v60 }
 0x134   :  { %1126 = vrot.lane.b32.xlu0 %v1104_v1, %s4675_s27  ;;  %v1062_v1 = vrot.slane %v1015_v47, 5  ;;  %v5172_v14 = vld [vmem:[#allocation2 + $0x30] sm:$0xe]  ;;  %v1430_v16 = vld [vmem:[#allocation2 + $0x88] sm:$0x1]  ;;  %v644_v21 = vshrl.u32 %v540_v34, 16  ;;  %v5182_v24 = vsel %vm4835_vm5, %v4325_v62, %v1050_v63  ;;  %v5199_v33 = vsel %vm4835_vm5, %v4335_v4, %v1366_v5 }
 0x135   :  { %v1157_v22 = vld [vmem:[#allocation2 + $0x38] sm:$0xf]  ;;  %v1454_v39 = vld [vmem:[#allocation2 + $0x8c] sm:$0x1]  ;;  %v5188_v28 = vld [vmem:[#allocation2 + $0x3c] sm:$0x1]  ;;  %v5207_v18 = vsel %vm4835_vm5, %v4326_v11, %v1054_v12 }
 0x136   :  { %v5186_v27 = vsel %vm4835_vm5, %v4328_v0, %v1062_v1  ;;  %v647_v29 = vshll.u32 %v540_v34, 16  ;;  %v1424_v31 = vld [vmem:[#allocation2 + $0x78] sm:$0x1]  ;;  %v1448_v32 = vld [vmem:[#allocation2 + $0x7c] sm:$0x1]  ;;  %v4319_v35 = vrot.slane %v5164_v6, 9 }
 0x137   :  { %1382 = vrot.lane.b32.xlu1 %v1363_v20, %s4677_s29  ;;  %v1175_v20 = vrot.slane %v1173_v59, 5  ;;  %v1102_v23 = vld [vmem:[#allocation2 + $0x30] sm:$0xf]  ;;  %v751_v36 = vrot.slane %v5170_v13, 5  ;;  %v5203_v37 = vld [vmem:[#allocation2 + $0x3c] sm:$0x1] }
 0x138   :  { %1279 = vrot.lane.b32.xlu0 %v1204_v17, %s4678_s30  ;;  %v1355_v17 = vsel %vm4835_vm5, %v4332_v25, %v1354_v56  ;;  %v4333_v19 = vrot.slane %v5172_v14, 9  ;;  %v1234_v40 = vshrl.u32 %v1157_v22, 16  ;;  %v5210_v41 = vld [vmem:[#allocation2 + $0x28] sm:$0xf]  ;;  %v269_v42 = vmax.f32 %v5045_v9, 0.0  ;;  %v4609_v4 = vld [vmem:[%s6563_s4] sm:$0xff]  }
 0x139   :  { %v1176_v51 = vsel %vm4880_vm12, %v5162_v3, %v1175_v20  ;;  %v653_v46 = vshll.u32 %v5188_v28, 16  ;;  %v1237_v47 = vshll.u32 %v1157_v22, 16  ;;  %v1431_v49 = vsel %vm4866_vm8, 0, %v1430_v16  ;;  %v1433_v52 = vld [vmem:[#allocation2 + $0x90] sm:$0x1]  ;;  %4505 = vmatprep.subr.bf16.mxu1 %v4609_v4 }
 0x13a   :  { %v1243_v54 = vshll.u32 %v5203_v37, 16  ;;  %v4440_v25 = vpack.c.bf16 %v269_v42, %v269_v42  ;;  %1432 = vst [vmem:[#allocation2 + $0x88] sm:$0x1] %v1431_v49  ;;  %v1455_v9 = vsel %vm4874_vm9, 0, %v1454_v39  ;;  %v1457_v56 = vld [vmem:[#allocation2 + $0x94] sm:$0x1]  ;;  %4506 = vmatpush3.bf16.msra.mxu1 %v4609_v4 }
 0x13b   :  { %661 = vrot.lane.b32.xlu1 %v586_v53, %s4676_s28  ;;  %v5220_v53 = vrot.slane %v647_v29, 5  ;;  %v1206_v57 = vshrl.u32 %v5210_v41, 16  ;;  %1456 = vst [vmem:[#allocation2 + $0x8c] sm:$0x1] %v1455_v9  ;;  %v267_v58 = vmax.f32 %v5052_v26, 0.0  ;;  %v1425_v59 = vsel %vm4866_vm8, 0, %v1424_v31  ;;  %v5255_v31 = vpop.permute.xlu1 %1128 }
 0x13c   :  { %665 = vrot.lane.b32.xlu0 %v614_v44, %s4676_s28  ;;  %v5215_v44 = vrot.slane %v644_v21, 4  ;;  %v1449_v38 = vsel %vm4874_vm9, 0, %v1448_v32  ;;  %v5231_v60 = vrot.slane %v1234_v40, 4  ;;  %v1509_v61 = vshrl.u32 %v4440_v25, 16  ;;  %1426 = vst [vmem:[#allocation2 + $0x78] sm:$0x1] %v1425_v59 }
 0x13d   :  { %v1512_v62 = vshll.u32 %v4440_v25, 16  ;;  %1450 = vst [vmem:[#allocation2 + $0x7c] sm:$0x1] %v1449_v38  ;;  %v270_v63 = vmax.f32 %v5057_v30, 0.0  ;;  %v1427_v0 = vld [vmem:[#allocation2 + $0x80] sm:$0x1]  ;;  %v4438_v1 = vpack.c.bf16 %v267_v58, %v267_v58 }
 0x13e   :  { %v5236_v26 = vrot.slane %v1237_v47, 5  ;;  %v1434_v34 = vsel %vm4866_vm8, 0, %v1433_v52  ;;  %v1458_v3 = vsel %vm4874_vm9, 0, %v1457_v56  ;;  %v650_v30 = vor.u32 %v5220_v53, %v5215_v44  ;;  %v1451_v11 = vld [vmem:[#allocation2 + $0x84] sm:$0x1] }
 0x13f   :  { %969 = vrot.lane.b32.xlu1 %v882_v10, %s4681_s20  ;;  %v1209_v5 = vshll.u32 %v5210_v41, 16  ;;  %v4441_v10 = vpack.c.bf16 %v270_v63, %v270_v63  ;;  %1435 = vst [vmem:[#allocation2 + $0x90] sm:$0x1] %v1434_v34  ;;  %1459 = vst [vmem:[#allocation2 + $0x94] sm:$0x1] %v1458_v3  ;;  %v1493_v16 = vshrl.u32 %v4438_v1, 16 }
 0x140   :  { %1076 = vrot.lane.b32.xlu0 %v1059_v7, %s4680_s3  ;;  %v1511_v7 = vrot.slane %v1509_v61, 7  ;;  %v851_v12 = vld [vmem:[#allocation2 + $0x38] sm:$0xf]  ;;  %v268_v20 = vmax.f32 %v5069_v50, 0.0  ;;  %v1428_v21 = vsel %vm4866_vm8, 0, %v1427_v0  ;;  %v5257_v32 = vrot.slane %v1206_v57, 4 }
 0x141   :  { %v1520_v29 = vshll.u32 %v4441_v10, 16  ;;  %1429 = vst [vmem:[#allocation2 + $0x80] sm:$0x1] %v1428_v21  ;;  %v5259_v50 = vld [vmem:[#allocation2 + $0x28] sm:$0xf]  ;;  %v1452_v41 = vsel %vm4874_vm9, 0, %v1451_v11  ;;  %v1240_v61 = vor.u32 %v5236_v26, %v5231_v60 }
 0x142   :  { %v1514_v22 = vor.u32 %v1512_v62, %v1511_v7  ;;  %v1515_v39 = vrot.slane %v1511_v7, 4  ;;  %v4439_v40 = vpack.c.bf16 %v268_v20, %v268_v20  ;;  %v940_v42 = vshrl.u32 %v851_v12, 16  ;;  %v1579_v49 = vld [vmem:[#allocation2 + $0x8c] sm:$0x1]  ;;  %1453 = vst [vmem:[#allocation2 + $0x84] sm:$0x1] %v1452_v41 }
 0x143   :  { %1378 = vrot.lane.b32.xlu1 %v1355_v17, %s4677_s29  ;;  %v1496_v17 = vshll.u32 %v4438_v1, 16  ;;  %v943_v47 = vshll.u32 %v851_v12, 16  ;;  %v1564_v48 = vld [vmem:[#allocation2 + $0x78] sm:$0xf]  ;;  %v2167_v59 = vld [vmem:[#allocation2 + $0x68] sm:$0xf] }
 0x144   :  { %1122 = vrot.lane.b32.xlu0 %v1102_v23, %s4675_s27  ;;  %v1576_v23 = vld [vmem:[#allocation2 + $0x88] sm:$0xf]  ;;  %v1580_v25 = vsel %vm4866_vm8, %v1515_v39, %v1579_v49  ;;  %v1567_v57 = vld [vmem:[#allocation2 + $0x7c] sm:$0x1]  ;;  %v1501_v58 = vshrl.u32 %v4439_v40, 16  ;;  %v1504_v0 = vshll.u32 %v4439_v40, 16 }
 0x145   :  { %v1317_v38 = vld [vmem:[#allocation2 + $0x34] sm:$0x1]  ;;  %1581 = vst [vmem:[#allocation2 + $0x8c] sm:$0x1] %v1580_v25  ;;  %v5276_v1 = vrot.slane %v1209_v5, 5  ;;  %v942_v11 = vrot.slane %v940_v42, 4  ;;  %v5287_v5 = vpop.permute.xlu1 %2196 }
 0x146   :  { %v1582_v60 = vld [vmem:[#allocation2 + $0x90] sm:$0xf]  ;;  %v1585_v26 = vld [vmem:[#allocation2 + $0x94] sm:$0x1]  ;;  %v1503_v4 = vrot.slane %v1501_v58, 7  ;;  %v616_v12 = vshrl.u32 %v5259_v50, 16 }
 0x147   :  { %767 = vrot.lane.b32.xlu1 %v748_v45, %s4674_s17  ;;  %v1517_v45 = vshrl.u32 %v4441_v10, 16  ;;  %v1154_v7 = vld [vmem:[#allocation2 + $0x2c] sm:$0x1]  ;;  %v852_v10 = vld [vmem:[#allocation2 + $0x3c] sm:$0x1]  ;;  %v4611_v39 = vld [vmem:[%s6563_s4 + $0x10] sm:$0xff]   ;;  %v1212_v2 = vor.u32 %v5276_v1, %v5257_v32 }
 0x148   :  { %1275 = vrot.lane.b32.xlu0 %v1176_v51, %s4678_s30  ;;  %v1495_v51 = vrot.slane %v1493_v16, 7  ;;  %v945_v16 = vrot.slane %v943_v47, 5  ;;  %v1506_v20 = vor.u32 %v1504_v0, %v1503_v4  ;;  %v1507_v21 = vrot.slane %v1503_v4, 4  ;;  %v847_v13 = vld [vmem:[#allocation2 + $0x28] sm:$0xf] }
 0x149   :  { %v1519_v52 = vrot.slane %v1517_v45, 7  ;;  %v752_v45 = vsel %vm4835_vm5, %v4319_v35, %v751_v36  ;;  %v1215_v40 = vshll.u32 %v1154_v7, 16  ;;  %v1573_v41 = vld [vmem:[#allocation2 + $0x84] sm:$0x1]  ;;  %v4612_v35 = vld [vmem:[%s6563_s4 + $0x18] sm:$0xff]   ;;  %v1241_v36 = vrot.slane %v1240_v61, 4  ;;  %v5326_v32 = vpop.permute.xlu1 %1386 }
 0x14a   :  { %v1498_v9 = vor.u32 %v1496_v17, %v1495_v51  ;;  %v1499_v56 = vrot.slane %v1495_v51, 4  ;;  %v619_v17 = vshll.u32 %v5259_v50, 16  ;;  %v651_v50 = vrot.slane %v650_v30, 4  ;;  %v513_v51 = vld [vmem:[#allocation2 + $0x18] sm:$0xf] }
 0x14b   :  { %1078 = vrot.lane.b32.xlu1 %v5186_v27, %s4680_s3  ;;  %v4610_v27 = vld [vmem:[%s6563_s4 + $0x8] sm:$0xff]   ;;  %v1522_v62 = vor.u32 %v1520_v29, %v1519_v52  ;;  %v1523_v63 = vrot.slane %v1519_v52, 4  ;;  %v1358_v29 = vrot.slane %v1317_v38, 5  ;;  %521 = vst.msk [vmem:[#allocation3 + $0xc] sm:$0xf] %vm319_vm1, %v513_v51  ;;  %v1245_v28 = vrot.slane %v1243_v54, 5 }
 0x14c   :  { %1072 = vrot.lane.b32.xlu0 %v5182_v24, %s4680_s3  ;;  %v1577_v24 = vsel %vm4979_vm14, %v1514_v22, %v1576_v23  ;;  %4507 = vmatprep.subr.bf16.mxu1 %v4610_v27  ;;  %v1565_v34 = vsel %vm4979_vm14, %v1498_v9, %v1564_v48  ;;  %v1568_v3 = vsel %vm4866_vm8, %v1499_v56, %v1567_v57  ;;  %v1570_v22 = vld [vmem:[#allocation2 + $0x80] sm:$0xf]  ;;  %v655_v23 = vrot.slane %v653_v46, 5  ;;  %v537_v30 = vld [vmem:[#allocation2 + $0x2c] sm:$0x1] }
 0x14d   :  { %1578 = vst [vmem:[#allocation2 + $0x88] sm:$0xf] %v1577_v24  ;;  %1566 = vst [vmem:[#allocation2 + $0x78] sm:$0xf] %v1565_v34  ;;  %4508 = vmatpush3.bf16.msra.mxu1 %v4610_v27  ;;  %v1571_v6 = vsel %vm4979_vm14, %v1506_v20, %v1570_v22  ;;  %v949_v44 = vshll.u32 %v852_v10, 16  ;;  %v1574_v46 = vsel %vm4866_vm8, %v1507_v21, %v1573_v41  ;;  %v618_v42 = vrot.slane %v616_v12, 4 }
 0x14e   :  { %1569 = vst [vmem:[#allocation2 + $0x7c] sm:$0x1] %v1568_v3  ;;  %1572 = vst [vmem:[#allocation2 + $0x80] sm:$0xf] %v1571_v6  ;;  %4509 = vmatprep.subr.bf16.mxu1 %v4611_v39  ;;  %v946_v53 = vor.u32 %v945_v16, %v942_v11  ;;  %v621_v47 = vrot.slane %v619_v17, 5  ;;  %v1359_v37 = vsel %vm4835_vm5, %v4333_v19, %v1358_v29  ;;  %v912_v43 = vshrl.u32 %v847_v13, 16  ;;  %v5336_v3 = vpop.permute.xlu1 %1289 }
 0x14f   :  { %1074 = vrot.lane.b32.xlu1 %v5207_v18, %s4680_s3  ;;  %v1586_v18 = vsel %vm4866_vm8, %v1523_v63, %v1585_v26  ;;  %1575 = vst [vmem:[#allocation2 + $0x84] sm:$0x1] %v1574_v46  ;;  %v656_v54 = vsel %vm4880_vm12, %v651_v50, %v655_v23  ;;  %v915_v24 = vshll.u32 %v847_v13, 16  ;;  %v853_v49 = vld [vmem:[#allocation2 + $0x40] sm:$0xf]  ;;  %v1217_v52 = vrot.slane %v1215_v40, 5 }
 0x150   :  { %1384 = vrot.lane.b32.xlu0 %v5199_v33, %s4677_s29  ;;  %v1583_v33 = vsel %vm4979_vm14, %v1522_v62, %v1582_v60  ;;  %1587 = vst [vmem:[#allocation2 + $0x94] sm:$0x1] %v1586_v18  ;;  %v951_v27 = vrot.slane %v949_v44, 5  ;;  %v625_v25 = vshll.u32 %v537_v30, 16  ;;  %v1246_v14 = vsel %vm4880_vm12, %v1241_v36, %v1245_v28  ;;  %v1863_v19 = vld [vmem:[#allocation2 + $0x68] sm:$0xf] }
 0x151   :  { %1584 = vst [vmem:[#allocation2 + $0x90] sm:$0xf] %v1583_v33  ;;  %4510 = vmatpush3.bf16.msra.mxu1 %v4611_v39  ;;  %v1213_v9 = vrot.slane %v1212_v2, 4  ;;  %v947_v56 = vrot.slane %v946_v53, 4  ;;  %v622_v48 = vor.u32 %v621_v47, %v618_v42  ;;  %v848_v57 = vld [vmem:[#allocation2 + $0x2c] sm:$0x1] }
 0x152   :  { %4511 = vmatprep.subr.bf16.mxu1 %v4612_v35  ;;  %v914_v58 = vrot.slane %v912_v43, 4  ;;  %v954_v38 = vshrl.u32 %v853_v49, 16  ;;  %v957_v61 = vshll.u32 %v853_v49, 16  ;;  %v1159_v62 = vld [vmem:[#allocation2 + $0x40] sm:$0xf]  ;;  %v627_v63 = vrot.slane %v625_v25, 5  ;;  %v5345_v50 = vpop.permute.xlu1 %2356 }
 0x153   :  { %2184 = vrot.lane.b32.xlu1 %v2167_v59, %s4675_s27  ;;  %v917_v59 = vrot.slane %v915_v24, 5  ;;  %v921_v0 = vshll.u32 %v848_v57, 16  ;;  %v1218_v1 = vsel %vm4880_vm12, %v1213_v9, %v1217_v52  ;;  %v952_v34 = vsel %vm4880_vm12, %v947_v56, %v951_v27  ;;  %v854_v12 = vld [vmem:[#allocation2 + $0x44] sm:$0x1]  ;;  %v511_v33 = vld [vmem:[#allocation2 + $0x8] sm:$0xf] }
 0x154   :  { %769 = vrot.lane.b32.xlu0 %v752_v45, %s4674_s17  ;;  %v1248_v60 = vshrl.u32 %v1159_v62, 16  ;;  %v1251_v26 = vshll.u32 %v1159_v62, 16  ;;  %v623_v4 = vrot.slane %v622_v48, 4  ;;  %v956_v10 = vrot.slane %v954_v38, 4  ;;  %519 = vst.msk [vmem:[#allocation3 + $0x4] sm:$0xf] %vm319_vm1, %v511_v33 }
 0x155   :  { %4512 = vmatpush3.bf16.msra.mxu1 %v4612_v35  ;;  %v918_v7 = vor.u32 %v917_v59, %v914_v58  ;;  %v959_v11 = vrot.slane %v957_v61, 5  ;;  %v923_v18 = vrot.slane %v921_v0, 5  ;;  %v1861_v21 = vld [vmem:[#allocation2 + $0x58] sm:$0xf]  ;;  %v963_v45 = vshll.u32 %v854_v12, 16 }
 0x156   :  { %v1250_v16 = vrot.slane %v1248_v60, 4  ;;  %v1253_v17 = vrot.slane %v1251_v26, 5  ;;  %v628_v20 = vsel %vm4880_vm12, %v623_v4, %v627_v63  ;;  %v1160_v29 = vld [vmem:[#allocation2 + $0x44] sm:$0x1]  ;;  %v1771_v40 = vld [vmem:[#allocation2 + $0x68] sm:$0xe] }
 0x157   :  { %671 = vrot.lane.b32.xlu1 %v656_v54, %s4676_s28  ;;  %v919_v22 = vrot.slane %v918_v7, 4  ;;  %v960_v39 = vor.u32 %v959_v11, %v956_v10  ;;  %v1257_v51 = vshll.u32 %v1160_v29, 16  ;;  %v1772_v13 = vld [vmem:[#allocation2 + $0x6c] sm:$0x1]  ;;  %v1864_v41 = vld [vmem:[#allocation2 + $0x70] sm:$0xf] }
 0x158   :  { %1380 = vrot.lane.b32.xlu0 %v1359_v37, %s4677_s29  ;;  %v1254_v23 = vor.u32 %v1253_v17, %v1250_v16  ;;  %v965_v36 = vrot.slane %v963_v45, 5  ;;  %v538_v28 = vld [vmem:[#allocation2 + $0x30] sm:$0xf]  ;;  %v4340_v46 = vrot.slane %v1771_v40, 9  ;;  %v1811_v2 = vrot.slane %v1772_v13, 5 }
 0x159   :  { %v924_v6 = vsel %vm4880_vm12, %v919_v22, %v923_v18  ;;  %v961_v35 = vrot.slane %v960_v39, 4  ;;  %v849_v44 = vld [vmem:[#allocation2 + $0x30] sm:$0xf]  ;;  %v2073_v53 = vld [vmem:[#allocation2 + $0x68] sm:$0xe]  ;;  %v1259_v37 = vrot.slane %v1257_v51, 5 }
 0x15a   :  { %v1255_v47 = vrot.slane %v1254_v23, 4  ;;  %v2074_v54 = vld [vmem:[#allocation2 + $0x6c] sm:$0x1]  ;;  %v630_v43 = vshrl.u32 %v538_v28, 16  ;;  %v633_v24 = vshll.u32 %v538_v28, 16  ;;  %v926_v27 = vshrl.u32 %v849_v44, 16 }
 0x15b   :  { %1285 = vrot.lane.b32.xlu1 %v1246_v14, %s4678_s30  ;;  %v2168_v49 = vld [vmem:[#allocation2 + $0x70] sm:$0xf]  ;;  %v966_v52 = vsel %vm4880_vm12, %v961_v35, %v965_v36  ;;  %v929_v25 = vshll.u32 %v849_v44, 16  ;;  %v4347_v9 = vrot.slane %v2073_v53, 9  ;;  %v2111_v56 = vrot.slane %v2074_v54, 5 }
 0x15c   :  { %1881 = vrot.lane.b32.xlu0 %v1863_v19, %s4679_s2  ;;  %v1155_v14 = vld [vmem:[#allocation2 + $0x30] sm:$0xf]  ;;  %v514_v19 = vld [vmem:[#allocation2 + $0x20] sm:$0xf]  ;;  %v2376_v48 = vld [vmem:[#allocation2 + $0x68] sm:$0xe]  ;;  %v1260_v38 = vsel %vm4880_vm12, %v1255_v47, %v1259_v37  ;;  %v1812_v61 = vsel %vm4835_vm5, %v4340_v46, %v1811_v2 }
 0x15d   :  { %522 = vst.msk [vmem:[#allocation3 + $0x10] sm:$0xf] %vm319_vm1, %v514_v19  ;;  %v512_v57 = vld [vmem:[#allocation2 + $0x10] sm:$0xf]  ;;  %v2377_v62 = vld [vmem:[#allocation2 + $0x6c] sm:$0x1]  ;;  %v2112_v10 = vsel %vm4835_vm5, %v4347_v9, %v2111_v56 }
 0x15e   :  { %v539_v63 = vld [vmem:[#allocation2 + $0x34] sm:$0x1]  ;;  %v632_v0 = vrot.slane %v630_v43, 4  ;;  %520 = vst.msk [vmem:[#allocation3 + $0x8] sm:$0xf] %vm319_vm1, %v512_v57  ;;  %v928_v60 = vrot.slane %v926_v27, 4 }
 0x15f   :  { %1281 = vrot.lane.b32.xlu1 %v1218_v1, %s4678_s30  ;;  %v635_v1 = vrot.slane %v633_v24, 5  ;;  %v931_v26 = vrot.slane %v929_v25, 5  ;;  %v1220_v4 = vshrl.u32 %v1155_v14, 16  ;;  %v1223_v7 = vshll.u32 %v1155_v14, 16  ;;  %v1156_v29 = vld [vmem:[#allocation2 + $0x34] sm:$0x1] }
 0x160   :  { %979 = vrot.lane.b32.xlu0 %v952_v34, %s4681_s20  ;;  %v850_v34 = vld [vmem:[#allocation2 + $0x34] sm:$0x1]  ;;  %v4354_v33 = vrot.slane %v2376_v48, 9  ;;  %v2412_v18 = vrot.slane %v2377_v62, 5  ;;  %v639_v16 = vshll.u32 %v539_v63, 16  ;;  %v1229_v46 = vshll.u32 %v1156_v29, 16 }
 0x161   :  { %v935_v17 = vshll.u32 %v850_v34, 16  ;;  %v932_v22 = vor.u32 %v931_v26, %v928_v60  ;;  %v1222_v39 = vrot.slane %v1220_v4, 4  ;;  %v1225_v45 = vrot.slane %v1223_v7, 5  ;;  %v2166_v40 = vld [vmem:[#allocation2 + $0x60] sm:$0xf] }
 0x162   :  { %v2413_v13 = vsel %vm4835_vm5, %v4354_v33, %v2412_v18  ;;  %v1767_v35 = vld [vmem:[#allocation2 + $0x58] sm:$0xe]  ;;  %v1768_v2 = vld [vmem:[#allocation2 + $0x5c] sm:$0x1]  ;;  %v1231_v25 = vrot.slane %v1229_v46, 5  ;;  %vm1138_vm8 = vcmask 454016  }
 0x163   :  { %667 = vrot.lane.b32.xlu1 %v628_v20, %s4676_s28  ;;  %v1862_v20 = vld [vmem:[#allocation2 + $0x60] sm:$0xf]  ;;  %v933_v28 = vrot.slane %v932_v22, 4  ;;  %v1226_v44 = vor.u32 %v1225_v45, %v1222_v39  ;;  %v4338_v37 = vrot.slane %v1767_v35, 9  ;;  %v1803_v54 = vrot.slane %v1768_v2, 5 }
 0x164   :  { %1877 = vrot.lane.b32.xlu0 %v1861_v21, %s4679_s2  ;;  %v636_v21 = vor.u32 %v635_v1, %v632_v0  ;;  %v2069_v43 = vld [vmem:[#allocation2 + $0x58] sm:$0xe]  ;;  %v2070_v24 = vld [vmem:[#allocation2 + $0x5c] sm:$0x1]  ;;  %v2075_v14 = vld [vmem:[#allocation2 + $0x70] sm:$0xe] }
 0x165   :  { %v1227_v27 = vrot.slane %v1226_v44, 4  ;;  %v2076_v19 = vld [vmem:[#allocation2 + $0x74] sm:$0x1]  ;;  %v1611_v9 = vld [vmem:[#allocation2 + $0x68] sm:$0xf]  ;;  %v4345_v57 = vrot.slane %v2069_v43, 9  ;;  %v1804_v63 = vsel %vm4835_vm5, %v4338_v37, %v1803_v54 }
 0x166   :  { %v637_v36 = vrot.slane %v636_v21, 4  ;;  %v2378_v0 = vld [vmem:[#allocation2 + $0x70] sm:$0xe]  ;;  %v2379_v1 = vld [vmem:[#allocation2 + $0x74] sm:$0x1]  ;;  %v1664_v34 = vshrl.u32 %v1611_v9, 16 }
 0x167   :  { %1883 = vrot.lane.b32.xlu1 %v1864_v41, %s4679_s2  ;;  %v937_v41 = vrot.slane %v935_v17, 5  ;;  %v1232_v62 = vsel %vm4880_vm12, %v1227_v27, %v1231_v25  ;;  %v1667_v60 = vshll.u32 %v1611_v9, 16  ;;  %v2071_v26 = vld [vmem:[#allocation2 + $0x60] sm:$0xe]  ;;  %v2072_v4 = vld [vmem:[#allocation2 + $0x64] sm:$0x1] }
 0x168   :  { %975 = vrot.lane.b32.xlu0 %v924_v6, %s4681_s20  ;;  %v641_v6 = vrot.slane %v639_v16, 5  ;;  %v4355_v16 = vrot.slane %v2378_v0, 9  ;;  %v2416_v17 = vrot.slane %v2379_v1, 5  ;;  %v517_v21 = vld [vmem:[#allocation2 + $0x38] sm:$0xf]  ;;  %v4346_v22 = vrot.slane %v2071_v26, 9 }
 0x169   :  { %v5351_v30 = vpop.permute.xlu1 %1116  ;;  %v2107_v39 = vrot.slane %v2072_v4, 5  ;;  %v1773_v45 = vld [vmem:[#allocation2 + $0x70] sm:$0xe]  ;;  %v1666_v29 = vrot.slane %v1664_v34, 4  ;;  %525 = vst.msk [vmem:[#allocation3 + $0x1c] sm:$0xf] %vm319_vm1, %v517_v21 }
 0x16a   :  { %v5353_v42 = vpop.permute.xlu0 %810  ;;  %v2417_v44 = vsel %vm4835_vm5, %v4355_v16, %v2416_v17  ;;  %v4341_v46 = vrot.slane %v1773_v45, 9  ;;  %v1770_v2 = vld [vmem:[#allocation2 + $0x64] sm:$0x1]  ;;  %v1913_v54 = vld [vmem:[#allocation2 + $0x68] sm:$0xf]  ;;  %vm1396_vm9 = vcmask 585216  }
 0x16b   :  { %981 = vrot.lane.b32.xlu1 %v966_v52, %s4681_s20  ;;  %v938_v52 = vsel %vm4880_vm12, %v933_v28, %v937_v41  ;;  %v1769_v41 = vld [vmem:[#allocation2 + $0x60] sm:$0xe]  ;;  %v2108_v43 = vsel %vm4835_vm5, %v4346_v22, %v2107_v39  ;;  %v1607_v27 = vld [vmem:[#allocation2 + $0x58] sm:$0xf]  ;;  %v2171_v25 = vld [vmem:[#allocation2 + $0x88] sm:$0xf] }
 0x16c   :  { %2186 = vrot.lane.b32.xlu0 %v2168_v49, %s4675_s27  ;;  %v642_v49 = vsel %vm4880_vm12, %v637_v36, %v641_v6  ;;  %v1612_v6 = vld [vmem:[#allocation2 + $0x6c] sm:$0x1]  ;;  %v1807_v9 = vrot.slane %v1770_v2, 5  ;;  %v1957_v1 = vshll.u32 %v1913_v54, 16  ;;  %v1636_v34 = vshrl.u32 %v1607_v27, 16 }
 0x16d   :  { %v5360_v59 = vpop.permute.xlu1 %812  ;;  %v1909_v16 = vld [vmem:[#allocation2 + $0x58] sm:$0xf]  ;;  %v515_v17 = vld [vmem:[#allocation2 + $0x28] sm:$0xf]  ;;  %v1914_v39 = vld [vmem:[#allocation2 + $0x6c] sm:$0x1] }
 0x16e   :  { %v807_v58 = vpop.permute.xlu0 %806  ;;  %523 = vst.msk [vmem:[#allocation3 + $0x14] sm:$0xf] %vm319_vm1, %v515_v17  ;;  %v1926_v2 = vshrl.u32 %v1909_v16, 16  ;;  %vm3020_vm14 = vcmask 1041408  }
 0x16f   :  { %831 = vst.msk [vmem:[#allocation3] sm:$0xf] %vm830_vm2, %v807_v58  ;;  %1835 = vrot.lane.b32.xlu1 %v1812_v61, %s4674_s17  ;;  %v2103_v58 = vrot.slane %v2070_v24, 5  ;;  %v2115_v61 = vrot.slane %v2076_v19, 5  ;;  %v4339_v19 = vrot.slane %v1769_v41, 9 }
 0x170   :  { %1287 = vrot.lane.b32.xlu0 %v1260_v38, %s4678_s30  ;;  %v4348_v38 = vrot.slane %v2075_v14, 9  ;;  %v2374_v14 = vld [vmem:[#allocation2 + $0x60] sm:$0xe]  ;;  %v1608_v41 = vld [vmem:[#allocation2 + $0x5c] sm:$0x1] }
 0x171   :  { %v5374_v12 = vpop.permute.xlu1 %763  ;;  %v2104_v33 = vsel %vm4835_vm5, %v4345_v57, %v2103_v58  ;;  %v2375_v57 = vld [vmem:[#allocation2 + $0x64] sm:$0x1] }
 0x172   :  { %v5372_v11 = vpop.permute.xlu0 %1118  ;;  %v2116_v18 = vsel %vm4835_vm5, %v4348_v38, %v2115_v61  ;;  %v1954_v38 = vshrl.u32 %v1913_v54, 16  ;;  %v2408_v21 = vrot.slane %v2375_v57, 5  ;;  %v1915_v54 = vld [vmem:[#allocation2 + $0x70] sm:$0xf] }
 0x173   :  { %1879 = vrot.lane.b32.xlu1 %v1862_v20, %s4679_s2  ;;  %v2216_v20 = vld [vmem:[#allocation2 + $0x68] sm:$0xf]  ;;  %v1968_v57 = vshrl.u32 %v1915_v54, 16 }
 0x174   :  { %2137 = vrot.lane.b32.xlu0 %v2112_v10, %s4680_s3  ;;  %v2245_v35 = vshrl.u32 %v2216_v20, 16  ;;  %v2248_v37 = vshll.u32 %v2216_v20, 16  ;;  %v1808_v20 = vsel %vm4835_vm5, %v4339_v19, %v1807_v9  ;;  %v1956_v45 = vrot.slane %v1954_v38, 4  ;;  %v1910_v9 = vld [vmem:[#allocation2 + $0x5c] sm:$0x1] }
 0x175   :  { %v5380_v51 = vpop.permute.xlu1 %808  ;;  %v2169_v38 = vld [vmem:[#allocation2 + $0x78] sm:$0xf]  ;;  %v1970_v17 = vrot.slane %v1968_v57, 4  ;;  %v1592_v57 = vld [vmem:[#allocation2 + $0x70] sm:$0xf] }
 0x176   :  { %v5378_v23 = vpop.permute.xlu0 %1068  ;;  %v2247_v58 = vrot.slane %v2245_v35, 4  ;;  %v2250_v0 = vrot.slane %v2248_v37, 5  ;;  %v1638_v35 = vrot.slane %v1636_v34, 4  ;;  %v1929_v37 = vshll.u32 %v1909_v16, 16  ;;  %v1916_v34 = vld [vmem:[#allocation2 + $0x74] sm:$0x1] }
 0x177   :  { %2440 = vrot.lane.b32.xlu1 %v2413_v13, %s4677_s29  ;;  %v1774_v13 = vld [vmem:[#allocation2 + $0x74] sm:$0x1]  ;;  %1601 = vst.msk [vmem:[#allocation3 + $0x30] sm:$0xf] %vm319_vm1, %v1592_v57  ;;  %v2172_v57 = vld [vmem:[#allocation2 + $0x90] sm:$0xf] }
 0x178   :  { %2182 = vrot.lane.b32.xlu0 %v2166_v40, %s4675_s27  ;;  %v1669_v40 = vrot.slane %v1667_v60, 5  ;;  %v1815_v24 = vrot.slane %v1774_v13, 5  ;;  %v1639_v60 = vshll.u32 %v1607_v27, 16  ;;  %v2251_v13 = vor.u32 %v2250_v0, %v2247_v58 }
 0x179   :  { %v5388_v47 = vpop.permute.xlu1 %1374  ;;  %v1645_v27 = vshll.u32 %v1608_v41, 16  ;;  %v1971_v58 = vshll.u32 %v1915_v54, 16  ;;  %v1931_v0 = vrot.slane %v1929_v37, 5  ;;  %v516_v37 = vld [vmem:[#allocation2 + $0x30] sm:$0xf] }
 0x17a   :  { %v5386_v53 = vpop.permute.xlu0 %1114  ;;  %v1816_v26 = vsel %vm4835_vm5, %v4341_v46, %v1815_v24  ;;  %v1591_v54 = vld [vmem:[#allocation2 + $0x68] sm:$0xf]  ;;  %524 = vst.msk [vmem:[#allocation3 + $0x18] sm:$0xf] %vm319_vm1, %v516_v37 }
 0x17b   :  { %977 = vrot.lane.b32.xlu1 %v938_v52, %s4681_s20  ;;  %v1673_v52 = vshll.u32 %v1612_v6, 16  ;;  %v1959_v6 = vrot.slane %v1957_v1, 5  ;;  %v1647_v16 = vrot.slane %v1645_v27, 5  ;;  %v1613_v27 = vld [vmem:[#allocation2 + $0x70] sm:$0xf] }
 0x17c   :  { %669 = vrot.lane.b32.xlu0 %v642_v49, %s4676_s28  ;;  %v1670_v49 = vor.u32 %v1669_v40, %v1666_v29  ;;  %1600 = vst.msk [vmem:[#allocation3 + $0x2c] sm:$0xf] %vm319_vm1, %v1591_v54 }
 0x17d   :  { %v5398_v48 = vpop.permute.xlu1 %759  ;;  %v1960_v19 = vor.u32 %v1959_v6, %v1956_v45 }
 0x17e   :  { %v5396_v56 = vpop.permute.xlu0 %1064  ;;  %v1671_v4 = vrot.slane %v1670_v49, 4 }
 0x17f   :  { %1831 = vrot.lane.b32.xlu1 %v1804_v63, %s4674_s17  ;;  %v2217_v63 = vld [vmem:[#allocation2 + $0x6c] sm:$0x1] }
 0x180   :  { %1283 = vrot.lane.b32.xlu0 %v1232_v62, %s4678_s30  ;;  %v2254_v22 = vshll.u32 %v2217_v63, 16 }
 0x181   :  { %v5408_v10 = vpop.permute.xlu1 %1070 }
 0x182   :  { %v5406_v7 = vpop.permute.xlu0 %1376  ;;  %v2256_v49 = vrot.slane %v2254_v22, 5 }
 0x183   :  { %2139 = vrot.lane.b32.xlu1 %v2116_v18, %s4680_s3  ;;  %v4353_v18 = vrot.slane %v2374_v14, 9  ;;  %v2252_v14 = vrot.slane %v2251_v13, 4  ;;  %v2218_v13 = vld [vmem:[#allocation2 + $0x70] sm:$0xf] }
 0x184   :  { %2133 = vrot.lane.b32.xlu0 %v2104_v33, %s4680_s3  ;;  %v1675_v33 = vrot.slane %v1673_v52, 5  ;;  %v1963_v52 = vshll.u32 %v1914_v39, 16 }
 0x185   :  { %v5419_v28 = vpop.permute.xlu1 %1066  ;;  %v2409_v24 = vsel %vm4835_vm5, %v4353_v18, %v2408_v21  ;;  %v1961_v18 = vrot.slane %v1960_v19, 4  ;;  %v1867_v21 = vld [vmem:[#allocation2 + $0x88] sm:$0xf]  ;;  %v2257_v22 = vsel %vm4880_vm12, %v2252_v14, %v2256_v49  ;;  %v1589_v14 = vld [vmem:[#allocation2 + $0x58] sm:$0xf] }
 0x186   :  { %v5417_v36 = vpop.permute.xlu0 %765  ;;  %v1676_v46 = vsel %vm4880_vm12, %v1671_v4, %v1675_v33  ;;  %v1779_v19 = vld [vmem:[#allocation2 + $0x88] sm:$0xe]  ;;  %1598 = vst.msk [vmem:[#allocation3 + $0x24] sm:$0xf] %vm319_vm1, %v1589_v14 }
 0x187   :  { %2135 = vrot.lane.b32.xlu1 %v2108_v43, %s4680_s3  ;;  %v4613_v43 = vld [vmem:[%s6563_s4 + $0x20] ss:$0 sps:$4 sm:$0xff]   ;;  %s4686_s4 = smov 28  }
 0x188   :  { %2442 = vrot.lane.b32.xlu0 %v2417_v44, %s4677_s29  ;;  %v1641_v44 = vrot.slane %v1639_v60, 5  ;;  %4581 = vmatprep.subr.msk.bf16.mxu1 %vm2587_vm4, %v4613_v43  ;;  %v2589_v1 = vsel %vm2587_vm4, %v4613_v43, 0  ;;  %v1965_v60 = vrot.slane %v1963_v52, 5 }
 0x189   :  { %v5429_v62 = vpop.permute.xlu1 %1124  ;;  %4514 = vmatpush3.bf16.msra.mxu1 %v2589_v1  ;;  %v1594_v1 = vld [vmem:[#allocation2 + $0x80] sm:$0xf] }
 0x18a   :  { %v5427_v61 = vpop.permute.xlu0 %761  ;;  %v1642_v63 = vor.u32 %v1641_v44, %v1638_v35  ;;  %v1966_v43 = vsel %vm4880_vm12, %v1961_v18, %v1965_v60  ;;  %v1780_v18 = vld [vmem:[#allocation2 + $0x8c] sm:$0x1]  ;;  %1603 = vst.msk [vmem:[#allocation3 + $0x38] sm:$0xf] %vm319_vm1, %v1594_v1 }
 0x18b   :  { %2192 = vrot.lane.b32.xlu1 %v2171_v25, %s4675_s27 }
 0x18c   :  { %1837 = vrot.lane.b32.xlu0 %v1816_v26, %s4674_s17  ;;  %v1935_v26 = vshll.u32 %v1910_v9, 16  ;;  %v1643_v39 = vrot.slane %v1642_v63, 4  ;;  %v1911_v9 = vld [vmem:[#allocation2 + $0x60] sm:$0xf]  ;;  %v1868_v63 = vld [vmem:[#allocation2 + $0x90] sm:$0xf] }
 0x18d   :  { %v664_v40 = vpop.permute.xlu1 %663 }
 0x18e   :  { %v5438_v29 = vpop.permute.xlu0 %1372  ;;  %685 = vst.msk [vmem:[#allocation3 + $0xc] sm:$0xf] %vm681_vm13, %v664_v40  ;;  %v1977_v40 = vshll.u32 %v1916_v34, 16  ;;  %v5470_v6 = vrot.slane %v1935_v26, 5 }
 0x18f   :  { %785 = vst.msk [vmem:[#allocation3 + $0xc] sm:$0xf] %vm781_vm15, %v5374_v12  ;;  %1739 = vrot.lane.b32.xlu1 %v1676_v46, %s4676_s28  ;;  %v2259_v46 = vshrl.u32 %v2218_v13, 16 }
 0x190   :  { %1833 = vrot.lane.b32.xlu0 %v1808_v20, %s4674_s17  ;;  %834 = vst.msk [vmem:[#allocation3 + $0xc] sm:$0xf] %vm830_vm2, %v5360_v59  ;;  %v1928_v59 = vrot.slane %v1926_v2, 4  ;;  %v1973_v20 = vrot.slane %v1971_v58, 5  ;;  %v2262_v2 = vshll.u32 %v2218_v13, 16  ;;  %v1979_v52 = vrot.slane %v1977_v40, 5 }
 0x191   :  { %v5456_v12 = vpop.permute.xlu1 %1120  ;;  %v1590_v58 = vld [vmem:[#allocation2 + $0x60] sm:$0xf]  ;;  %v4344_v40 = vrot.slane %v1779_v19, 9  ;;  %v1827_v13 = vrot.slane %v1780_v18, 5  ;;  %v2082_v18 = vld [vmem:[#allocation2 + $0x8c] sm:$0x1] }
 0x192   :  { %v5454_v25 = vpop.permute.xlu0 %818  ;;  %v1932_v45 = vor.u32 %v1931_v0, %v1928_v59  ;;  %v1974_v44 = vor.u32 %v1973_v20, %v1970_v17  ;;  %1599 = vst.msk [vmem:[#allocation3 + $0x28] sm:$0xf] %vm319_vm1, %v1590_v58  ;;  %v1595_v59 = vld [vmem:[#allocation2 + $0x88] sm:$0xf]  ;;  %v1593_v0 = vld [vmem:[#allocation2 + $0x78] sm:$0xf] }
 0x193   :  { %2188 = vrot.lane.b32.xlu1 %v2169_v38, %s4675_s27  ;;  %v1865_v38 = vld [vmem:[#allocation2 + $0x78] sm:$0xf]  ;;  %v2264_v17 = vrot.slane %v2262_v2, 5  ;;  %1604 = vst.msk [vmem:[#allocation3 + $0x3c] sm:$0xf] %vm319_vm1, %v1595_v59 }
 0x194   :  { %2438 = vrot.lane.b32.xlu0 %v2409_v24, %s4677_s29  ;;  %v1648_v24 = vsel %vm4880_vm12, %v1643_v39, %v1647_v16  ;;  %v1933_v49 = vrot.slane %v1932_v45, 4  ;;  %v1975_v26 = vrot.slane %v1974_v44, 4  ;;  %v2261_v16 = vrot.slane %v2259_v46, 4  ;;  %1602 = vst.msk [vmem:[#allocation3 + $0x34] sm:$0xf] %vm319_vm1, %v1593_v0 }
 0x195   :  { %v5464_v33 = vpop.permute.xlu1 %1277  ;;  %v2219_v20 = vld [vmem:[#allocation2 + $0x74] sm:$0x1]  ;;  %v1940_v39 = vshrl.u32 %v1911_v9, 16  ;;  %v1943_v45 = vshll.u32 %v1911_v9, 16  ;;  %v1609_v9 = vld [vmem:[#allocation2 + $0x60] sm:$0xf] }
 0x196   :  { %v5462_v4 = vpop.permute.xlu0 %971  ;;  %v2265_v2 = vor.u32 %v2264_v17, %v2261_v16  ;;  %v2268_v37 = vshll.u32 %v2219_v20, 16  ;;  %v1650_v59 = vshrl.u32 %v1609_v9, 16  ;;  %v1653_v0 = vshll.u32 %v1609_v9, 16 }
 0x197   :  { %2344 = vrot.lane.b32.xlu1 %v2257_v22, %s4678_s30  ;;  %v1681_v22 = vshll.u32 %v1613_v27, 16  ;;  %vm1299_vm1 = vcmask 519616  }
 0x198   :  { %1889 = vrot.lane.b32.xlu0 %v1867_v21, %s4679_s2  ;;  %v1678_v21 = vshrl.u32 %v1613_v27, 16  ;;  %v1945_v27 = vrot.slane %v1943_v45, 5  ;;  %v2270_v14 = vrot.slane %v2268_v37, 5  ;;  %v2381_v45 = vld [vmem:[#allocation2 + $0x7c] sm:$0x1]  ;;  %v2127_v37 = vrot.slane %v2082_v18, 5 }
 0x199   :  { %v5474_v35 = vpop.permute.xlu1 %820 }
 0x19a   :  { %v5472_v41 = vpop.permute.xlu0 %814  ;;  %v1680_v54 = vrot.slane %v1678_v21, 4 }
 0x19b   :  { %1735 = vrot.lane.b32.xlu1 %v1648_v24, %s4676_s28  ;;  %v1942_v24 = vrot.slane %v1940_v39, 4  ;;  %v2380_v39 = vld [vmem:[#allocation2 + $0x78] sm:$0xe] }
 0x19c   :  { %2041 = vrot.lane.b32.xlu0 %v1966_v43, %s4681_s20  ;;  %v1683_v43 = vrot.slane %v1681_v22, 5  ;;  %v2214_v22 = vld [vmem:[#allocation2 + $0x60] sm:$0xf] }
 0x19d   :  { %v974_v60 = vpop.permute.xlu1 %973 }
 0x19e   :  { %v660_v34 = vpop.permute.xlu0 %659  ;;  %995 = vst.msk [vmem:[#allocation3 + $0xc] sm:$0xf] %vm991_vm6, %v974_v60  ;;  %v1684_v58 = vor.u32 %v1683_v43, %v1680_v54  ;;  %v2231_v54 = vshrl.u32 %v2214_v22, 16  ;;  %v2234_v43 = vshll.u32 %v2214_v22, 16 }
 0x19f   :  { %683 = vst.msk [vmem:[#allocation3 + $0x4] sm:$0xf] %vm681_vm13, %v660_v34  ;;  %1891 = vrot.lane.b32.xlu1 %v1868_v63, %s4679_s2 }
 0x1a0   :  { %783 = vst.msk [vmem:[#allocation3 + $0x4] sm:$0xf] %vm781_vm15, %v5398_v48  ;;  %1885 = vrot.lane.b32.xlu0 %v1865_v38, %s4679_s2  ;;  %v1938_v48 = vsel %vm4880_vm12, %v1933_v49, %v5470_v6  ;;  %v1946_v38 = vor.u32 %v1945_v27, %v1942_v24  ;;  %v1685_v17 = vrot.slane %v1684_v58, 4 }
 0x1a1   :  { %1092 = vst.msk [vmem:[#allocation3 + $0xc] sm:$0xf] %vm1088_vm7, %v5408_v10  ;;  %v5502_v46 = vpop.permute.xlu1 %771  ;;  %v1980_v10 = vsel %vm4880_vm12, %v1975_v26, %v1979_v52  ;;  %v1828_v52 = vsel %vm4835_vm5, %v4344_v40, %v1827_v13  ;;  %v2081_v26 = vld [vmem:[#allocation2 + $0x88] sm:$0xe]  ;;  %v1610_v40 = vld [vmem:[#allocation2 + $0x64] sm:$0x1] }
 0x1a2   :  { %832 = vst.msk [vmem:[#allocation3 + $0x4] sm:$0xf] %vm830_vm2, %v5380_v51  ;;  %v968_v44 = vpop.permute.xlu0 %967  ;;  %v1614_v51 = vld [vmem:[#allocation2 + $0x74] sm:$0x1]  ;;  %v1947_v20 = vrot.slane %v1946_v38, 4  ;;  %v1652_v13 = vrot.slane %v1650_v59, 4 }
 0x1a3   :  { %1142 = vst.msk [vmem:[#allocation3 + $0xc] sm:$0xf] %vm1138_vm8, %v5456_v12  ;;  %2043 = vrot.lane.b32.xlu1 %v1980_v10, %s4681_s20  ;;  %v1912_v12 = vld [vmem:[#allocation2 + $0x64] sm:$0x1]  ;;  %v1687_v19 = vshll.u32 %v1614_v51, 16  ;;  %v1659_v9 = vshll.u32 %v1610_v40, 16 }
 0x1a4   :  { %992 = vst.msk [vmem:[#allocation3] sm:$0xf] %vm991_vm6, %v968_v44  ;;  %2037 = vrot.lane.b32.xlu0 %v1938_v48, %s4681_s20  ;;  %v1949_v63 = vshll.u32 %v1912_v12, 16  ;;  %v1655_v44 = vrot.slane %v1653_v0, 5  ;;  %v1775_v51 = vld [vmem:[#allocation2 + $0x78] sm:$0xe] }
 0x1a5   :  { %1089 = vst.msk [vmem:[#allocation3] sm:$0xf] %vm1088_vm7, %v5396_v56  ;;  %v5518_v49 = vpop.permute.xlu1 %816  ;;  %v2266_v56 = vrot.slane %v2265_v2, 4  ;;  %v1689_v60 = vrot.slane %v1687_v19, 5  ;;  %v4351_v2 = vrot.slane %v2081_v26, 9  ;;  %v4356_v12 = vrot.slane %v2380_v39, 9 }
 0x1a6   :  { %1139 = vst.msk [vmem:[#allocation3] sm:$0xf] %vm1138_vm8, %v5386_v53  ;;  %v5516_v6 = vpop.permute.xlu0 %1126  ;;  %v1866_v53 = vld [vmem:[#allocation2 + $0x80] sm:$0xf]  ;;  %v1951_v21 = vrot.slane %v1949_v63, 5  ;;  %v1656_v58 = vor.u32 %v1655_v44, %v1652_v13  ;;  %v2233_v0 = vrot.slane %v2231_v54, 4 }
 0x1a7   :  { %1843 = vrot.lane.b32.xlu1 %v1828_v52, %s4674_s17  ;;  %v2271_v16 = vsel %vm4880_vm12, %v2266_v56, %v2270_v14  ;;  %v1690_v24 = vsel %vm4880_vm12, %v1685_v17, %v1689_v60  ;;  %v2420_v52 = vrot.slane %v2381_v45, 5  ;;  %v1776_v14 = vld [vmem:[#allocation2 + $0x7c] sm:$0x1]  ;;  %v5538_v19 = vld [vmem:[#allocation2 + $0x90] sm:$0xe]  ;;  %v4342_v56 = vrot.slane %v1775_v51, 9 }
 0x1a8   :  { %2194 = vrot.lane.b32.xlu0 %v2172_v57, %s4675_s27  ;;  %v1952_v27 = vsel %vm4880_vm12, %v1947_v20, %v1951_v21  ;;  %v1619_v57 = vld [vmem:[#allocation2 + $0x88] sm:$0xf]  ;;  %v1819_v63 = vrot.slane %v1776_v14, 5  ;;  %v4352_v59 = vrot.slane %v5538_v19, 9  ;;  %v1620_v60 = vld [vmem:[#allocation2 + $0x8c] sm:$0x1] }
 0x1a9   :  { %v5526_v34 = vpop.permute.xlu1 %1382  ;;  %v1720_v26 = vshrl.u32 %v1619_v57, 16  ;;  %v1723_v18 = vshll.u32 %v1619_v57, 16  ;;  %v5568_v20 = vld [vmem:[#allocation2 + $0x80] sm:$0xe]  ;;  %v2080_v21 = vld [vmem:[#allocation2 + $0x84] sm:$0x1] }
 0x1aa   :  { %v5524_v1 = vpop.permute.xlu0 %1279  ;;  %v1657_v22 = vrot.slane %v1656_v58, 4  ;;  %v5574_v39 = vld [vmem:[#allocation2 + $0x78] sm:$0xe]  ;;  %v1729_v44 = vshll.u32 %v1620_v60, 16  ;;  %v2123_v54 = vrot.slane %v2080_v21, 5 }
 0x1ab   :  { %1887 = vrot.lane.b32.xlu1 %v1866_v53, %s4679_s2  ;;  %v2084_v53 = vld [vmem:[#allocation2 + $0x94] sm:$0x1]  ;;  %v1615_v14 = vld [vmem:[#allocation2 + $0x78] sm:$0xf]  ;;  %v1921_v19 = vld [vmem:[#allocation2 + $0x88] sm:$0xf] }
 0x1ac   :  { %2346 = vrot.lane.b32.xlu0 %v2271_v16, %s4678_s30  ;;  %v2224_v16 = vld [vmem:[#allocation2 + $0x88] sm:$0xf]  ;;  %v1731_v58 = vrot.slane %v1729_v44, 5  ;;  %v2010_v60 = vshrl.u32 %v1921_v19, 16  ;;  %v1616_v44 = vld [vmem:[#allocation2 + $0x7c] sm:$0x1] }
 0x1ad   :  { %v662_v10 = vpop.permute.xlu1 %661  ;;  %s4687_s2 = smov 70  }
 0x1ae   :  { %v666_v48 = vpop.permute.xlu0 %665  ;;  %684 = vst.msk [vmem:[#allocation3 + $0x8] sm:$0xf] %vm681_vm13, %v662_v10  ;;  %v4350_v10 = vrot.slane %v5568_v20, 9 }
 0x1af   :  { %686 = vst.msk [vmem:[#allocation3 + $0x10] sm:$0xf] %vm681_vm13, %v666_v48  ;;  %2039 = vrot.lane.b32.xlu1 %v1952_v27, %s4681_s20  ;;  %v2301_v48 = vshrl.u32 %v2224_v16, 16  ;;  %v2220_v27 = vld [vmem:[#allocation2 + $0x78] sm:$0xf] }
 0x1b0   :  { %786 = vst.msk [vmem:[#allocation3 + $0x10] sm:$0xf] %vm781_vm15, %v5417_v36  ;;  %784 = vst.msk [vmem:[#allocation3 + $0x8] sm:$0xf] %vm781_vm15, %v5427_v61  ;;  %1741 = vrot.lane.b32.xlu0 %v1690_v24, %s4676_s28  ;;  %v2215_v36 = vld [vmem:[#allocation2 + $0x64] sm:$0x1] }
 0x1b1   :  { %835 = vst.msk [vmem:[#allocation3 + $0x10] sm:$0xf] %vm830_vm2, %v5472_v41  ;;  %833 = vst.msk [vmem:[#allocation3 + $0x8] sm:$0xf] %vm830_vm2, %v5353_v42  ;;  %v970_v38 = vpop.permute.xlu1 %969  ;;  %v2236_v41 = vrot.slane %v2234_v43, 5  ;;  %v2128_v42 = vsel %vm4835_vm5, %v4351_v2, %v2127_v37  ;;  %v2240_v17 = vshll.u32 %v2215_v36, 16 }
 0x1b2   :  { %994 = vst.msk [vmem:[#allocation3 + $0x8] sm:$0xf] %vm991_vm6, %v5462_v4  ;;  %v5552_v61 = vpop.permute.xlu0 %1076  ;;  %993 = vst.msk [vmem:[#allocation3 + $0x4] sm:$0xf] %vm991_vm6, %v970_v38  ;;  %v2421_v4 = vsel %vm4835_vm5, %v4356_v12, %v2420_v52  ;;  %v1725_v2 = vrot.slane %v1723_v18, 5  ;;  %v4349_v43 = vrot.slane %v5574_v39, 9 }
 0x1b3   :  { %1091 = vst.msk [vmem:[#allocation3 + $0x8] sm:$0xf] %vm1088_vm7, %v5378_v23  ;;  %1090 = vst.msk [vmem:[#allocation3 + $0x4] sm:$0xf] %vm1088_vm7, %v5419_v28  ;;  %2444 = vrot.lane.b32.xlu1 %v2421_v4, %s4677_s29  ;;  %v1661_v23 = vrot.slane %v1659_v9, 5  ;;  %v2237_v13 = vor.u32 %v2236_v41, %v2233_v0  ;;  %v2242_v51 = vrot.slane %v2240_v17, 5 }
 0x1b4   :  { %1141 = vst.msk [vmem:[#allocation3 + $0x8] sm:$0xf] %vm1138_vm8, %v5372_v11  ;;  %2145 = vrot.lane.b32.xlu0 %v2128_v42, %s4680_s3  ;;  %1140 = vst.msk [vmem:[#allocation3 + $0x4] sm:$0xf] %vm1138_vm8, %v5351_v30  ;;  %v2131_v11 = vrot.slane %v2084_v53, 5  ;;  %v1820_v30 = vsel %vm4835_vm5, %v4342_v56, %v1819_v63  ;;  %v2303_v36 = vrot.slane %v2301_v48, 4 }
 0x1b5   :  { %1302 = vst.msk [vmem:[#allocation3 + $0x8] sm:$0xf] %vm1299_vm1, %v5524_v1  ;;  %v5576_v28 = vld [vmem:[#allocation2 + $0x7c] sm:$0x1]  ;;  %1301 = vst.msk [vmem:[#allocation3 + $0x4] sm:$0xf] %vm1299_vm1, %v5464_v33  ;;  %v5584_v40 = vpop.permute.xlu1 %1378 }
 0x1b6   :  { %1399 = vst.msk [vmem:[#allocation3 + $0x8] sm:$0xf] %vm1396_vm9, %v5406_v7  ;;  %v5582_v45 = vpop.permute.xlu0 %1122  ;;  %v2170_v1 = vld [vmem:[#allocation2 + $0x80] sm:$0xf]  ;;  %1398 = vst.msk [vmem:[#allocation3 + $0x4] sm:$0xf] %vm1396_vm9, %v5388_v47  ;;  %v1662_v47 = vsel %vm4880_vm12, %v1657_v22, %v1661_v23  ;;  %v2132_v12 = vsel %vm4835_vm5, %v4352_v59, %v2131_v11 }
 0x1b7   :  { %v1722_v7 = vrot.slane %v1720_v26, 4  ;;  %v2225_v37 = vld [vmem:[#allocation2 + $0x8c] sm:$0x1]  ;;  %v2304_v33 = vshll.u32 %v2224_v16, 16  ;;  %1839 = vrot.lane.b32.xlu1 %v1820_v30, %s4674_s17  ;;  %v2119_v24 = vrot.slane %v5576_v28, 5  ;;  %v2238_v56 = vrot.slane %v2237_v13, 4 }
 0x1b8   :  { %2190 = vrot.lane.b32.xlu0 %v2170_v1, %s4675_s27  ;;  %v1777_v52 = vld [vmem:[#allocation2 + $0x80] sm:$0xe]  ;;  %v2310_v38 = vshll.u32 %v2225_v37, 16  ;;  %v1778_v63 = vld [vmem:[#allocation2 + $0x84] sm:$0x1]  ;;  %v2273_v41 = vshrl.u32 %v2220_v27, 16 }
 0x1b9   :  { %v5599_v57 = vpop.permute.xlu1 %767  ;;  %v1726_v53 = vor.u32 %v1725_v2, %v1722_v7  ;;  %v2306_v0 = vrot.slane %v2304_v33, 5  ;;  %v2276_v42 = vshll.u32 %v2220_v27, 16  ;;  %v1692_v59 = vshrl.u32 %v1615_v14, 16  ;;  %v2221_v23 = vld [vmem:[#allocation2 + $0x7c] sm:$0x1]  ;;  %s4694_s27 = smov 112  }
 0x1ba   :  { %v1276_v9 = vpop.permute.xlu0 %1275  ;;  %v1695_v4 = vshll.u32 %v1615_v14, 16  ;;  %v2013_v26 = vshll.u32 %v1921_v19, 16  ;;  %v4343_v18 = vrot.slane %v1777_v52, 9  ;;  %v1823_v16 = vrot.slane %v1778_v63, 5  ;;  %v1923_v22 = vld [vmem:[#allocation2 + $0x90] sm:$0xf] }
 0x1bb   :  { %1300 = vst.msk [vmem:[#allocation3] sm:$0xf] %vm1299_vm1, %v1276_v9  ;;  %2147 = vrot.lane.b32.xlu1 %v2132_v12, %s4680_s3  ;;  %v2243_v21 = vsel %vm4880_vm12, %v2238_v56, %v2242_v51  ;;  %v1917_v11 = vld [vmem:[#allocation2 + $0x78] sm:$0xf]  ;;  %v1727_v39 = vrot.slane %v1726_v53, 4  ;;  %v2307_v28 = vor.u32 %v2306_v0, %v2303_v36  ;;  %v2275_v1 = vrot.slane %v2273_v41, 4 }
 0x1bc   :  { %1397 = vst.msk [vmem:[#allocation3] sm:$0xf] %vm1396_vm9, %v5438_v29  ;;  %1737 = vrot.lane.b32.xlu0 %v1662_v47, %s4676_s28  ;;  %v2124_v29 = vsel %vm4835_vm5, %v4350_v10, %v2123_v54  ;;  %v2278_v30 = vrot.slane %v2276_v42, 5  ;;  %v5614_v13 = vld [vmem:[#allocation2 + $0x80] sm:$0xe]  ;;  %v1694_v48 = vrot.slane %v1692_v59, 4  ;;  %v2120_v10 = vsel %vm4835_vm5, %v4349_v43, %v2119_v24 }
 0x1bd   :  { %v5608_v20 = vpop.permute.xlu1 %1078  ;;  %v1697_v7 = vrot.slane %v1695_v4, 5  ;;  %v2012_v2 = vrot.slane %v2010_v60, 4  ;;  %v2015_v37 = vrot.slane %v2013_v26, 5  ;;  %v1922_v33 = vld [vmem:[#allocation2 + $0x8c] sm:$0x1]  ;;  %v2024_v51 = vshrl.u32 %v1923_v22, 16 }
 0x1be   :  { %v5606_v17 = vpop.permute.xlu0 %1072  ;;  %v2027_v54 = vshll.u32 %v1923_v22, 16  ;;  %v1982_v27 = vshrl.u32 %v1917_v11, 16  ;;  %v2312_v52 = vrot.slane %v2310_v38, 5  ;;  %v2282_v14 = vshll.u32 %v2221_v23, 16  ;;  %v1919_v56 = vld [vmem:[#allocation2 + $0x80] sm:$0xf] }
 0x1bf   :  { %2143 = vrot.lane.b32.xlu1 %v2124_v29, %s4680_s3  ;;  %v4357_v19 = vrot.slane %v5614_v13, 9  ;;  %v1985_v9 = vshll.u32 %v1917_v11, 16  ;;  %v1732_v36 = vsel %vm4880_vm12, %v1727_v39, %v1731_v58  ;;  %v2308_v53 = vrot.slane %v2307_v28, 4  ;;  %v2226_v0 = vld [vmem:[#allocation2 + $0x90] sm:$0xf] }
 0x1c0   :  { %2342 = vrot.lane.b32.xlu0 %v2243_v21, %s4678_s30  ;;  %v1824_v43 = vsel %vm4835_vm5, %v4343_v18, %v1823_v16  ;;  %v2279_v24 = vor.u32 %v2278_v30, %v2275_v1  ;;  %v2383_v38 = vld [vmem:[#allocation2 + $0x84] sm:$0x1]  ;;  %v1698_v41 = vor.u32 %v1697_v7, %v1694_v48  ;;  %v1701_v42 = vshll.u32 %v1616_v44, 16  ;;  %v1924_v60 = vld [vmem:[#allocation2 + $0x94] sm:$0x1] }
 0x1c1   :  { %v5622_v12 = vpop.permute.xlu1 %1074  ;;  %v2016_v59 = vor.u32 %v2015_v37, %v2012_v2  ;;  %v2019_v4 = vshll.u32 %v1922_v33, 16  ;;  %v2026_v58 = vrot.slane %v2024_v51, 4  ;;  %v2029_v26 = vrot.slane %v2027_v54, 5  ;;  %v1918_v16 = vld [vmem:[#allocation2 + $0x7c] sm:$0x1] }
 0x1c2   :  { %v5620_v47 = vpop.permute.xlu0 %1384  ;;  %v1984_v23 = vrot.slane %v1982_v27, 4  ;;  %v1996_v21 = vshrl.u32 %v1919_v56, 16  ;;  %v1987_v22 = vrot.slane %v1985_v9, 5  ;;  %v1999_v11 = vshll.u32 %v1919_v56, 16 }
 0x1c3   :  { %v4608_v63 = vld [vmem:[#allocation3] sm:$0xff]   ;;  %1747 = vrot.lane.b32.xlu1 %v1732_v36, %s4676_s28  ;;  %v2315_v39 = vshrl.u32 %v2226_v0, 16  ;;  %v2318_v28 = vshll.u32 %v2226_v0, 16  ;;  %v2313_v1 = vsel %vm4880_vm12, %v2308_v53, %v2312_v52  ;;  %v2280_v30 = vrot.slane %v2279_v24, 4  ;;  %v2227_v0 = vld [vmem:[#allocation2 + $0x94] sm:$0x1] }
 0x1c4   :  { %2141 = vrot.lane.b32.xlu0 %v2120_v10, %s4680_s3  ;;  %4515 = vmatprep.mubr.msk.bf16.mxu1 %vm2562_vm10, %v4608_v63  ;;  %v2284_v13 = vrot.slane %v2282_v14, 5  ;;  %v2424_v44 = vrot.slane %v2383_v38, 5  ;;  %v1699_v48 = vrot.slane %v1698_v41, 4  ;;  %v1703_v7 = vrot.slane %v1701_v42, 5  ;;  %v1617_v10 = vld [vmem:[#allocation2 + $0x80] sm:$0xf] }
 0x1c5   :  { %v5634_v18 = vpop.permute.xlu1 %2184  ;;  %v2021_v2 = vrot.slane %v2019_v4, 5  ;;  %v2033_v37 = vshll.u32 %v1924_v60, 16  ;;  %v2017_v33 = vrot.slane %v2016_v59, 4  ;;  %v2030_v51 = vor.u32 %v2029_v26, %v2026_v58  ;;  %v1920_v36 = vld [vmem:[#allocation2 + $0x84] sm:$0x1] }
 0x1c6   :  { %v5632_v29 = vpop.permute.xlu0 %769  ;;  %v1991_v54 = vshll.u32 %v1918_v16, 16  ;;  %v1998_v27 = vrot.slane %v1996_v21, 4  ;;  %v1988_v52 = vor.u32 %v1987_v22, %v1984_v23  ;;  %v2001_v14 = vrot.slane %v1999_v11, 5  ;;  %v2222_v4 = vld [vmem:[#allocation2 + $0x80] sm:$0xf] }
 0x1c7   :  { %2352 = vrot.lane.b32.xlu1 %v2313_v1, %s4678_s30  ;;  %v2317_v63 = vrot.slane %v2315_v39, 4  ;;  %v2320_v53 = vrot.slane %v2318_v28, 5  ;;  %v2425_v24 = vsel %vm4835_vm5, %v4357_v19, %v2424_v44  ;;  %v1706_v38 = vshrl.u32 %v1617_v10, 16  ;;  %v1618_v39 = vld [vmem:[#allocation2 + $0x84] sm:$0x1] }
 0x1c8   :  { %1841 = vrot.lane.b32.xlu0 %v1824_v43, %s4674_s17  ;;  %v2285_v43 = vsel %vm4880_vm12, %v2280_v30, %v2284_v13  ;;  %v1709_v41 = vshll.u32 %v1617_v10, 16  ;;  %v1704_v42 = vsel %vm4880_vm12, %v1699_v48, %v1703_v7  ;;  %v2035_v59 = vrot.slane %v2033_v37, 5 }
 0x1c9   :  { %v672_v56 = vpop.permute.xlu1 %671  ;;  %v2022_v19 = vsel %vm4880_vm12, %v2017_v33, %v2021_v2  ;;  %v2031_v60 = vrot.slane %v2030_v51, 4  ;;  %v1993_v58 = vrot.slane %v1991_v54, 5  ;;  %v2005_v26 = vshll.u32 %v1920_v36, 16  ;;  %v2384_v33 = vld [vmem:[#allocation2 + $0x88] sm:$0xe] }
 0x1ca   :  { %v5640_v9 = vpop.permute.xlu0 %1380  ;;  %689 = vst.msk [vmem:[#allocation3 + $0x1c] sm:$0xf] %vm681_vm13, %v672_v56  ;;  %v1989_v21 = vrot.slane %v1988_v52, 4  ;;  %v2002_v16 = vor.u32 %v2001_v14, %v1998_v27  ;;  %v2321_v22 = vor.u32 %v2320_v53, %v2317_v63  ;;  %v2324_v11 = vshll.u32 %v2227_v0, 16  ;;  %v2385_v27 = vld [vmem:[#allocation2 + $0x8c] sm:$0x1] }
 0x1cb   :  { %789 = vst.msk [vmem:[#allocation3 + $0x1c] sm:$0xf] %vm781_vm15, %v5502_v46  ;;  %2348 = vrot.lane.b32.xlu1 %v2285_v43, %s4678_s30  ;;  %v1708_v28 = vrot.slane %v1706_v38, 4  ;;  %v1711_v1 = vrot.slane %v1709_v41, 5  ;;  %v2287_v30 = vshrl.u32 %v2222_v4, 16  ;;  %v2290_v13 = vshll.u32 %v2222_v4, 16 }
 0x1cc   :  { %2446 = vrot.lane.b32.xlu0 %v2425_v24, %s4677_s29  ;;  %838 = vst.msk [vmem:[#allocation3 + $0x1c] sm:$0xf] %vm830_vm2, %v5474_v35  ;;  %v2036_v35 = vsel %vm4880_vm12, %v2031_v60, %v2035_v59  ;;  %v2007_v44 = vrot.slane %v2005_v26, 5  ;;  %v1994_v2 = vsel %vm4880_vm12, %v1989_v21, %v1993_v58  ;;  %v2003_v37 = vrot.slane %v2002_v16, 4  ;;  %v2223_v14 = vld [vmem:[#allocation2 + $0x84] sm:$0x1] }
 0x1cd   :  { %v5657_v23 = vpop.permute.xlu1 %1285  ;;  %v2326_v10 = vrot.slane %v2324_v11, 5  ;;  %v1715_v51 = vshll.u32 %v1618_v39, 16  ;;  %v2322_v54 = vrot.slane %v2321_v22, 4  ;;  %v1712_v56 = vor.u32 %v1711_v1, %v1708_v28  ;;  %v2388_v41 = vld [vmem:[#allocation2 + $0x98] sm:$0xe] }
 0x1ce   :  { %v5659_v46 = vpop.permute.xlu0 %1881  ;;  %v2289_v52 = vrot.slane %v2287_v30, 4  ;;  %v2292_v36 = vrot.slane %v2290_v13, 5  ;;  %v4358_v63 = vrot.slane %v2384_v33, 9  ;;  %v2008_v24 = vsel %vm4880_vm12, %v2003_v37, %v2007_v44  ;;  %v2387_v28 = vld [vmem:[#allocation2 + $0x94] sm:$0x1] }
 0x1cf   :  { %1743 = vrot.lane.b32.xlu1 %v1704_v42, %s4676_s28  ;;  %v2428_v0 = vrot.slane %v2385_v27, 5  ;;  %v1717_v38 = vrot.slane %v1715_v51, 5  ;;  %v2389_v42 = vld [vmem:[#allocation2 + $0x9c] sm:$0x1]  ;;  %v1713_v59 = vrot.slane %v1712_v56, 4  ;;  %v4360_v60 = vrot.slane %v2388_v41, 9 }
 0x1d0   :  { %2049 = vrot.lane.b32.xlu0 %v2022_v19, %s4681_s20  ;;  %v2293_v4 = vor.u32 %v2292_v36, %v2289_v52  ;;  %v2296_v19 = vshll.u32 %v2223_v14, 16  ;;  %v2436_v58 = vrot.slane %v2389_v42, 5  ;;  %v2432_v44 = vrot.slane %v2387_v28, 5 }
 0x1d1   :  { %v1282_v48 = vpop.permute.xlu1 %1281  ;;  %v2429_v16 = vsel %vm4835_vm5, %v4358_v63, %v2428_v0 }
 0x1d2   :  { %v5665_v7 = vpop.permute.xlu0 %979  ;;  %1303 = vst.msk [vmem:[#allocation3 + $0xc] sm:$0xf] %vm1299_vm1, %v1282_v48  ;;  %v2294_v11 = vrot.slane %v2293_v4, 4  ;;  %v2298_v39 = vrot.slane %v2296_v19, 5  ;;  %v2437_v1 = vsel %vm4835_vm5, %v4360_v60, %v2436_v58 }
 0x1d3   :  { %1400 = vst.msk [vmem:[#allocation3 + $0xc] sm:$0xf] %vm1396_vm9, %v5584_v40  ;;  %2051 = vrot.lane.b32.xlu1 %v2036_v35, %s4681_s20  ;;  %v2327_v40 = vsel %vm4880_vm12, %v2322_v54, %v2326_v10 }
 0x1d4   :  { %2045 = vrot.lane.b32.xlu0 %v1994_v2, %s4681_s20 }
 0x1d5   :  { %v668_v53 = vpop.permute.xlu1 %667 }
 0x1d6   :  { %v1878_v43 = vpop.permute.xlu0 %1877  ;;  %687 = vst.msk [vmem:[#allocation3 + $0x14] sm:$0xf] %vm681_vm13, %v668_v53 }
 0x1d7   :  { %1901 = vst.msk [vmem:[#allocation3 + $0x20] sm:$0xf] %vm830_vm2, %v1878_v43  ;;  %2047 = vrot.lane.b32.xlu1 %v2008_v24, %s4681_s20  ;;  %s4688_s20 = smov 84  }
 0x1d8   :  { %787 = vst.msk [vmem:[#allocation3 + $0x14] sm:$0xf] %vm781_vm15, %v5599_v57  ;;  %2354 = vrot.lane.b32.xlu0 %v2327_v40, %s4678_s30  ;;  %v1718_v57 = vsel %vm4880_vm12, %v1713_v59, %v1717_v38 }
 0x1d9   :  { %836 = vst.msk [vmem:[#allocation3 + $0x14] sm:$0xf] %vm830_vm2, %v5518_v49  ;;  %v5686_v21 = vpop.permute.xlu1 %1883  ;;  %v2386_v49 = vld [vmem:[#allocation2 + $0x90] sm:$0xe] }
 0x1da   :  { %v976_v26 = vpop.permute.xlu0 %975  ;;  %v4614_v22 = vld [vmem:[#allocation3 + $0x8] sm:$0xff]   ;;  %v4359_v35 = vrot.slane %v2386_v49, 9 }
 0x1db   :  { %996 = vst.msk [vmem:[#allocation3 + $0x10] sm:$0xf] %vm991_vm6, %v976_v26  ;;  %2448 = vrot.lane.b32.xlu1 %v2429_v16, %s4677_s29  ;;  %4516 = vmatmul.mubr.msk.bf16.vlgmr.msra.gmra.mrb[0].mxu1 %vm2562_vm10, %v4614_v22 }
 0x1dc   :  { %1093 = vst.msk [vmem:[#allocation3 + $0x10] sm:$0xf] %vm1088_vm7, %v5606_v17  ;;  %1745 = vrot.lane.b32.xlu0 %v1718_v57, %s4676_s28  ;;  %v2299_v17 = vsel %vm4880_vm12, %v2294_v11, %v2298_v39  ;;  %v2433_v55 = vsel %vm4835_vm5, %v4359_v35, %v2432_v44  ;;  %v2758_v57 = vld [vmem:[%s6566_s7] sm:$0xf]  ;;  %vm2759_vm5 = vcmask 64512   ;;  %vm2930_vm12 = vcmask 261120  }
 0x1dd   :  { %1143 = vst.msk [vmem:[#allocation3 + $0x10] sm:$0xf] %vm1138_vm8, %v5582_v45  ;;  %v982_v13 = vpop.permute.xlu1 %981  ;;  %4582 = vmatprep.subr.msk.bf16.mxu0 %vm2587_vm4, %v2758_v57  ;;  %v2785_v11 = vsel %vm2587_vm4, %v2758_v57, 0  ;;  %vm3233_vm4 = vcmask 1041409  }
 0x1de   :  { %v5702_v30 = vpop.permute.xlu0 %2186  ;;  %999 = vst.msk [vmem:[#allocation3 + $0x1c] sm:$0xf] %vm991_vm6, %v982_v13  ;;  %4532 = vmatpush3.bf16.msra.mxu0 %v2785_v11 }
 0x1df   :  { %1096 = vst.msk [vmem:[#allocation3 + $0x1c] sm:$0xf] %vm1088_vm7, %v5608_v20  ;;  %2452 = vrot.lane.b32.xlu1 %v2437_v1, %s4677_s29  ;;  %3842 = vmatprep.subr.bf16.mxu0 %v4673_v8 }
 0x1e0   :  { %2350 = vrot.lane.b32.xlu0 %v2299_v17, %s4678_s30  ;;  %1146 = vst.msk [vmem:[#allocation3 + $0x1c] sm:$0xf] %vm1138_vm8, %v5255_v31 }
 0x1e1   :  { %1307 = vst.msk [vmem:[#allocation3 + $0x1c] sm:$0xf] %vm1299_vm1, %v5336_v3  ;;  %v1836_v48 = vpop.permute.xlu1 %1835 }
 0x1e2   :  { %v1288_v45 = vpop.permute.xlu0 %1287  ;;  %1404 = vst.msk [vmem:[#allocation3 + $0x1c] sm:$0xf] %vm1396_vm9, %v5326_v32 }
 0x1e4   :  { %2450 = vrot.lane.b32.xlu0 %v2433_v55, %s4677_s29 }
 0x1e5   :  { %v1880_v2 = vpop.permute.xlu1 %1879 }
 0x1e6   :  { %v5720_v20 = vpop.permute.xlu0 %2137 }
 0x1e9   :  { %v5722_v10 = vpop.permute.xlu1 %2440 }
 0x1ea   :  { %v2183_v37 = vpop.permute.xlu0 %2182 }
 0x1ed   :  { %v978_v33 = vpop.permute.xlu1 %977 }
 0x1ee   :  { %v670_v31 = vpop.permute.xlu0 %669  ;;  %997 = vst.msk [vmem:[#allocation3 + $0x14] sm:$0xf] %vm991_vm6, %v978_v33 }
 0x1ef   :  { %688 = vst.msk [vmem:[#allocation3 + $0x18] sm:$0xf] %vm681_vm13, %v670_v31  ;;  %v5854_v31 = vld [vmem:[%s6565_s6] ss:$0 sm:$0xff] }
 0x1f0   :  { %788 = vst.msk [vmem:[#allocation3 + $0x18] sm:$0xf] %vm781_vm15, %v5632_v29 }
 0x1f1   :  { %1094 = vst.msk [vmem:[#allocation3 + $0x14] sm:$0xf] %vm1088_vm7, %v5622_v12  ;;  %v1832_v32 = vpop.permute.xlu1 %1831 }
 0x1f2   :  { %837 = vst.msk [vmem:[#allocation3 + $0x18] sm:$0xf] %vm830_vm2, %v5454_v25  ;;  %v1284_v15 = vpop.permute.xlu0 %1283 }
 0x1f3   :  { %1144 = vst.msk [vmem:[#allocation3 + $0x14] sm:$0xf] %vm1138_vm8, %v5429_v62 }
 0x1f4   :  { %998 = vst.msk [vmem:[#allocation3 + $0x18] sm:$0xf] %vm991_vm6, %v5665_v7 }
 0x1f5   :  { %1305 = vst.msk [vmem:[#allocation3 + $0x14] sm:$0xf] %vm1299_vm1, %v5657_v23  ;;  %1304 = vst.msk [vmem:[#allocation3 + $0x10] sm:$0xf] %vm1299_vm1, %v1284_v15  ;;  %v2140_v62 = vpop.permute.xlu1 %2139 }
 0x1f6   :  { %1095 = vst.msk [vmem:[#allocation3 + $0x18] sm:$0xf] %vm1088_vm7, %v5552_v61  ;;  %v2134_v3 = vpop.permute.xlu0 %2133 }
 0x1f7   :  { %1402 = vst.msk [vmem:[#allocation3 + $0x14] sm:$0xf] %vm1396_vm9, %v5526_v34  ;;  %1401 = vst.msk [vmem:[#allocation3 + $0x10] sm:$0xf] %vm1396_vm9, %v5640_v9 }
 0x1f8   :  { %1145 = vst.msk [vmem:[#allocation3 + $0x18] sm:$0xf] %vm1138_vm8, %v5516_v6 }
 0x1f9   :  { %1306 = vst.msk [vmem:[#allocation3 + $0x18] sm:$0xf] %vm1299_vm1, %v1288_v45  ;;  %v2136_v61 = vpop.permute.xlu1 %2135 }
 0x1fa   :  { %1403 = vst.msk [vmem:[#allocation3 + $0x18] sm:$0xf] %vm1396_vm9, %v5620_v47  ;;  %v5750_v25 = vpop.permute.xlu0 %2442 }
 0x1fd   :  { %v5753_v23 = vpop.permute.xlu1 %2192 }
 0x1fe   :  { %v4615_v12 = vld [vmem:[#allocation3 + $0x10] sm:$0xff]   ;;  %v1838_v29 = vpop.permute.xlu0 %1837 }
 0x1ff   :  { %4519 = vmatprep.mubr.msk.bf16.mxu1 %vm2562_vm10, %v4615_v12 }
 0x201   :  { %v4616_v34 = vld [vmem:[#allocation3 + $0x18] sm:$0xff]   ;;  %v1740_v9 = vpop.permute.xlu1 %1739 }
 0x202   :  { %4520 = vmatmul.mubr.msk.bf16.gmra.mrb[4].mxu1 %vm2562_vm10, %v4616_v34  ;;  %v1834_v6 = vpop.permute.xlu0 %1833  ;;  %1760 = vst.msk [vmem:[#allocation3 + $0x2c] sm:$0xf] %vm681_vm13, %v1740_v9 }
 0x203   :  { %1856 = vst.msk [vmem:[#allocation3 + $0x2c] sm:$0xf] %vm781_vm15, %v1836_v48 }
 0x204   :  { %1904 = vst.msk [vmem:[#allocation3 + $0x2c] sm:$0xf] %vm830_vm2, %v5686_v21 }
 0x205   :  { %v2189_v7 = vpop.permute.xlu1 %2188 }
 0x206   :  { %v2439_v47 = vpop.permute.xlu0 %2438 }
 0x209   :  { %v2345_v54 = vpop.permute.xlu1 %2344 }
 0x20a   :  { %v5760_v51 = vpop.permute.xlu0 %1889 }
 0x20d   :  { %v1736_v56 = vpop.permute.xlu1 %1735 }
 0x20e   :  { %v2042_v27 = vpop.permute.xlu0 %2041  ;;  %1758 = vst.msk [vmem:[#allocation3 + $0x24] sm:$0xf] %vm681_vm13, %v1736_v56 }
 0x20f   :  { %1854 = vst.msk [vmem:[#allocation3 + $0x24] sm:$0xf] %vm781_vm15, %v1832_v32 }
 0x210   :  { %1902 = vst.msk [vmem:[#allocation3 + $0x24] sm:$0xf] %vm830_vm2, %v1880_v2 }
 0x211   :  { %v1892_v36 = vpop.permute.xlu1 %1891 }
 0x212   :  { %v1886_v52 = vpop.permute.xlu0 %1885 }
 0x215   :  { %v2044_v63 = vpop.permute.xlu1 %2043 }
 0x216   :  { %v2038_v14 = vpop.permute.xlu0 %2037  ;;  %2064 = vst.msk [vmem:[#allocation3 + $0x2c] sm:$0xf] %vm991_vm6, %v2044_v63 }
 0x217   :  { %2061 = vst.msk [vmem:[#allocation3 + $0x20] sm:$0xf] %vm991_vm6, %v2038_v14 }
 0x218   :  { %2157 = vst.msk [vmem:[#allocation3 + $0x20] sm:$0xf] %vm1088_vm7, %v2134_v3  ;;  %2160 = vst.msk [vmem:[#allocation3 + $0x2c] sm:$0xf] %vm1088_vm7, %v2140_v62 }
 0x219   :  { %2206 = vst.msk [vmem:[#allocation3 + $0x20] sm:$0xf] %vm1138_vm8, %v2183_v37  ;;  %2209 = vst.msk [vmem:[#allocation3 + $0x2c] sm:$0xf] %vm1138_vm8, %v2189_v7  ;;  %v1844_v43 = vpop.permute.xlu1 %1843  ;;  %v5849_v37 = vld [vmem:[%s6564_s5] ss:$0 sm:$0xff] }
 0x21a   :  { %v5771_v53 = vpop.permute.xlu0 %2194 }
 0x21d   :  { %v1888_v0 = vpop.permute.xlu1 %1887 }
 0x21e   :  { %v2347_v24 = vpop.permute.xlu0 %2346 }
 0x221   :  { %v2040_v41 = vpop.permute.xlu1 %2039 }
 0x222   :  { %v1742_v38 = vpop.permute.xlu0 %1741  ;;  %2062 = vst.msk [vmem:[#allocation3 + $0x24] sm:$0xf] %vm991_vm6, %v2040_v41 }
 0x223   :  { %1761 = vst.msk [vmem:[#allocation3 + $0x30] sm:$0xf] %vm681_vm13, %v1742_v38 }
 0x224   :  { %1857 = vst.msk [vmem:[#allocation3 + $0x30] sm:$0xf] %vm781_vm15, %v1838_v29 }
 0x225   :  { %2158 = vst.msk [vmem:[#allocation3 + $0x24] sm:$0xf] %vm1088_vm7, %v2136_v61  ;;  %v2445_v40 = vpop.permute.xlu1 %2444 }
 0x226   :  { %1905 = vst.msk [vmem:[#allocation3 + $0x30] sm:$0xf] %vm830_vm2, %v1886_v52  ;;  %v5781_v42 = vpop.permute.xlu0 %2145 }
 0x227   :  { %2207 = vst.msk [vmem:[#allocation3 + $0x24] sm:$0xf] %vm1138_vm8, %v5634_v18 }
 0x228   :  { %2367 = vst.msk [vmem:[#allocation3 + $0x24] sm:$0xf] %vm1299_vm1, %v2345_v54 }
 0x229   :  { %2463 = vst.msk [vmem:[#allocation3 + $0x24] sm:$0xf] %vm1396_vm9, %v5722_v10  ;;  %v1840_v4 = vpop.permute.xlu1 %1839 }
 0x22a   :  { %v2191_v59 = vpop.permute.xlu0 %2190 }
 0x22d   :  { %v2148_v60 = vpop.permute.xlu1 %2147 }
 0x22e   :  { %v1738_v19 = vpop.permute.xlu0 %1737 }
 0x22f   :  { %1759 = vst.msk [vmem:[#allocation3 + $0x28] sm:$0xf] %vm681_vm13, %v1738_v19 }
 0x230   :  { %1855 = vst.msk [vmem:[#allocation3 + $0x28] sm:$0xf] %vm781_vm15, %v1834_v6 }
 0x231   :  { %1903 = vst.msk [vmem:[#allocation3 + $0x28] sm:$0xf] %vm830_vm2, %v5659_v46  ;;  %v2144_v58 = vpop.permute.xlu1 %2143 }
 0x232   :  { %2063 = vst.msk [vmem:[#allocation3 + $0x28] sm:$0xf] %vm991_vm6, %v2042_v27  ;;  %v2343_v18 = vpop.permute.xlu0 %2342 }
 0x233   :  { %2159 = vst.msk [vmem:[#allocation3 + $0x28] sm:$0xf] %vm1088_vm7, %v5720_v20 }
 0x234   :  { %2366 = vst.msk [vmem:[#allocation3 + $0x20] sm:$0xf] %vm1299_vm1, %v2343_v18 }
 0x235   :  { %2208 = vst.msk [vmem:[#allocation3 + $0x28] sm:$0xf] %vm1138_vm8, %v5702_v30  ;;  %v1748_v26 = vpop.permute.xlu1 %1747 }
 0x236   :  { %2462 = vst.msk [vmem:[#allocation3 + $0x20] sm:$0xf] %vm1396_vm9, %v2439_v47  ;;  %v2142_v46 = vpop.permute.xlu0 %2141 }
 0x237   :  { %2368 = vst.msk [vmem:[#allocation3 + $0x28] sm:$0xf] %vm1299_vm1, %v2347_v24 }
 0x238   :  { %2464 = vst.msk [vmem:[#allocation3 + $0x28] sm:$0xf] %vm1396_vm9, %v5750_v25 }
 0x239   :  { %1764 = vst.msk [vmem:[#allocation3 + $0x3c] sm:$0xf] %vm681_vm13, %v1748_v26  ;;  %v2353_v21 = vpop.permute.xlu1 %2352 }
 0x23a   :  { %1860 = vst.msk [vmem:[#allocation3 + $0x3c] sm:$0xf] %vm781_vm15, %v1844_v43  ;;  %v1842_v16 = vpop.permute.xlu0 %1841 }
 0x23b   :  { %1908 = vst.msk [vmem:[#allocation3 + $0x3c] sm:$0xf] %vm830_vm2, %v1892_v36 }
 0x23d   :  { %v4617_v22 = vld [vmem:[#allocation3 + $0x20] sm:$0xff]   ;;  %v2349_v39 = vpop.permute.xlu1 %2348 }
 0x23e   :  { %4523 = vmatprep.mubr.msk.bf16.mxu1 %vm2562_vm10, %v4617_v22  ;;  %v2447_v49 = vpop.permute.xlu0 %2446  ;;  %2369 = vst.msk [vmem:[#allocation3 + $0x2c] sm:$0xf] %vm1299_vm1, %v2349_v39 }
 0x23f   :  { %2465 = vst.msk [vmem:[#allocation3 + $0x2c] sm:$0xf] %vm1396_vm9, %v2445_v40 }
 0x241   :  { %v1744_v28 = vpop.permute.xlu1 %1743 }
 0x242   :  { %v2050_v1 = vpop.permute.xlu0 %2049  ;;  %1762 = vst.msk [vmem:[#allocation3 + $0x34] sm:$0xf] %vm681_vm13, %v1744_v28 }
 0x243   :  { %1858 = vst.msk [vmem:[#allocation3 + $0x34] sm:$0xf] %vm781_vm15, %v1840_v4 }
 0x244   :  { %1906 = vst.msk [vmem:[#allocation3 + $0x34] sm:$0xf] %vm830_vm2, %v1888_v0 }
 0x245   :  { %v2052_v30 = vpop.permute.xlu1 %2051 }
 0x246   :  { %v2046_v13 = vpop.permute.xlu0 %2045  ;;  %2068 = vst.msk [vmem:[#allocation3 + $0x3c] sm:$0xf] %vm991_vm6, %v2052_v30  ;;  %v4618_v17 = vld [vmem:[#allocation3 + $0x28] sm:$0xff]  }
 0x247   :  { %2065 = vst.msk [vmem:[#allocation3 + $0x30] sm:$0xf] %vm991_vm6, %v2046_v13  ;;  %4524 = vmatmul.mubr.msk.bf16.gmra.mrb[8].mxu1 %vm2562_vm10, %v4618_v17 }
 0x248   :  { %2164 = vst.msk [vmem:[#allocation3 + $0x3c] sm:$0xf] %vm1088_vm7, %v2148_v60  ;;  %2161 = vst.msk [vmem:[#allocation3 + $0x30] sm:$0xf] %vm1088_vm7, %v2142_v46 }
 0x249   :  { %2213 = vst.msk [vmem:[#allocation3 + $0x3c] sm:$0xf] %vm1138_vm8, %v5287_v5  ;;  %2210 = vst.msk [vmem:[#allocation3 + $0x30] sm:$0xf] %vm1138_vm8, %v2191_v59  ;;  %v2048_v35 = vpop.permute.xlu1 %2047 }
 0x24a   :  { %2373 = vst.msk [vmem:[#allocation3 + $0x3c] sm:$0xf] %vm1299_vm1, %v5345_v50  ;;  %v2355_v44 = vpop.permute.xlu0 %2354 }
 0x24b   :  { %2066 = vst.msk [vmem:[#allocation3 + $0x34] sm:$0xf] %vm991_vm6, %v2048_v35 }
 0x24c   :  { %2162 = vst.msk [vmem:[#allocation3 + $0x34] sm:$0xf] %vm1088_vm7, %v2144_v58 }
 0x24d   :  { %2211 = vst.msk [vmem:[#allocation3 + $0x34] sm:$0xf] %vm1138_vm8, %v5753_v23  ;;  %v2449_v45 = vpop.permute.xlu1 %2448 }
 0x24e   :  { %2371 = vst.msk [vmem:[#allocation3 + $0x34] sm:$0xf] %vm1299_vm1, %v2353_v21  ;;  %v1746_v5 = vpop.permute.xlu0 %1745 }
 0x24f   :  { %2467 = vst.msk [vmem:[#allocation3 + $0x34] sm:$0xf] %vm1396_vm9, %v2449_v45 }
 0x250   :  { %1763 = vst.msk [vmem:[#allocation3 + $0x38] sm:$0xf] %vm681_vm13, %v1746_v5  ;;  %vm3018_vm13 = vcmask 1040384  }
 0x251   :  { %1859 = vst.msk [vmem:[#allocation3 + $0x38] sm:$0xf] %vm781_vm15, %v1842_v16  ;;  %v2453_v48 = vpop.permute.xlu1 %2452  ;;  %vm3087_vm15 = vcmask 15360  }
 0x252   :  { %1907 = vst.msk [vmem:[#allocation3 + $0x38] sm:$0xf] %vm830_vm2, %v5760_v51  ;;  %v2351_v50 = vpop.permute.xlu0 %2350  ;;  %vm3138_vm2 = vcmask 109568  }
 0x253   :  { %2067 = vst.msk [vmem:[#allocation3 + $0x38] sm:$0xf] %vm991_vm6, %v2050_v1  ;;  %vm3235_vm6 = vcmask 1042434  }
 0x254   :  { %2163 = vst.msk [vmem:[#allocation3 + $0x38] sm:$0xf] %vm1088_vm7, %v5781_v42  ;;  %vm3237_vm7 = vcmask 1043459  }
 0x255   :  { %2370 = vst.msk [vmem:[#allocation3 + $0x30] sm:$0xf] %vm1299_vm1, %v2351_v50 }
 0x256   :  { %2469 = vst.msk [vmem:[#allocation3 + $0x3c] sm:$0xf] %vm1396_vm9, %v2453_v48  ;;  %2466 = vst.msk [vmem:[#allocation3 + $0x30] sm:$0xf] %vm1396_vm9, %v2447_v49  ;;  %v2451_v55 = vpop.permute.xlu0 %2450 }
 0x257   :  { %2212 = vst.msk [vmem:[#allocation3 + $0x38] sm:$0xf] %vm1138_vm8, %v5771_v53  ;;  %vm3239_vm8 = vcmask 1044484  }
 0x258   :  { %2372 = vst.msk [vmem:[#allocation3 + $0x38] sm:$0xf] %vm1299_vm1, %v2355_v44  ;;  %vm3241_vm1 = vcmask 1045509  }
 0x259   :  { %2468 = vst.msk [vmem:[#allocation3 + $0x38] sm:$0xf] %vm1396_vm9, %v2451_v55  ;;  %vm3243_vm9 = vcmask 1046534  }
 0x25d   :  { %v4619_v20 = vld [vmem:[#allocation3 + $0x30] sm:$0xff]  }
 0x25e   :  { %4527 = vmatprep.mubr.msk.bf16.mxu1 %vm2562_vm10, %v4619_v20 }
 0x260   :  { %v4620_v2 = vld [vmem:[#allocation3 + $0x38] sm:$0xff]  }
 0x261   :  { %4528 = vmatmul.mubr.msk.bf16.gmra.mrb[12].mxu1 %vm2562_vm10, %v4620_v2  ;;  %vm3245_vm10 = vcmask 1047559  }
 0x2ae   :  { %v4517_v10 = vpop.f32.mrb[0].mxu1 }
 0x2af   :  { %v2697_v33 = vmul.f32 %v4517_v10, %v5849_v37  ;;  %v2625_v15 = vpop.f32.mrb[1].mxu1 }
 0x2b0   :  { %v2695_v32 = vmul.f32 %v5849_v37, %v2625_v15  ;;  %v4518_v3 = vpop.f32.mrb[2].mxu1 }
 0x2b1   :  { %v2720_v62 = vadd.f32 %v5854_v31, %v2697_v33  ;;  %v2698_v25 = vmul.f32 %v4518_v3, %v5849_v37  ;;  %v2628_v61 = vpop.f32.mrb[3].mxu1 }
 0x2b2   :  { %v2718_v12 = vadd.f32 %v5854_v31, %v2695_v32  ;;  %v2696_v34 = vmul.f32 %v5849_v37, %v2628_v61 }
 0x2b3   :  { %v2721_v29 = vadd.f32 %v5854_v31, %v2698_v25  ;;  %v2736_v6 = vmax.f32 %v2720_v62, 0.0 }
 0x2b4   :  { %v2719_v23 = vadd.f32 %v5854_v31, %v2696_v34  ;;  %v2734_v47 = vmax.f32 %v2718_v12, 0.0 }
 0x2b5   :  { %v2737_v9 = vmax.f32 %v2721_v29, 0.0 }
 0x2b6   :  { %v2735_v7 = vmax.f32 %v2719_v23, 0.0 }
 0x2b7   :  { %v2751_v51 = vpack.c.bf16 %v2737_v9, %v2736_v6 }
 0x2b8   :  { %v2750_v54 = vpack.c.bf16 %v2735_v7, %v2734_v47  ;;  %v4682_v7 = vmov 0.0  }
 0x2b9   :  { %4549 = vmatprep.subr.bf16.mxu1 %v4682_v7  ;;  %4553 = vmatprep.mubr.msk.bf16.mxu1 %vm4683_vm11, %v4682_v7  ;;  %3139 = vst.msk [vmem:[#allocation4 + $0x18] sm:$0xf] %vm3138_vm2, %v4682_v7  ;;  %3143 = vst.msk [vmem:[#allocation5 + $0x18] sm:$0xf] %vm3138_vm2, %v4682_v7 }
 0x2ba   :  { %4533 = vmatprep.mubr.msk.bf16.mxu0 %vm2759_vm5, %v2750_v54 }
 0x2bb   :  { %4534 = vmatmul.mubr.msk.bf16.vlgmr.msra.gmra.mrb[16].mxu0 %vm2759_vm5, %v2751_v51 }
 0x2d5   :  { %v4521_v27 = vpop.f32.mrb[4].mxu1 }
 0x2d6   :  { %v2701_v56 = vmul.f32 %v4521_v27, %v5849_v37  ;;  %v2641_v52 = vpop.f32.mrb[5].mxu1 }
 0x2d7   :  { %v2699_v36 = vmul.f32 %v5849_v37, %v2641_v52  ;;  %v4522_v14 = vpop.f32.mrb[6].mxu1  ;;  %v5910_v52 = vld [vmem:[%s6567_s8] ss:$0 sm:$0xff]  ;;  %s4690_s8 = smov 12  }
 0x2d8   :  { %v2724_v63 = vadd.f32 %v5854_v31, %v2701_v56  ;;  %v2702_v53 = vmul.f32 %v4522_v14, %v5849_v37  ;;  %v2644_v43 = vpop.f32.mrb[7].mxu1 }
 0x2d9   :  { %v2722_v24 = vadd.f32 %v5854_v31, %v2699_v36  ;;  %v2700_v0 = vmul.f32 %v5849_v37, %v2644_v43 }
 0x2da   :  { %v2725_v38 = vadd.f32 %v5854_v31, %v2702_v53  ;;  %v2740_v42 = vmax.f32 %v2724_v63, 0.0  ;;  %v5917_v63 = vld [vmem:[%s6568_s9] ss:$0 sm:$0xff]  ;;  %s4691_s9 = smov 26  }
 0x2db   :  { %v2723_v41 = vadd.f32 %v5854_v31, %v2700_v0  ;;  %v2738_v59 = vmax.f32 %v2722_v24, 0.0 }
 0x2dc   :  { %v2741_v40 = vmax.f32 %v2725_v38, 0.0 }
 0x2dd   :  { %v2739_v4 = vmax.f32 %v2723_v41, 0.0 }
 0x2de   :  { %v2753_v19 = vpack.c.bf16 %v2741_v40, %v2740_v42 }
 0x2df   :  { %v2752_v60 = vpack.c.bf16 %v2739_v4, %v2738_v59 }
 0x2e1   :  { %4537 = vmatprep.mubr.msk.bf16.mxu0 %vm2759_vm5, %v2752_v60 }
 0x2e2   :  { %4538 = vmatmul.mubr.msk.bf16.gmra.mrb[20].mxu0 %vm2759_vm5, %v2753_v19 }
 0x31a   :  { %v4525_v18 = vpop.f32.mrb[8].mxu1 }
 0x31b   :  { %v2705_v58 = vmul.f32 %v4525_v18, %v5849_v37  ;;  %v2657_v46 = vpop.f32.mrb[9].mxu1 }
 0x31c   :  { %v2703_v26 = vmul.f32 %v5849_v37, %v2657_v46  ;;  %v4526_v21 = vpop.f32.mrb[10].mxu1 }
 0x31d   :  { %v2728_v16 = vadd.f32 %v5854_v31, %v2705_v58  ;;  %v2706_v57 = vmul.f32 %v4526_v21, %v5849_v37  ;;  %v2660_v22 = vpop.f32.mrb[11].mxu1 }
 0x31e   :  { %v2726_v11 = vadd.f32 %v5854_v31, %v2703_v26  ;;  %v2704_v39 = vmul.f32 %v5849_v37, %v2660_v22 }
 0x31f   :  { %v2729_v49 = vadd.f32 %v5854_v31, %v2706_v57  ;;  %v2744_v1 = vmax.f32 %v2728_v16, 0.0 }
 0x320   :  { %v2727_v28 = vadd.f32 %v5854_v31, %v2704_v39  ;;  %v2742_v13 = vmax.f32 %v2726_v11, 0.0 }
 0x321   :  { %v2745_v30 = vmax.f32 %v2729_v49, 0.0 }
 0x322   :  { %v2743_v17 = vmax.f32 %v2727_v28, 0.0 }
 0x323   :  { %v2755_v35 = vpack.c.bf16 %v2745_v30, %v2744_v1 }
 0x324   :  { %v2754_v44 = vpack.c.bf16 %v2743_v17, %v2742_v13 }
 0x326   :  { %4541 = vmatprep.mubr.msk.bf16.mxu0 %vm2759_vm5, %v2754_v44 }
 0x327   :  { %4542 = vmatmul.mubr.msk.bf16.gmra.mrb[24].mxu0 %vm2759_vm5, %v2755_v35 }
 0x334   :  { %v4529_v45 = vpop.f32.mrb[12].mxu1 }
 0x335   :  { %v2709_v5 = vmul.f32 %v4529_v45, %v5849_v37  ;;  %v2673_v50 = vpop.f32.mrb[13].mxu1 }
 0x336   :  { %v2707_v48 = vmul.f32 %v5849_v37, %v2673_v50  ;;  %v4530_v55 = vpop.f32.mrb[14].mxu1 }
 0x337   :  { %v2732_v20 = vadd.f32 %v5854_v31, %v2709_v5  ;;  %v2710_v2 = vmul.f32 %v4530_v55, %v5849_v37  ;;  %v2676_v10 = vpop.f32.mrb[15].mxu1 }
 0x338   :  { %v2730_v33 = vadd.f32 %v5854_v31, %v2707_v48  ;;  %v2708_v15 = vmul.f32 %v5849_v37, %v2676_v10  ;;  %v4621_v37 = vld [vmem:[%s6569_s10] sm:$0xff]  }
 0x339   :  { %v2733_v32 = vadd.f32 %v5854_v31, %v2710_v2  ;;  %v2748_v62 = vmax.f32 %v2732_v20, 0.0  ;;  %4550 = vmatpush3.bf16.msra.mxu1 %v4621_v37 }
 0x33a   :  { %v2731_v3 = vadd.f32 %v5854_v31, %v2708_v15  ;;  %v2746_v61 = vmax.f32 %v2730_v33, 0.0  ;;  %4551 = vmatprep.subr.bf16.mxu1 %v4682_v7  ;;  %v4622_v31 = vld [vmem:[%s6569_s10 + $0x8] sm:$0xff]  }
 0x33b   :  { %v2749_v25 = vmax.f32 %v2733_v32, 0.0 }
 0x33c   :  { %v2747_v12 = vmax.f32 %v2731_v3, 0.0 }
 0x33d   :  { %v2757_v34 = vpack.c.bf16 %v2749_v25, %v2748_v62  ;;  %4552 = vmatpush3.bf16.msra.mxu1 %v4622_v31 }
 0x33e   :  { %v2756_v29 = vpack.c.bf16 %v2747_v12, %v2746_v61  ;;  %4557 = vmatprep.subr.bf16.mxu1 %v4682_v7 }
 0x340   :  { %4545 = vmatprep.mubr.msk.bf16.mxu0 %vm2759_vm5, %v2756_v29 }
 0x341   :  { %4546 = vmatmul.mubr.msk.bf16.gmra.mrb[28].mxu0 %vm2759_vm5, %v2757_v34  ;;  %vm3248_vm5 = vcmask 89112  }
 0x38e   :  { %v4535_v23 = vpop.f32.mrb[16].mxu0 }
 0x38f   :  { %v2821_v6 = vpop.f32.mrb[17].mxu0  ;;  %v2893_v43 = vmul.f32 %v4535_v23, %v5910_v52 }
 0x390   :  { %v4536_v9 = vpop.f32.mrb[18].mxu0  ;;  %v2891_v14 = vmul.f32 %v5910_v52, %v2821_v6 }
 0x391   :  { %v2824_v47 = vpop.f32.mrb[19].mxu0  ;;  %v5929_v38 = vadd.f32 %v5917_v63, %v2893_v43  ;;  %v2894_v42 = vmul.f32 %v4536_v9, %v5910_v52 }
 0x392   :  { %v2892_v36 = vmul.f32 %v5910_v52, %v2824_v47  ;;  %v5924_v24 = vadd.f32 %v5917_v63, %v2891_v14 }
 0x393   :  { %v2934_v4 = vsel %vm2930_vm12, %v5929_v38, 0.0  ;;  %v5938_v19 = vadd.f32 %v5917_v63, %v2894_v42  ;;  %v2956_v32 = vsel %vm2930_vm12, %v5929_v38, -inf }
 0x394   :  { %v5920_v53 = vadd.f32 %v5917_v63, %v2892_v36  ;;  %v2931_v41 = vsel %vm2930_vm12, %v5924_v24, 0.0  ;;  %v2954_v61 = vsel %vm2930_vm12, %v5924_v24, -inf }
 0x395   :  { %v2936_v46 = vsel %vm2930_vm12, %v5938_v19, 0.0  ;;  %v2957_v20 = vsel %vm2930_vm12, %v5938_v19, -inf }
 0x396   :  { %v2932_v0 = vsel %vm2930_vm12, %v5920_v53, 0.0  ;;  %v2955_v2 = vsel %vm2930_vm12, %v5920_v53, -inf }
 0x397   :  { %v2933_v59 = vadd.f32 %v2932_v0, %v2931_v41 }
 0x399   :  { %v2935_v58 = vadd.f32 %v2934_v4, %v2933_v59 }
 0x39b   :  { %v2937_v57 = vadd.f32 %v2936_v46, %v2935_v58 }
 0x3b5   :  { %v4539_v51 = vpop.f32.mrb[20].mxu0 }
 0x3b6   :  { %v2837_v54 = vpop.f32.mrb[21].mxu0  ;;  %v2897_v11 = vmul.f32 %v4539_v51, %v5910_v52 }
 0x3b7   :  { %v4540_v27 = vpop.f32.mrb[22].mxu0  ;;  %v2895_v40 = vmul.f32 %v5910_v52, %v2837_v54 }
 0x3b8   :  { %v2840_v56 = vpop.f32.mrb[23].mxu0  ;;  %v2898_v28 = vmul.f32 %v4540_v27, %v5910_v52  ;;  %v5956_v13 = vadd.f32 %v5917_v63, %v2897_v11 }
 0x3b9   :  { %v5941_v60 = vadd.f32 %v5917_v63, %v2895_v40  ;;  %v2896_v18 = vmul.f32 %v5910_v52, %v2840_v56 }
 0x3ba   :  { %v5959_v17 = vadd.f32 %v5917_v63, %v2898_v28  ;;  %v2942_v45 = vsel %vm2930_vm12, %v5956_v13, 0.0  ;;  %v2962_v10 = vsel %vm2930_vm12, %v5956_v13, -inf }
 0x3bb   :  { %v2938_v26 = vsel %vm2930_vm12, %v5941_v60, 0.0  ;;  %v5949_v21 = vadd.f32 %v5917_v63, %v2896_v18  ;;  %v2958_v33 = vsel %vm2930_vm12, %v5941_v60, -inf  ;;  %v2963_v23 = vmax.f32 %v2956_v32, %v2962_v10 }
 0x3bc   :  { %v2939_v49 = vadd.f32 %v2938_v26, %v2937_v57  ;;  %v2964_v5 = vsel %vm2930_vm12, %v5959_v17, -inf  ;;  %v2944_v3 = vsel %vm2930_vm12, %v5959_v17, 0.0  ;;  %v2959_v6 = vmax.f32 %v2954_v61, %v2958_v33 }
 0x3bd   :  { %v2940_v30 = vsel %vm2930_vm12, %v5949_v21, 0.0  ;;  %v2960_v48 = vsel %vm2930_vm12, %v5949_v21, -inf  ;;  %v2965_v62 = vmax.f32 %v2957_v20, %v2964_v5 }
 0x3be   :  { %v2941_v35 = vadd.f32 %v2940_v30, %v2939_v49  ;;  %v2961_v25 = vmax.f32 %v2955_v2, %v2960_v48 }
 0x3bf   :  { %v2967_v47 = vmax.f32 %v2963_v23, %v2965_v62 }
 0x3c0   :  { %v2943_v50 = vadd.f32 %v2942_v45, %v2941_v35  ;;  %v2966_v37 = vmax.f32 %v2959_v6, %v2961_v25 }
 0x3c2   :  { %v2945_v12 = vadd.f32 %v2944_v3, %v2943_v50  ;;  %v2968_v36 = vmax.f32 %v2966_v37, %v2967_v47 }
 0x3c4   :  { %v2946_v31 = vrot.slane %v2945_v12, 4  ;;  %v2969_v58 = vrot.slane %v2968_v36, 4 }
 0x3c6   :  { %v2947_v14 = vadd.f32 %v2946_v31, %v2945_v12  ;;  %v2970_v62 = vmax.f32 %v2968_v36, %v2969_v58 }
 0x3c8   :  { %v2948_v57 = vrot.slane %v2947_v14, 2  ;;  %v2971_v37 = vrot.slane %v2970_v62, 2 }
 0x3ca   :  { %v2949_v23 = vadd.f32 %v2948_v57, %v2947_v14 }
 0x3fa   :  { %v4543_v16 = vpop.f32.mrb[24].mxu0 }
 0x3fb   :  { %v2853_v22 = vpop.f32.mrb[25].mxu0  ;;  %v2901_v34 = vmul.f32 %v4543_v16, %v5910_v52 }
 0x3fc   :  { %v4544_v39 = vpop.f32.mrb[26].mxu0  ;;  %v2899_v55 = vmul.f32 %v5910_v52, %v2853_v22 }
 0x3fd   :  { %v2856_v1 = vpop.f32.mrb[27].mxu0  ;;  %v5993_v51 = vadd.f32 %v5917_v63, %v2901_v34  ;;  %v2902_v27 = vmul.f32 %v4544_v39, %v5910_v52 }
 0x3fe   :  { %v2900_v44 = vmul.f32 %v5910_v52, %v2856_v1  ;;  %v5988_v29 = vadd.f32 %v5917_v63, %v2899_v55 }
 0x3ff   :  { %v2978_v43 = vsel %vm2930_vm12, %v5993_v51, 0.0  ;;  %v6001_v0 = vadd.f32 %v5917_v63, %v2902_v27  ;;  %v2999_v49 = vsel %vm2930_vm12, %v5993_v51, -inf  ;;  %v2950_v27 = vrot.slane %v2949_v23, 1 }
 0x400   :  { %v5978_v15 = vadd.f32 %v5917_v63, %v2900_v44  ;;  %v2975_v54 = vsel %vm2930_vm12, %v5988_v29, 0.0  ;;  %v2997_v35 = vsel %vm2930_vm12, %v5988_v29, -inf }
 0x401   :  { %v2980_v22 = vsel %vm2930_vm12, %v6001_v0, 0.0  ;;  %v3000_v5 = vsel %vm2930_vm12, %v6001_v0, -inf }
 0x402   :  { %v2976_v9 = vsel %vm2930_vm12, %v5978_v15, 0.0  ;;  %v2998_v50 = vsel %vm2930_vm12, %v5978_v15, -inf }
 0x403   :  { %v2977_v56 = vadd.f32 %v2976_v9, %v2975_v54 }
 0x405   :  { %v2979_v42 = vadd.f32 %v2978_v43, %v2977_v56 }
 0x407   :  { %v2981_v1 = vadd.f32 %v2980_v22, %v2979_v42 }
 0x414   :  { %v4547_v41 = vpop.f32.mrb[28].mxu0 }
 0x415   :  { %v2905_v40 = vmul.f32 %v4547_v41, %v5910_v52  ;;  %v2869_v59 = vpop.f32.mrb[29].mxu0  ;;  %v2972_v41 = vmax.f32 %v2970_v62, %v2971_v37 }
 0x416   :  { %v2903_v4 = vmul.f32 %v5910_v52, %v2869_v59  ;;  %v4548_v18 = vpop.f32.mrb[30].mxu0 }
 0x417   :  { %v6006_v46 = vadd.f32 %v5917_v63, %v2905_v40  ;;  %v2906_v26 = vmul.f32 %v4548_v18, %v5910_v52  ;;  %v2872_v16 = vpop.f32.mrb[31].mxu0  ;;  %v2951_v40 = vadd.f32 %v2950_v27, %v2949_v23  ;;  %v2973_v18 = vrot.slane %v2972_v41, 1 }
 0x418   :  { %v6012_v11 = vadd.f32 %v5917_v63, %v2903_v4  ;;  %v2904_v39 = vmul.f32 %v5910_v52, %v2872_v16 }
 0x419   :  { %v3005_v28 = vsel %vm2930_vm12, %v6006_v46, -inf  ;;  %v6020_v30 = vadd.f32 %v5917_v63, %v2906_v26  ;;  %v2986_v25 = vsel %vm2930_vm12, %v6006_v46, 0.0  ;;  %v2953_v14 = vmul.f32 0.015625, %v2951_v40 }
 0x41a   :  { %v2982_v44 = vsel %vm2930_vm12, %v6012_v11, 0.0  ;;  %v3001_v45 = vsel %vm2930_vm12, %v6012_v11, -inf  ;;  %v6029_v52 = vadd.f32 %v5917_v63, %v2904_v39  ;;  %v3006_v20 = vmax.f32 %v2999_v49, %v3005_v28  ;;  %v3086_v28 = vld [vmem:[%s6570_s11] sm:$0x1] }
 0x41b   :  { %v2983_v48 = vadd.f32 %v2982_v44, %v2981_v1  ;;  %v3007_v55 = vsel %vm2930_vm12, %v6020_v30, -inf  ;;  %v3002_v63 = vmax.f32 %v2997_v35, %v3001_v45  ;;  %v2988_v6 = vsel %vm2930_vm12, %v6020_v30, 0.0 }
 0x41c   :  { %v3008_v2 = vmax.f32 %v3000_v5, %v3007_v55  ;;  %v2984_v10 = vsel %vm2930_vm12, %v6029_v52, 0.0  ;;  %v3003_v33 = vsel %vm2930_vm12, %v6029_v52, -inf  ;;  %v2974_v57 = vmax.f32 %v2972_v41, %v2973_v18 }
 0x41d   :  { %v2985_v32 = vadd.f32 %v2984_v10, %v2983_v48  ;;  %v3004_v3 = vmax.f32 %v2998_v50, %v3003_v33  ;;  %v3092_v45 = vsel %vm3018_vm13, %v3086_v28, 0 }
 0x41e   :  { %v3010_v61 = vmax.f32 %v3006_v20, %v3008_v2  ;;  %v3019_v49 = vsel %vm3018_vm13, %v2953_v14, %v2974_v57  ;;  %vm3341_vm13 = vcmask 224368  }
 0x41f   :  { %v2987_v12 = vadd.f32 %v2986_v25, %v2985_v32  ;;  %v3009_v34 = vmax.f32 %v3002_v63, %v3004_v3 }
 0x421   :  { %v2989_v9 = vadd.f32 %v2988_v6, %v2987_v12  ;;  %v3011_v47 = vmax.f32 %v3009_v34, %v3010_v61  ;;  %v3154_v34 = vlaneseq }
 0x423   :  { %v2990_v31 = vrot.slane %v2989_v9, 4  ;;  %v3012_v54 = vrot.slane %v3011_v47, 4  ;;  %v6054_v23 = vshrl.u32 %v3154_v34, 7 }
 0x425   :  { %v2991_v56 = vadd.f32 %v2990_v31, %v2989_v9  ;;  %v3013_v43 = vmax.f32 %v3011_v47, %v3012_v54  ;;  %v6057_v6 = vsub.s32 2, %v6054_v23  ;;  %v6060_v47 = vsub.s32 0, %v6054_v23 }
 0x427   :  { %v2992_v36 = vrot.slane %v2991_v56, 2  ;;  %v3014_v42 = vrot.slane %v3013_v43, 2 }
 0x429   :  { %v2993_v59 = vadd.f32 %v2992_v36, %v2991_v56  ;;  %v3015_v4 = vmax.f32 %v3013_v43, %v3014_v42 }
 0x42b   :  { %v2994_v58 = vrot.slane %v2993_v59, 1  ;;  %v3016_v26 = vrot.slane %v3015_v4, 1 }
 0x42d   :  { %v2995_v16 = vadd.f32 %v2994_v58, %v2993_v59  ;;  %v3017_v39 = vmax.f32 %v3015_v4, %v3016_v26 }
 0x42f   :  { %v2996_v22 = vmul.f32 0.015625, %v2995_v16 }
 0x431   :  { %v3021_v1 = vsel %vm3020_vm14, %v3019_v49, %v2996_v22 }
 0x432   :  { %v3023_v35 = vsel %vm722_vm3, %v3021_v1, %v3017_v39  ;;  %vm3134_vm3 = vcmask 113664  }
 0x433   :  { %v3024_v44 = vpack.c.bf16 %v3023_v35, %v3023_v35  ;;  %3137 = vst.msk [vmem:[#allocation4 + $0x10] sm:$0xff] %vm3134_vm3, %v4682_v7  ;;  %3135 = vst.msk [vmem:[#allocation4] sm:$0xff] %vm3134_vm3, %v4682_v7 }
 0x434   :  { %3136 = vst.msk [vmem:[#allocation4 + $0x8] sm:$0xff] %vm3134_vm3, %v4682_v7  ;;  %3140 = vst.msk [vmem:[#allocation5] sm:$0xff] %vm3134_vm3, %v4682_v7 }
 0x435   :  { %4554 = vmatmul.mubr.msk.bf16.vlgmr.msra.gmra.mrb[16].mxu1 %vm2930_vm12, %v3024_v44  ;;  %3141 = vst.msk [vmem:[#allocation5 + $0x8] sm:$0xff] %vm3134_vm3, %v4682_v7  ;;  %3142 = vst.msk [vmem:[#allocation5 + $0x10] sm:$0xff] %vm3134_vm3, %v4682_v7  ;;  %vm3365_vm3 = vcmask 568768  }
 0x436   :  { %4558 = vmatpush3.bf16.msra.mxu1 %v3092_v45  ;;  %4559 = vmatprep.mubr.msk.bf16.mxu1 %vm4683_vm11, %v4682_v7  ;;  %vm3612_vm11 = vcmask 113668  }
 0x508   :  { %v3078_v5 = vpop.f32.mrb[16].mxu1 }
 0x509   :  { %v3084_v50 = vmax.f32 %v3078_v5, 0.0  ;;  %v4555_v48 = vpop.f32.mrb[17].mxu1 }
 0x50a   :  { %v3081_v55 = vpop.f32.mrb[18].mxu1 }
 0x50b   :  { %v3085_v20 = vpack.c.bf16 %v3084_v50, %v3084_v50  ;;  %v4556_v2 = vpop.f32.mrb[19].mxu1 }
 0x50d   :  { %4560 = vmatmul.mubr.msk.bf16.vlgmr.msra.gmra.mrb[20].mxu1 %vm3087_vm15, %v3085_v20  ;;  %vm3357_vm15 = vcmask 453968  }
 0x5e0   :  { %v3128_v10 = vpop.f32.mrb[20].mxu1 }
 0x5e1   :  { %v3145_v33 = vrot.slane %v3128_v10, 1  ;;  %v4561_v63 = vpop.f32.mrb[21].mxu1 }
 0x5e2   :  { %v3131_v32 = vpop.f32.mrb[22].mxu1 }
 0x5e3   :  { %v3147_v3 = vadd.f32 %v3145_v33, %v3128_v10  ;;  %v4562_v62 = vpop.f32.mrb[23].mxu1 }
 0x5e5   :  { %v4398_v25 = vmul.f32 -1.442695, %v3147_v3 }
 0x5e7   :  { %4637 = vpow2.f32 %v4398_v25 }
 0x5f1   :  { %v4638_v61 = vpop.eup %4637 }
 0x5f2   :  { %v3151_v12 = vadd.f32 1.0, %v4638_v61 }
 0x5f4   :  { %4639 = vrcp.f32 %v3151_v12 }
 0x5fe   :  { %v4640_v9 = vpop.eup %4639 }
 0x5ff   :  { %v3444_v37 = vrot.slane %v4640_v9, %v6057_v6  ;;  %v6070_v27 = vrot.slane %v4640_v9, %v6060_v47 }
 0x601   :  { %v6064_v31 = vmul.f32 %v3444_v37, %v5978_v15  ;;  %v6067_v54 = vmul.f32 %v3444_v37, %v5988_v29  ;;  %v6077_v41 = vmul.f32 %v3444_v37, %v5993_v51  ;;  %v6085_v36 = vmul.f32 %v6070_v27, %v5920_v53 }
 0x602   :  { %v6093_v40 = vmul.f32 %v6070_v27, %v5924_v24  ;;  %v6100_v4 = vmul.f32 %v3444_v37, %v6001_v0  ;;  %v6107_v58 = vmul.f32 %v3444_v37, %v6012_v11  ;;  %v6111_v14 = vmul.f32 %v6070_v27, %v5929_v38 }
 0x603   :  { %v3456_v56 = vsel %vm2930_vm12, %v6064_v31, -inf  ;;  %v3453_v43 = vsel %vm2930_vm12, %v6067_v54, -inf  ;;  %v3529_v15 = vsel %vm2930_vm12, %v6064_v31, 0.0  ;;  %v3459_v29 = vsel %vm2930_vm12, %v6077_v41, -inf }
 0x604   :  { %3457 = vmax.xlane.f32.xlu1 %v3456_v56  ;;  %3454 = vmax.xlane.f32.xlu0 %v3453_v43  ;;  %v3526_v42 = vsel %vm2930_vm12, %v6067_v54, 0.0  ;;  %v3169_v51 = vsel %vm2930_vm12, %v6085_v36, -inf  ;;  %v3532_v59 = vsel %vm2930_vm12, %v6077_v41, 0.0  ;;  %v3166_v53 = vsel %vm2930_vm12, %v6093_v40, -inf }
 0x605   :  { %v3250_v18 = vsel %vm2930_vm12, %v6093_v40, 0.0  ;;  %v3462_v24 = vsel %vm2930_vm12, %v6100_v4, -inf  ;;  %v3465_v0 = vsel %vm2930_vm12, %v6107_v58, -inf  ;;  %v3172_v26 = vsel %vm2930_vm12, %v6111_v14, -inf }
 0x606   :  { %v6119_v16 = vmul.f32 %v6070_v27, %v5938_v19  ;;  %v3253_v38 = vsel %vm2930_vm12, %v6085_v36, 0.0  ;;  %v6126_v57 = vmul.f32 %v3444_v37, %v6029_v52  ;;  %v3535_v19 = vsel %vm2930_vm12, %v6100_v4, 0.0 }
 0x607   :  { %v6134_v39 = vmul.f32 %v6070_v27, %v5941_v60  ;;  %v3256_v52 = vsel %vm2930_vm12, %v6111_v14, 0.0  ;;  %v6141_v28 = vmul.f32 %v3444_v37, %v6006_v46  ;;  %v3538_v60 = vsel %vm2930_vm12, %v6107_v58, 0.0 }
 0x608   :  { %3530 = vadd.xlane.f32.xlu1 %v3529_v15  ;;  %3460 = vmax.xlane.f32.xlu0 %v3459_v29  ;;  %v3175_v11 = vsel %vm2930_vm12, %v6119_v16, -inf  ;;  %v3468_v22 = vsel %vm2930_vm12, %v6126_v57, -inf  ;;  %v6149_v35 = vmul.f32 %v6070_v27, %v5949_v21  ;;  %v3259_v46 = vsel %vm2930_vm12, %v6119_v16, 0.0 }
 0x609   :  { %v3178_v49 = vsel %vm2930_vm12, %v6134_v39, -inf  ;;  %v3471_v1 = vsel %vm2930_vm12, %v6141_v28, -inf  ;;  %v6156_v45 = vmul.f32 %v3444_v37, %v6020_v30  ;;  %v3541_v21 = vsel %vm2930_vm12, %v6126_v57, 0.0 }
 0x60a   :  { %v3181_v44 = vsel %vm2930_vm12, %v6149_v35, -inf  ;;  %v6164_v50 = vmul.f32 %v6070_v27, %v5956_v13  ;;  %v3262_v30 = vsel %vm2930_vm12, %v6134_v39, 0.0  ;;  %v3544_v20 = vsel %vm2930_vm12, %v6141_v28, 0.0 }
 0x60b   :  { %v3474_v5 = vsel %vm2930_vm12, %v6156_v45, -inf  ;;  %v3547_v55 = vsel %vm2930_vm12, %v6156_v45, 0.0  ;;  %v3265_v2 = vsel %vm2930_vm12, %v6149_v35, 0.0  ;;  %v6180_v10 = vmul.f32 %v6070_v27, %v5959_v17 }
 0x60c   :  { %3527 = vadd.xlane.f32.xlu0 %v3526_v42  ;;  %3170 = vmax.xlane.f32.xlu1 %v3169_v51  ;;  %v3184_v48 = vsel %vm2930_vm12, %v6164_v50, -inf  ;;  %v3268_v13 = vsel %vm2930_vm12, %v6164_v50, 0.0  ;;  %v3199_v29 = vand.u32 127, %v3154_v34 }
 0x60d   :  { %v3187_v33 = vsel %vm2930_vm12, %v6180_v10, -inf  ;;  %v3271_v17 = vsel %vm2930_vm12, %v6180_v10, 0.0 }
 0x610   :  { %3533 = vadd.xlane.f32.xlu1 %v3532_v59  ;;  %3167 = vmax.xlane.f32.xlu0 %v3166_v53  ;;  %v3200_v59 = vadd.s32 4294967293, %v3199_v29 }
 0x614   :  { %3251 = vadd.xlane.f32.xlu1 %v3250_v18  ;;  %3463 = vmax.xlane.f32.xlu0 %v3462_v24  ;;  %v6210_v24 = vsub.s32 %v3200_v59, %v6054_v23 }
 0x618   :  { %3466 = vmax.xlane.f32.xlu1 %v3465_v0  ;;  %3173 = vmax.xlane.f32.xlu0 %v3172_v26 }
 0x61c   :  { %3176 = vmax.xlane.f32.xlu1 %v3175_v11  ;;  %3254 = vadd.xlane.f32.xlu0 %v3253_v38 }
 0x620   :  { %3469 = vmax.xlane.f32.xlu1 %v3468_v22  ;;  %3536 = vadd.xlane.f32.xlu0 %v3535_v19 }
 0x624   :  { %3179 = vmax.xlane.f32.xlu1 %v3178_v49  ;;  %3257 = vadd.xlane.f32.xlu0 %v3256_v52 }
 0x628   :  { %3472 = vmax.xlane.f32.xlu1 %v3471_v1  ;;  %3539 = vadd.xlane.f32.xlu0 %v3538_v60 }
 0x62c   :  { %3182 = vmax.xlane.f32.xlu1 %v3181_v44  ;;  %3260 = vadd.xlane.f32.xlu0 %v3259_v46 }
 0x630   :  { %3475 = vmax.xlane.f32.xlu1 %v3474_v5  ;;  %3542 = vadd.xlane.f32.xlu0 %v3541_v21 }
 0x634   :  { %3185 = vmax.xlane.f32.xlu1 %v3184_v48  ;;  %3263 = vadd.xlane.f32.xlu0 %v3262_v30 }
 0x638   :  { %3548 = vadd.xlane.f32.xlu1 %v3547_v55  ;;  %3545 = vadd.xlane.f32.xlu0 %v3544_v20 }
 0x63c   :  { %3269 = vadd.xlane.f32.xlu1 %v3268_v13  ;;  %3266 = vadd.xlane.f32.xlu0 %v3265_v2 }
 0x640   :  { %3188 = vmax.xlane.f32.xlu0 %v3187_v33 }
 0x644   :  { %3272 = vadd.xlane.f32.xlu0 %v3271_v17 }
 0x691   :  { %v3458_v63 = vpop.xlane.xlu1 %3457  ;;  %v3455_v32 = vpop.xlane.xlu0 %3454 }
 0x692   :  { %v3492_v11 = vrot.slane %v3458_v63, %v6210_v24  ;;  %v3488_v38 = vrot.slane %v3455_v32, %v6210_v24 }
 0x694   :  { %v3517_v1 = vsel %vm3233_vm4, %v3492_v11, %v3488_v38 }
 0x695   :  { %v3531_v3 = vpop.xlane.xlu1 %3530  ;;  %v3461_v62 = vpop.xlane.xlu0 %3460 }
 0x696   :  { %v3496_v22 = vrot.slane %v3461_v62, %v6210_v24  ;;  %v3551_v13 = vmul.f32 0.03125, %v3531_v3 }
 0x698   :  { %v3518_v44 = vsel %vm3235_vm6, %v3496_v22, %v3517_v1  ;;  %v3573_v29 = vrot.slane %v3551_v13, %v6210_v24 }
 0x699   :  { %v3528_v25 = vpop.xlane.xlu0 %3527  ;;  %v6196_v61 = vpop.xlane.xlu1 %3170 }
 0x69a   :  { %v3550_v5 = vmul.f32 0.03125, %v3528_v25 }
 0x69c   :  { %v3569_v32 = vrot.slane %v3550_v5, %v6210_v24 }
 0x69d   :  { %v3534_v12 = vpop.xlane.xlu1 %3533  ;;  %v6198_v9 = vpop.xlane.xlu0 %3167 }
 0x69e   :  { %v3552_v48 = vmul.f32 0.03125, %v3534_v12  ;;  %v3204_v38 = vrot.slane %v6198_v9, %v6210_v24 }
 0x6a0   :  { %v3577_v12 = vrot.slane %v3552_v48, %v6210_v24 }
 0x6a1   :  { %v6200_v37 = vpop.xlane.xlu1 %3251  ;;  %v3464_v27 = vpop.xlane.xlu0 %3463 }
 0x6a2   :  { %v3500_v34 = vrot.slane %v3464_v27, %v6210_v24 }
 0x6a4   :  { %v3519_v21 = vsel %vm3237_vm7, %v3500_v34, %v3518_v44 }
 0x6a5   :  { %v3467_v56 = vpop.xlane.xlu1 %3466  ;;  %v6202_v7 = vpop.xlane.xlu0 %3173 }
 0x6a6   :  { %v3504_v19 = vrot.slane %v3467_v56, %v6210_v24  ;;  %v3212_v1 = vrot.slane %v6202_v7, %v6210_v24 }
 0x6a8   :  { %v3520_v30 = vsel %vm3239_vm8, %v3504_v19, %v3519_v21 }
 0x6a9   :  { %v6204_v43 = vpop.xlane.xlu1 %3176  ;;  %v3255_v15 = vpop.xlane.xlu0 %3254 }
 0x6ad   :  { %v3470_v42 = vpop.xlane.xlu1 %3469  ;;  %v3537_v51 = vpop.xlane.xlu0 %3536 }
 0x6ae   :  { %v3508_v60 = vrot.slane %v3470_v42, %v6210_v24  ;;  %v3553_v17 = vmul.f32 0.03125, %v3537_v51  ;;  %v3276_v42 = vmul.f32 0.03125, %v3255_v15  ;;  %v3598_v51 = vsel %vm3233_vm4, %v3573_v29, %v3569_v32 }
 0x6af   :  { %v3599_v11 = vsel %vm3235_vm6, %v3577_v12, %v3598_v51  ;;  %v3275_v15 = vmul.f32 0.03125, %v6200_v37 }
 0x6b0   :  { %v3521_v2 = vsel %vm3241_vm1, %v3508_v60, %v3520_v30  ;;  %v3581_v59 = vrot.slane %v3553_v17, %v6210_v24 }
 0x6b1   :  { %v6207_v53 = vpop.xlane.xlu1 %3179  ;;  %v3258_v18 = vpop.xlane.xlu0 %3257 }
 0x6b2   :  { %v3600_v5 = vsel %vm3237_vm7, %v3581_v59, %v3599_v11  ;;  %v3277_v21 = vmul.f32 0.03125, %v3258_v18  ;;  %v3220_v7 = vrot.slane %v6207_v53, %v6210_v24 }
 0x6b5   :  { %v3473_v0 = vpop.xlane.xlu1 %3472  ;;  %v3540_v26 = vpop.xlane.xlu0 %3539 }
 0x6b6   :  { %v3512_v46 = vrot.slane %v3473_v0, %v6210_v24  ;;  %v3554_v62 = vmul.f32 0.03125, %v3540_v26  ;;  %v3208_v26 = vrot.slane %v6196_v61, %v6210_v24  ;;  %v3298_v61 = vrot.slane %v3276_v42, %v6210_v24 }
 0x6b8   :  { %v3522_v63 = vsel %vm3243_vm9, %v3512_v46, %v3521_v2  ;;  %v3585_v0 = vrot.slane %v3554_v62, %v6210_v24  ;;  %v3216_v46 = vrot.slane %v6204_v43, %v6210_v24  ;;  %v3294_v2 = vrot.slane %v3275_v15, %v6210_v24 }
 0x6b9   :  { %v6217_v49 = vpop.xlane.xlu1 %3182  ;;  %v3261_v52 = vpop.xlane.xlu0 %3260  ;;  %v3302_v62 = vrot.slane %v3277_v21, %v6210_v24 }
 0x6ba   :  { %v3601_v9 = vsel %vm3239_vm8, %v3585_v0, %v3600_v5  ;;  %v3278_v48 = vmul.f32 0.03125, %v3261_v52  ;;  %v3224_v18 = vrot.slane %v6217_v49, %v6210_v24 }
 0x6bd   :  { %v3476_v55 = vpop.xlane.xlu1 %3475  ;;  %v3543_v20 = vpop.xlane.xlu0 %3542 }
 0x6be   :  { %v3516_v33 = vrot.slane %v3476_v55, %v6210_v24  ;;  %v3555_v27 = vmul.f32 0.03125, %v3543_v20  ;;  %v3234_v55 = vsel %vm3233_vm4, %v3208_v26, %v3204_v38 }
 0x6bf   :  { %v3236_v32 = vsel %vm3235_vm6, %v3212_v1, %v3234_v55 }
 0x6c0   :  { %v3523_v25 = vsel %vm3245_vm10, %v3516_v33, %v3522_v63  ;;  %v3589_v22 = vrot.slane %v3555_v27, %v6210_v24  ;;  %v3238_v12 = vsel %vm3237_vm7, %v3216_v46, %v3236_v32  ;;  %v3323_v27 = vsel %vm3233_vm4, %v3298_v61, %v3294_v2  ;;  %v4625_v32 = vld [vmem:[%s6571_s12 + $0x10] sm:$0xff]  }
 0x6c1   :  { %3525 = vst.msk [vmem:[#allocation4 + $0x11] sm:$0xff] %vm3248_vm5, %v3523_v25  ;;  %v3186_v56 = vpop.xlane.xlu1 %3185  ;;  %v3264_v3 = vpop.xlane.xlu0 %3263  ;;  %v3240_v49 = vsel %vm3239_vm8, %v3220_v7, %v3238_v12  ;;  %v3324_v11 = vsel %vm3235_vm6, %v3302_v62, %v3323_v27  ;;  %vm3381_vm4 = vcmask 798368   ;;  %vm3621_vm6 = vcmask 228468  }
 0x6c2   :  { %v3602_v20 = vsel %vm3241_vm1, %v3589_v22, %v3601_v9  ;;  %v3279_v43 = vmul.f32 0.03125, %v3264_v3  ;;  %v3228_v53 = vrot.slane %v3186_v56, %v6210_v24  ;;  %v3306_v3 = vrot.slane %v3278_v48, %v6210_v24  ;;  %v4623_v9 = vld [vmem:[%s6571_s12] sm:$0xff]  }
 0x6c3   :  { %v3242_v0 = vsel %vm3241_vm1, %v3224_v18, %v3240_v49  ;;  %3843 = vmatpush1.bf16.msra.mxu0 %v4623_v9 }
 0x6c4   :  { %v3310_v29 = vrot.slane %v3279_v43, %v6210_v24  ;;  %v3244_v38 = vsel %vm3243_vm9, %v3228_v53, %v3242_v0  ;;  %3844 = vmatprep.subr.bf16.mxu0 %v4673_v8  ;;  %v4627_v0 = vld [vmem:[%s6571_s12 + $0x20] sm:$0xff]  }
 0x6c5   :  { %v3549_v34 = vpop.xlane.xlu1 %3548  ;;  %v3546_v19 = vpop.xlane.xlu0 %3545 }
 0x6c6   :  { %v3557_v60 = vmul.f32 0.03125, %v3549_v34  ;;  %v3556_v44 = vmul.f32 0.03125, %v3546_v19  ;;  %v3325_v34 = vsel %vm3237_vm7, %v3306_v3, %v3324_v11  ;;  %v4626_v3 = vld [vmem:[%s6571_s12 + $0x18] sm:$0xff]   ;;  %vm3630_vm7 = vcmask 343268  }
 0x6c7   :  { %v3326_v15 = vsel %vm3239_vm8, %v3310_v29, %v3325_v34  ;;  %v4628_v34 = vld [vmem:[%s6571_s12 + $0x28] sm:$0xff]   ;;  %vm3639_vm8 = vcmask 458068  }
 0x6c8   :  { %v3597_v30 = vrot.slane %v3557_v60, %v6210_v24  ;;  %v3593_v37 = vrot.slane %v3556_v44, %v6210_v24  ;;  %v3607_v63 = vld [vmem:[#allocation4 + $0xe] sm:$0xff] }
 0x6c9   :  { %v3267_v13 = vpop.xlane.xlu0 %3266  ;;  %v3270_v33 = vpop.xlane.xlu1 %3269  ;;  %v3608_v51 = vpack.c.bf16 %v3607_v63, %v3607_v63  ;;  %v3632_v63 = vld [vmem:[#allocation4 + $0x11] sm:$0xff] }
 0x6ca   :  { %v3603_v52 = vsel %vm3243_vm9, %v3593_v37, %v3602_v20  ;;  %v3280_v17 = vmul.f32 0.03125, %v3267_v13  ;;  %v3281_v42 = vmul.f32 0.03125, %v3270_v33  ;;  %v3623_v20 = vld [vmem:[#allocation4 + $0x10] sm:$0xff]  ;;  %v4624_v13 = vld [vmem:[%s6571_s12 + $0x8] sm:$0xff]  }
 0x6cb   :  { %v3604_v25 = vsel %vm3245_vm10, %v3597_v30, %v3603_v52  ;;  %v3610_v22 = vrot.slane %v3608_v51, 4  ;;  %3845 = vmatpush1.bf16.msra.mxu0 %v4624_v13  ;;  %v3624_v33 = vpack.c.bf16 %v3623_v20, %v3623_v20  ;;  %v3614_v27 = vld [vmem:[#allocation4 + $0xf] sm:$0xff] }
 0x6cc   :  { %3606 = vst.msk [vmem:[#allocation5 + $0x11] sm:$0xff] %vm3248_vm5, %v3604_v25  ;;  %v3314_v56 = vrot.slane %v3280_v17, %v6210_v24  ;;  %v3318_v1 = vrot.slane %v3281_v42, %v6210_v24  ;;  %3846 = vmatprep.subr.bf16.mxu0 %v4673_v8  ;;  %v3633_v25 = vpack.c.bf16 %v3632_v63, %v3632_v63  ;;  %v3641_v51 = vld [vmem:[#allocation4 + $0x12] sm:$0xff] }
 0x6cd   :  { %v3189_v59 = vpop.xlane.xlu0 %3188  ;;  %3613 = vst.msk [vmem:[#allocation6] sm:$0xf0] %vm3612_vm11, %v3610_v22  ;;  %v3626_v53 = vrot.slane %v3624_v33, 4  ;;  %v3615_v42 = vpack.c.bf16 %v3614_v27, %v3614_v27  ;;  %v3642_v11 = vpack.c.bf16 %v3641_v51, %v3641_v51  ;;  %v3650_v22 = vld [vmem:[#allocation4 + $0x13] sm:$0xff]  ;;  %vm3431_vm11 = vcmask 437568  }
 0x6ce   :  { %v3232_v26 = vrot.slane %v3189_v59, %v6210_v24  ;;  %v3327_v44 = vsel %vm3241_vm1, %v3314_v56, %v3326_v15  ;;  %v3635_v29 = vrot.slane %v3633_v25, 4  ;;  %v4633_v27 = vld [vmem:[%s6571_s12 + $0x50] sm:$0xff]   ;;  %v4634_v51 = vld [vmem:[%s6571_s12 + $0x58] sm:$0xff]   ;;  %vm3415_vm1 = vcmask 207968  }
 0x6cf   :  { %v3328_v5 = vsel %vm3243_vm9, %v3318_v1, %v3327_v44  ;;  %3847 = vmatpush1.bf16.msra.mxu0 %v4625_v32  ;;  %v3617_v56 = vrot.slane %v3615_v42, 4  ;;  %v3651_v1 = vpack.c.bf16 %v3650_v22, %v3650_v22  ;;  %v3659_v44 = vld [vmem:[#allocation4 + $0x14] sm:$0xff]  ;;  %vm3648_vm9 = vcmask 572868  }
 0x6d0   :  { %v3246_v19 = vsel %vm3245_vm10, %v3232_v26, %v3244_v38  ;;  %3848 = vmatprep.subr.bf16.mxu0 %v4673_v8 }
 0x6d1   :  { %3249 = vst.msk [vmem:[#allocation4 + $0x3] sm:$0xff] %vm3248_vm5, %v3246_v19  ;;  %v3273_v60 = vpop.xlane.xlu0 %3272  ;;  %v3644_v19 = vrot.slane %v3642_v11, 4 }
 0x6d2   :  { %v3282_v46 = vmul.f32 0.03125, %v3273_v60 }
 0x6d3   :  { %3849 = vmatpush1.bf16.msra.mxu0 %v4626_v3  ;;  %v3668_v33 = vld [vmem:[#allocation5 + $0xe] sm:$0xff] }
 0x6d4   :  { %v3322_v61 = vrot.slane %v3282_v46, %v6210_v24  ;;  %3850 = vmatprep.subr.bf16.mxu0 %v4673_v8  ;;  %v4629_v46 = vld [vmem:[%s6571_s12 + $0x30] sm:$0xff]  }
 0x6d5   :  { %v3706_v25 = vld [vmem:[#allocation5 + $0x12] sm:$0xff] }
 0x6d6   :  { %v3329_v21 = vsel %vm3245_vm10, %v3322_v61, %v3328_v5  ;;  %v3653_v61 = vrot.slane %v3651_v1, 4  ;;  %v4023_v1 = vld [vmem:[%s6578_s25] sm:$0xff]  ;;  %vm3423_vm10 = vcmask 322768  }
 0x6d7   :  { %3331 = vst.msk [vmem:[#allocation5 + $0x3] sm:$0xff] %vm3248_vm5, %v3329_v21  ;;  %3851 = vmatpush1.bf16.msra.mxu0 %v4627_v0  ;;  %v3660_v21 = vpack.c.bf16 %v3659_v44, %v3659_v44  ;;  %v4635_v0 = vld [vmem:[%s6571_s12 + $0x60] ss:$0 sps:$4 sm:$0x33]   ;;  %vm3657_vm5 = vcmask 687668  }
 0x6d8   :  { %v3351_v48 = vld [vmem:[#allocation4 + $0x3] sm:$0xff]  ;;  %3852 = vmatprep.subr.bf16.mxu0 %v4673_v8  ;;  %v3840_v22 = vsel %vm3020_vm14, %v4635_v0, 0  ;;  %vm3349_vm14 = vcmask 339168  }
 0x6d9   :  { %v3335_v30 = vld [vmem:[#allocation4 + $0x1] sm:$0xff]  ;;  %v3352_v37 = vpack.c.bf16 %v3351_v48, %v3351_v48  ;;  %v4630_v48 = vld [vmem:[%s6571_s12 + $0x38] sm:$0xff]  }
 0x6da   :  { %v3336_v55 = vpack.c.bf16 %v3335_v30, %v3335_v30  ;;  %v3359_v7 = vld [vmem:[#allocation4 + $0x4] sm:$0xff]  ;;  %v3662_v30 = vrot.slane %v3660_v21, 4 }
 0x6db   :  { %v3343_v24 = vld [vmem:[#allocation4 + $0x2] sm:$0xff]  ;;  %3354 = vrot.lane.b32.xlu0 %v3352_v37, %s4684_s19  ;;  %v3360_v18 = vpack.c.bf16 %v3359_v7, %v3359_v7  ;;  %3853 = vmatpush1.bf16.msra.mxu0 %v4628_v34 }
 0x6dc   :  { %v3332_v43 = vld [vmem:[#allocation4] sm:$0xff]  ;;  %3338 = vrot.lane.b32.xlu1 %v3336_v55, %s4685_s21  ;;  %v3344_v52 = vpack.c.bf16 %v3343_v24, %v3343_v24  ;;  %3854 = vmatprep.subr.bf16.mxu0 %v4673_v8  ;;  %v3686_v55 = vld [vmem:[#allocation5 + $0x10] sm:$0xff] }
 0x6dd   :  { %v3333_v2 = vpack.c.bf16 %v3332_v43, %v3332_v43  ;;  %v3367_v17 = vld [vmem:[#allocation4 + $0x5] sm:$0xff] }
 0x6de   :  { %v3368_v62 = vpack.c.bf16 %v3367_v17, %v3367_v17  ;;  %v3375_v12 = vld [vmem:[#allocation4 + $0x6] sm:$0xff] }
 0x6df   :  { %3334 = vst.msk [vmem:[#allocation6] sm:$0xf] %vm3138_vm2, %v3333_v2  ;;  %3362 = vrot.lane.b32.xlu0 %v3360_v18, %s4678_s30  ;;  %v3376_v49 = vpack.c.bf16 %v3375_v12, %v3375_v12  ;;  %v3399_v59 = vld [vmem:[#allocation5 + $0x2] sm:$0xff]  ;;  %3855 = vmatpush1.bf16.msra.mxu0 %v4629_v46  ;;  %v3687_v2 = vpack.c.bf16 %v3686_v55, %v3686_v55  ;;  %v3677_v12 = vld [vmem:[#allocation5 + $0xf] sm:$0xff]  ;;  %v4026_v46 = vld [vmem:[%s6578_s25 + $0x18] sm:$0xff]  ;;  %vm3373_vm2 = vcmask 683568  }
 0x6e0   :  { %3346 = vrot.lane.b32.xlu1 %v3344_v52, %s4686_s4  ;;  %v3400_v26 = vpack.c.bf16 %v3399_v59, %v3399_v59  ;;  %v3409_v38 = vld [vmem:[#allocation5 + $0x3] sm:$0xff]  ;;  %3856 = vmatprep.subr.bf16.mxu0 %v4673_v8  ;;  %v3697_v52 = vld [vmem:[#allocation5 + $0x11] sm:$0xff]  ;;  %v3678_v42 = vpack.c.bf16 %v3677_v12, %v3677_v12 }
 0x6e1   :  { %v3410_v15 = vpack.c.bf16 %v3409_v38, %v3409_v38  ;;  %v3417_v60 = vld [vmem:[#allocation5 + $0x4] sm:$0xff]  ;;  %v3689_v63 = vrot.slane %v3687_v2, 4  ;;  %v3715_v59 = vld [vmem:[#allocation5 + $0x13] sm:$0xff] }
 0x6e2   :  { %v3418_v5 = vpack.c.bf16 %v3417_v60, %v3417_v60  ;;  %v3425_v9 = vld [vmem:[#allocation5 + $0x5] sm:$0xff]  ;;  %v3716_v11 = vpack.c.bf16 %v3715_v59, %v3715_v59  ;;  %v3724_v38 = vld [vmem:[#allocation5 + $0x14] sm:$0xff] }
 0x6e3   :  { %3370 = vrot.lane.b32.xlu0 %v3368_v62, %s4687_s2  ;;  %v3426_v37 = vpack.c.bf16 %v3425_v9, %v3425_v9  ;;  %v3433_v7 = vld [vmem:[#allocation5 + $0x6] sm:$0xff]  ;;  %3857 = vmatpush1.bf16.msra.mxu0 %v4630_v48  ;;  %v3698_v62 = vpack.c.bf16 %v3697_v52, %v3697_v52 }
 0x6e4   :  { %3627 = vrot.lane.b32.xlu1 %v3626_v53, %s4686_s4  ;;  %v3383_v20 = vld [vmem:[#allocation5] sm:$0xff]  ;;  %3858 = vmatprep.subr.bf16.mxu0 %v4673_v8  ;;  %v3434_v43 = vpack.c.bf16 %v3433_v7, %v3433_v7  ;;  %v4632_v17 = vld [vmem:[%s6571_s12 + $0x48] sm:$0xff]   ;;  %v3669_v53 = vpack.c.bf16 %v3668_v33, %v3668_v33  ;;  %v3718_v34 = vrot.slane %v3716_v11, 4 }
 0x6e5   :  { %v4631_v24 = vld [vmem:[%s6571_s12 + $0x40] sm:$0xff]   ;;  %v3384_v13 = vpack.c.bf16 %v3383_v20, %v3383_v20  ;;  %v3700_v3 = vrot.slane %v3698_v62, 4  ;;  %v4024_v60 = vld [vmem:[%s6578_s25 + $0x8] sm:$0xff] }
 0x6e6   :  { %v3391_v18 = vld [vmem:[#allocation5 + $0x1] sm:$0xff]  ;;  %v4039_v44 = vpack.c.bf16 %v4024_v60, %v4023_v1 }
 0x6e7   :  { %3378 = vrot.lane.b32.xlu0 %v3376_v49, %s4688_s20  ;;  %3859 = vmatpush1.bf16.msra.mxu0 %v4631_v24  ;;  %v3392_v32 = vpack.c.bf16 %v3391_v18, %v3391_v18  ;;  %v3671_v49 = vrot.slane %v3669_v53, 4  ;;  %v4028_v9 = vld [vmem:[%s6578_s25 + $0x28] sm:$0xff]  ;;  %v4031_v55 = vld [vmem:[%s6578_s25 + $0x40] sm:$0xff] }
 0x6e8   :  { %3636 = vrot.lane.b32.xlu1 %v3635_v29, %s4684_s19  ;;  %s4693_s19 = smov 98   ;;  %3860 = vmatprep.subr.bf16.mxu0 %v4673_v8  ;;  %v3707_v29 = vpack.c.bf16 %v3706_v25, %v3706_v25  ;;  %v4032_v7 = vld [vmem:[%s6578_s25 + $0x48] sm:$0xff]  ;;  %v4035_v2 = vld [vmem:[%s6578_s25 + $0x60] sm:$0xff] }
 0x6e9   :  { %4565 = vmatprep.mubr.msk.bf16.mxu1 %vm87_vm0, %v4039_v44  ;;  %v4043_v24 = vpack.c.bf16 %v4032_v7, %v4031_v55  ;;  %v4036_v18 = vld [vmem:[%s6578_s25 + $0x68] sm:$0xff] }
 0x6ea   :  { %v4045_v33 = vpack.c.bf16 %v4036_v18, %v4035_v2 }
 0x6eb   :  { %3618 = vrot.lane.b32.xlu0 %v3617_v56, %s4685_s21  ;;  %3861 = vmatpush1.bf16.msra.mxu0 %v4632_v17  ;;  %v3709_v56 = vrot.slane %v3707_v29, 4  ;;  %v4037_v17 = vld [vmem:[%s6578_s25 + $0x70] sm:$0xff] }
 0x6ec   :  { %3402 = vrot.lane.b32.xlu1 %v3400_v26, %s4689_s24  ;;  %3862 = vmatprep.subr.bf16.mxu0 %v4673_v8  ;;  %v3680_v26 = vrot.slane %v3678_v42, 4 }
 0x6ef   :  { %3645 = vrot.lane.b32.xlu0 %v3644_v19, %s4678_s30  ;;  %3863 = vmatpush1.bf16.msra.mxu0 %v4633_v27  ;;  %v3725_v19 = vpack.c.bf16 %v3724_v38, %v3724_v38 }
 0x6f0   :  { %3412 = vrot.lane.b32.xlu1 %v3410_v15, %s4690_s8  ;;  %3864 = vmatprep.subr.bf16.mxu0 %v4673_v8  ;;  %v4636_v15 = vld [vmem:[%s6572_s13] sm:$0xff]  }
 0x6f1   :  { %4563 = vmatprep.subr.bf16.mxu1 %v4636_v15 }
 0x6f2   :  { %4564 = vmatpush3.bf16.msra.mxu1 %v4636_v15 }
 0x6f3   :  { %3654 = vrot.lane.b32.xlu0 %v3653_v61, %s4687_s2  ;;  %3865 = vmatpush1.bf16.msra.mxu0 %v4634_v51  ;;  %v4027_v61 = vld [vmem:[%s6578_s25 + $0x20] sm:$0xff] }
 0x6f4   :  { %3420 = vrot.lane.b32.xlu1 %v3418_v5, %s4691_s9  ;;  %3866 = vmatprep.subr.bf16.mxu0 %v4673_v8  ;;  %v4025_v8 = vld [vmem:[%s6578_s25 + $0x10] sm:$0xff]  ;;  %v3727_v5 = vrot.slane %v3725_v19, 4  ;;  %v4041_v48 = vpack.c.bf16 %v4028_v9, %v4027_v61 }
 0x6f5   :  { %v4040_v21 = vpack.c.bf16 %v4026_v46, %v4025_v8 }
 0x6f7   :  { %3663 = vrot.lane.b32.xlu0 %v3662_v30, %s4688_s20  ;;  %3867 = vmatpush1.bf16.msra.mxu0 %v3840_v22  ;;  %v4029_v30 = vld [vmem:[%s6578_s25 + $0x30] sm:$0xff] }
 0x6f8   :  { %3428 = vrot.lane.b32.xlu1 %v3426_v37, %s4680_s3  ;;  %4566 = vmatmul.mubr.msk.bf16.vlgmr.msra.gmra.mrb[24].mxu1 %vm87_vm0, %v4040_v21  ;;  %v4030_v37 = vld [vmem:[%s6578_s25 + $0x38] sm:$0xff] }
 0x6f9   :  { %4569 = vmatprep.mubr.msk.bf16.mxu1 %vm87_vm0, %v4041_v48  ;;  %v4042_v20 = vpack.c.bf16 %v4030_v37, %v4029_v30 }
 0x6fb   :  { %3386 = vrot.lane.b32.xlu0 %v3384_v13, %s4693_s19  ;;  %v4034_v13 = vld [vmem:[%s6578_s25 + $0x58] sm:$0xff] }
 0x6fc   :  { %3436 = vrot.lane.b32.xlu1 %v3434_v43, %s4692_s18  ;;  %v4033_v43 = vld [vmem:[%s6578_s25 + $0x50] sm:$0xff] }
 0x6fd   :  { %v4044_v52 = vpack.c.bf16 %v4034_v13, %v4033_v43 }
 0x6ff   :  { %3394 = vrot.lane.b32.xlu0 %v3392_v32, %s4694_s27 }
 0x700   :  { %3690 = vrot.lane.b32.xlu1 %v3689_v63, %s4689_s24  ;;  %4570 = vmatmul.mubr.msk.bf16.gmra.mrb[28].mxu1 %vm87_vm0, %v4042_v20  ;;  %v4038_v63 = vld [vmem:[%s6578_s25 + $0x78] sm:$0xff] }
 0x701   :  { %4573 = vmatprep.mubr.msk.bf16.mxu1 %vm87_vm0, %v4043_v24  ;;  %v4046_v32 = vpack.c.bf16 %v4038_v63, %v4037_v17  ;;  %v3904_v17 = vsub.s32 1, %v6054_v23 }
 0x703   :  { %3672 = vrot.lane.b32.xlu0 %v3671_v49, %s4693_s19 }
 0x704   :  { %3701 = vrot.lane.b32.xlu1 %v3700_v3, %s4690_s8 }
 0x707   :  { %3681 = vrot.lane.b32.xlu0 %v3680_v26, %s4694_s27 }
 0x708   :  { %3710 = vrot.lane.b32.xlu1 %v3709_v56, %s4691_s9  ;;  %4574 = vmatmul.mubr.msk.bf16.gmra.mrb[32].mxu1 %vm87_vm0, %v4044_v52 }
 0x709   :  { %4577 = vmatprep.mubr.msk.bf16.mxu1 %vm87_vm0, %v4045_v33 }
 0x70c   :  { %3719 = vrot.lane.b32.xlu1 %v3718_v34, %s4680_s3 }
 0x710   :  { %3728 = vrot.lane.b32.xlu1 %v3727_v5, %s4692_s18  ;;  %4578 = vmatmul.mubr.msk.bf16.gmra.mrb[36].mxu1 %vm87_vm0, %v4046_v32  ;;  %vm3407_vm0 = vcmask 93184  }
 0x74d   :  { %v3355_v53 = vpop.permute.xlu0 %3354 }
 0x74e   :  { %v3339_v62 = vpop.permute.xlu1 %3338 }
 0x74f   :  { %3342 = vst.msk [vmem:[#allocation6] sm:$0xf] %vm3341_vm13, %v3339_v62  ;;  %vm3666_vm13 = vcmask 802468  }
 0x751   :  { %v3363_v12 = vpop.permute.xlu0 %3362 }
 0x752   :  { %v3347_v25 = vpop.permute.xlu1 %3346 }
 0x753   :  { %3350 = vst.msk [vmem:[#allocation6] sm:$0xf] %vm3349_vm14, %v3347_v25  ;;  %vm3439_vm14 = vcmask 552368  }
 0x754   :  { %3358 = vst.msk [vmem:[#allocation6] sm:$0xf] %vm3357_vm15, %v3355_v53  ;;  %vm3389_vm15 = vcmask 913168  }
 0x755   :  { %3366 = vst.msk [vmem:[#allocation6] sm:$0xf] %vm3365_vm3, %v3363_v12  ;;  %v3371_v3 = vpop.permute.xlu0 %3370  ;;  %vm3695_vm3 = vcmask 97284   ;;  %v3918_v12 = vsub.s32 3, %v6054_v23 }
 0x756   :  { %v3628_v27 = vpop.permute.xlu1 %3627  ;;  %3374 = vst.msk [vmem:[#allocation6] sm:$0xf] %vm3373_vm2, %v3371_v3  ;;  %vm3397_vm2 = vcmask 1027968  }
 0x759   :  { %v3379_v29 = vpop.permute.xlu0 %3378 }
 0x75a   :  { %v3637_v49 = vpop.permute.xlu1 %3636  ;;  %3382 = vst.msk [vmem:[#allocation6] sm:$0xf] %vm3381_vm4, %v3379_v29  ;;  %vm3405_vm4 = vcmask 1044464  }
 0x75d   :  { %v3619_v59 = vpop.permute.xlu0 %3618 }
 0x75e   :  { %v3403_v42 = vpop.permute.xlu1 %3402  ;;  %3622 = vst.msk [vmem:[#allocation6] sm:$0xf0] %vm3621_vm6, %v3619_v59  ;;  %vm3675_vm6 = vcmask 917268   ;;  %v3932_v59 = vsub.s32 5, %v6054_v23 }
 0x75f   :  { %3408 = vst.msk [vmem:[#allocation6 + $0x8] sm:$0xf] %vm3407_vm0, %v3403_v42  ;;  %vm3704_vm0 = vcmask 212068  }
 0x760   :  { %3631 = vst.msk [vmem:[#allocation6] sm:$0xf0] %vm3630_vm7, %v3628_v27  ;;  %vm3713_vm7 = vcmask 326868  }
 0x761   :  { %3640 = vst.msk [vmem:[#allocation6] sm:$0xf0] %vm3639_vm8, %v3637_v49  ;;  %v3646_v0 = vpop.permute.xlu0 %3645  ;;  %vm3684_vm8 = vcmask 1032068  }
 0x762   :  { %v3413_v51 = vpop.permute.xlu1 %3412  ;;  %3649 = vst.msk [vmem:[#allocation6] sm:$0xf0] %vm3648_vm9, %v3646_v0  ;;  %vm3722_vm9 = vcmask 441668  }
 0x763   :  { %3416 = vst.msk [vmem:[#allocation6 + $0x8] sm:$0xf] %vm3415_vm1, %v3413_v51  ;;  %vm3693_vm1 = vcmask 1048564   ;;  %v3925_v51 = vsub.s32 4, %v6054_v23 }
 0x765   :  { %v3655_v26 = vpop.permute.xlu0 %3654 }
 0x766   :  { %v3421_v56 = vpop.permute.xlu1 %3420  ;;  %3658 = vst.msk [vmem:[#allocation6] sm:$0xf0] %vm3657_vm5, %v3655_v26  ;;  %vm3835_vm5 = vcmask 556032  }
 0x767   :  { %3424 = vst.msk [vmem:[#allocation6 + $0x8] sm:$0xf] %vm3423_vm10, %v3421_v56  ;;  %vm3731_vm10 = vcmask 556468  }
 0x769   :  { %v3664_v38 = vpop.permute.xlu0 %3663 }
 0x76a   :  { %v3429_v11 = vpop.permute.xlu1 %3428  ;;  %3667 = vst.msk [vmem:[#allocation6] sm:$0xf0] %vm3666_vm13, %v3664_v38  ;;  %v3939_v38 = vsub.s32 6, %v6054_v23 }
 0x76b   :  { %3432 = vst.msk [vmem:[#allocation6 + $0x8] sm:$0xf] %vm3431_vm11, %v3429_v11  ;;  %v3946_v11 = vsub.s32 7, %v6054_v23 }
 0x76d   :  { %v3387_v34 = vpop.permute.xlu0 %3386 }
 0x76e   :  { %v3437_v22 = vpop.permute.xlu1 %3436  ;;  %3390 = vst.msk [vmem:[#allocation6] sm:$0xf] %vm3389_vm15, %v3387_v34 }
 0x76f   :  { %3440 = vst.msk [vmem:[#allocation6 + $0x8] sm:$0xf] %vm3439_vm14, %v3437_v22 }
 0x771   :  { %v3395_v15 = vpop.permute.xlu0 %3394 }
 0x772   :  { %v3691_v19 = vpop.permute.xlu1 %3690  ;;  %3398 = vst.msk [vmem:[#allocation6] sm:$0xf] %vm3397_vm2, %v3395_v15 }
 0x773   :  { %3696 = vst.msk [vmem:[#allocation6 + $0x8] sm:$0xf0] %vm3695_vm3, %v3691_v19 }
 0x774   :  { %3406 = vst.msk [vmem:[#allocation6] sm:$0xf] %vm3405_vm4, %v3403_v42 }
 0x775   :  { %v3673_v60 = vpop.permute.xlu0 %3672 }
 0x776   :  { %v3702_v1 = vpop.permute.xlu1 %3701  ;;  %3676 = vst.msk [vmem:[#allocation6] sm:$0xf0] %vm3675_vm6, %v3673_v60 }
 0x777   :  { %3705 = vst.msk [vmem:[#allocation6 + $0x8] sm:$0xf0] %vm3704_vm0, %v3702_v1 }
 0x779   :  { %v3682_v8 = vpop.permute.xlu0 %3681 }
 0x77a   :  { %v3711_v44 = vpop.permute.xlu1 %3710  ;;  %3685 = vst.msk [vmem:[#allocation6] sm:$0xf0] %vm3684_vm8, %v3682_v8 }
 0x77b   :  { %3714 = vst.msk [vmem:[#allocation6 + $0x8] sm:$0xf0] %vm3713_vm7, %v3711_v44 }
 0x77c   :  { %3694 = vst.msk [vmem:[#allocation6] sm:$0xf0] %vm3693_vm1, %v3691_v19 }
 0x77e   :  { %v3720_v46 = vpop.permute.xlu1 %3719 }
 0x77f   :  { %3723 = vst.msk [vmem:[#allocation6 + $0x8] sm:$0xf0] %vm3722_vm9, %v3720_v46 }
 0x782   :  { %v3729_v61 = vpop.permute.xlu1 %3728 }
 0x783   :  { %3732 = vst.msk [vmem:[#allocation6 + $0x8] sm:$0xf0] %vm3731_vm10, %v3729_v61  ;;  %v3733_v21 = vld [vmem:[#allocation6] sm:$0xff] }
 0x78a   :  { %v3734_v5 = vld [vmem:[#allocation6 + $0x8] sm:$0xff] }
 0x78b   :  { %4412 = vmatprep.mubr.msk.bf16.mxu0 %vm3835_vm5, %v3734_v5 }
 0x78c   :  { %3875 = vmatmul.mubr.bf16.vlgmr.msra.gmra.mrb[32].mxu0 %v3733_v21 }
 0x7cb   :  { %v6417_v9 = vpop.f32.mrb[24].mxu1 }
 0x7cc   :  { %v6419_v48 = vpop.f32.mrb[25].mxu1 }
 0x7cd   :  { %v6421_v30 = vpop.f32.mrb[26].mxu1 }
 0x7ce   :  { %v6423_v37 = vpop.f32.mrb[27].mxu1 }
 0x7d3   :  { %v6425_v52 = vpop.f32.mrb[28].mxu1 }
 0x7d4   :  { %v6428_v62 = vpop.f32.mrb[29].mxu1 }
 0x7d5   :  { %v6432_v27 = vpop.f32.mrb[30].mxu1 }
 0x7d6   :  { %v4132_v3 = vpop.f32.mrb[31].mxu1 }
 0x7db   :  { %v6434_v49 = vpop.f32.mrb[32].mxu1 }
 0x7dc   :  { %v6439_v0 = vpop.f32.mrb[33].mxu1 }
 0x7dd   :  { %v6443_v22 = vpop.f32.mrb[34].mxu1 }
 0x7de   :  { %v6445_v34 = vpop.f32.mrb[35].mxu1 }
 0x7e3   :  { %v6447_v19 = vpop.f32.mrb[36].mxu1 }
 0x7e4   :  { %v6449_v44 = vpop.f32.mrb[37].mxu1 }
 0x7e5   :  { %v6452_v61 = vpop.f32.mrb[38].mxu1 }
 0x7e6   :  { %v6454_v23 = vpop.f32.mrb[39].mxu1 }
 0x85f   :  { %v3876_v55 = vpop.f32.mrb[32].mxu0 }
 0x860   :  { %v4413_v7 = vmul.f32 -1.442695, %v3876_v55  ;;  %v3878_v20 = vpop.f32.mrb[33].mxu0 }
 0x861   :  { %v3879_v24 = vpop.f32.mrb[34].mxu0 }
 0x862   :  { %4641 = vpow2.f32 %v4413_v7  ;;  %v3881_v43 = vpop.f32.mrb[35].mxu0  ;;  %v4414_v13 = vmul.f32 -1.442695, %v3879_v24 }
 0x864   :  { %4643 = vpow2.f32 %v4414_v13  ;;  %v6469_v13 = vld [vmem:[%s6574_s15] ss:$0 sm:$0xff] }
 0x86c   :  { %v4642_v2 = vpop.eup %4641 }
 0x86d   :  { %v3889_v18 = vadd.f32 1.0, %v4642_v2 }
 0x86e   :  { %v4644_v33 = vpop.eup %4643 }
 0x86f   :  { %4645 = vrcp.f32 %v3889_v18  ;;  %v3890_v32 = vadd.f32 1.0, %v4644_v33 }
 0x871   :  { %4647 = vrcp.f32 %v3890_v32 }
 0x879   :  { %v4646_v63 = vpop.eup %4645 }
 0x87a   :  { %v3905_v53 = vrot.slane %v4646_v63, %v3904_v17  ;;  %v3898_v25 = vrot.slane %v4646_v63, %v6060_v47  ;;  %v3919_v29 = vrot.slane %v4646_v63, %v3918_v12  ;;  %v3912_v42 = vrot.slane %v4646_v63, %v6057_v6 }
 0x87b   :  { %v3933_v56 = vrot.slane %v4646_v63, %v3932_v59  ;;  %v3926_v26 = vrot.slane %v4646_v63, %v3925_v51  ;;  %v3947_v15 = vrot.slane %v4646_v63, %v3946_v11  ;;  %v3940_v1 = vrot.slane %v4646_v63, %v3939_v38  ;;  %v4648_v60 = vpop.eup %4647 }
 0x87c   :  { %3907 = vbcast.lane.b32.xlu1 %v3905_v53, 256  ;;  %3900 = vbcast.lane.b32.xlu0 %v3898_v25, 256  ;;  %v3961_v8 = vrot.slane %v4648_v60, %v3904_v17  ;;  %v3954_v46 = vrot.slane %v4648_v60, %v6060_v47  ;;  %v3975_v5 = vrot.slane %v4648_v60, %v3918_v12  ;;  %v6460_v47 = vld [vmem:[%s6573_s14] ss:$0 sm:$0xff]  ;;  %s4695_s14 = smov [#allocation7]  }
 0x87d   :  { %v3968_v21 = vrot.slane %v4648_v60, %v6057_v6  ;;  %v3989_v55 = vrot.slane %v4648_v60, %v3932_v59  ;;  %v3982_v7 = vrot.slane %v4648_v60, %v3925_v51  ;;  %v4003_v20 = vrot.slane %v4648_v60, %v3946_v11  ;;  %s4275_s15 = sshll.u32 %s4695_s14, 4  ;;  %s4276_s15 = int_to_ptr.vmem [resolvable:$true] %s4275_s15 }
 0x87e   :  { %v3996_v24 = vrot.slane %v4648_v60, %v3939_v38  ;;  %v4183_v43 = vmul.f32 %v6460_v47, %v6419_v48  ;;  %v4184_v6 = vmul.f32 %v6460_v47, %v6423_v37  ;;  %v4185_v33 = vmul.f32 %v6417_v9, %v6460_v47  ;;  %s4649_s0 = scalar_lea.vmem %s4276_s15, 2048  ;;  %p4654_p1 = scmp.lt.s32.totalorder %s4276_s15, %s4276_s15 }
 0x87f   :  { %v4186_v17 = vmul.f32 %v6421_v30, %v6460_v47  ;;  %v4187_v12 = vmul.f32 %v6460_v47, %v6428_v62  ;;  %v4189_v38 = vmul.f32 %v6425_v52, %v6460_v47  ;;  %v4191_v52 = vmul.f32 %v6460_v47, %v6439_v0  ;;  %p4650_p0 = scmp.ne.s32.totalorder %s4276_s15, %s4649_s0  ;;  %p4655_p2 = scmp.lt.s32.totalorder %s4649_s0, %s4649_s0 }
 0x880   :  { %3921 = vbcast.lane.b32.xlu1 %v3919_v29, 256  ;;  %3914 = vbcast.lane.b32.xlu0 %v3912_v42, 256  ;;  %v4206_v2 = vadd.f32 %v6469_v13, %v4183_v43  ;;  %v4207_v18 = vadd.f32 %v6469_v13, %v4184_v6  ;;  %v4188_v29 = vmul.f32 %v6460_v47, %v4132_v3 }
 0x881   :  { %v4208_v42 = vadd.f32 %v6469_v13, %v4185_v33  ;;  %v4209_v9 = vadd.f32 %v6469_v13, %v4186_v17  ;;  %v4210_v3 = vadd.f32 %v6469_v13, %v4187_v12  ;;  %v4193_v33 = vmul.f32 %v6434_v49, %v6460_v47  ;;  %p4656_p3 = por %p4655_p2, %p4654_p1 }
 0x882   :  { %v4211_v11 = vadd.f32 %v6469_v13, %v4188_v29  ;;  %v4194_v17 = vmul.f32 %v6443_v22, %v6460_v47  ;;  %v4195_v49 = vmul.f32 %v6460_v47, %v6449_v44  ;;  %v4196_v22 = vmul.f32 %v6460_v47, %v6454_v23 }
 0x883   :  { %v4216_v12 = vadd.f32 %v6469_v13, %v4193_v33  ;;  %p4657_p4 = pnand %p4656_p3, %p4650_p0 }
 0x884   :  { %3935 = vbcast.lane.b32.xlu1 %v3933_v56, 256  ;;  %3928 = vbcast.lane.b32.xlu0 %v3926_v26, 256  ;;  %v4217_v29 = vadd.f32 %v6469_v13, %v4194_v17  ;;  %v4218_v23 = vadd.f32 %v6469_v13, %v4195_v49 }
 0x888   :  { %3949 = vbcast.lane.b32.xlu1 %v3947_v15, 256  ;;  %3942 = vbcast.lane.b32.xlu0 %v3940_v1, 256  ;;  %v4190_v15 = vmul.f32 %v6432_v27, %v6460_v47  ;;  %v4192_v27 = vmul.f32 %v6460_v47, %v6445_v34  ;;  %v4214_v34 = vadd.f32 %v6469_v13, %v4191_v52 }
 0x88c   :  { %3963 = vbcast.lane.b32.xlu1 %v3961_v8, 256  ;;  %3956 = vbcast.lane.b32.xlu0 %v3954_v46, 256 }
 0x890   :  { %3977 = vbcast.lane.b32.xlu1 %v3975_v5, 256  ;;  %3970 = vbcast.lane.b32.xlu0 %v3968_v21, 256 }
 0x894   :  { %3991 = vbcast.lane.b32.xlu1 %v3989_v55, 256  ;;  %3984 = vbcast.lane.b32.xlu0 %v3982_v7, 256  ;;  %v4212_v55 = vadd.f32 %v6469_v13, %v4189_v38  ;;  %v4213_v7 = vadd.f32 %v6469_v13, %v4190_v15 }
 0x898   :  { %4005 = vbcast.lane.b32.xlu1 %v4003_v20, 256  ;;  %3998 = vbcast.lane.b32.xlu0 %v3996_v24, 256 }
 0x8ee   :  { %v3908_v63 = vpop.permute.xlu1 %3907  ;;  %v3901_v48 = vpop.permute.xlu0 %3900 }
 0x8ef   :  { %v4008_v32 = vmul.f32 %v3908_v63, %v6085_v36  ;;  %v4007_v37 = vmul.f32 %v3901_v48, %v6093_v40 }
 0x8f1   :  { %v4223_v53 = vadd.f32 %v4207_v18, %v4008_v32  ;;  %v4222_v25 = vadd.f32 %v4206_v2, %v4007_v37  ;;  %v4215_v18 = vadd.f32 %v6469_v13, %v4192_v27 }
 0x8f2   :  { %v3922_v59 = vpop.permute.xlu1 %3921  ;;  %v3915_v51 = vpop.permute.xlu0 %3914 }
 0x8f3   :  { %v4239_v30 = vmax.f32 %v4223_v53, 0.0  ;;  %v4238_v56 = vmax.f32 %v4222_v25, 0.0  ;;  %v4010_v26 = vmul.f32 %v3922_v59, %v6119_v16  ;;  %v4009_v36 = vmul.f32 %v3915_v51, %v6111_v14 }
 0x8f5   :  { %4255 = vst.msk [vmem:[#allocation7 + $0x8] sm:$0xff] %vm2930_vm12, %v4239_v30  ;;  %4254 = vst.msk [vmem:[#allocation7] sm:$0xff] %vm2930_vm12, %v4238_v56  ;;  %v4225_v40 = vadd.f32 %v4209_v9, %v4010_v26  ;;  %v4224_v62 = vadd.f32 %v4208_v42, %v4009_v36  ;;  %v4219_v56 = vadd.f32 %v6469_v13, %v4196_v22 }
 0x8f6   :  { %v3936_v1 = vpop.permute.xlu1 %3935  ;;  %v3929_v16 = vpop.permute.xlu0 %3928  ;;  %v4197_v26 = vmul.f32 %v6447_v19, %v6460_v47  ;;  %v4198_v36 = vmul.f32 %v6452_v61, %v6460_v47 }
 0x8f7   :  { %v4241_v60 = vmax.f32 %v4225_v40, 0.0  ;;  %v4240_v14 = vmax.f32 %v4224_v62, 0.0  ;;  %v4012_v8 = vmul.f32 %v3936_v1, %v6149_v35  ;;  %v4011_v46 = vmul.f32 %v3929_v16, %v6134_v39 }
 0x8f8   :  { %v4220_v1 = vadd.f32 %v6469_v13, %v4197_v26  ;;  %v4221_v19 = vadd.f32 %v6469_v13, %v4198_v36 }
 0x8f9   :  { %4257 = vst.msk [vmem:[#allocation7 + $0x18] sm:$0xff] %vm2930_vm12, %v4241_v60  ;;  %4256 = vst.msk [vmem:[#allocation7 + $0x10] sm:$0xff] %vm2930_vm12, %v4240_v14  ;;  %v4227_v5 = vadd.f32 %v4211_v11, %v4012_v8  ;;  %v4226_v21 = vadd.f32 %v4210_v3, %v4011_v46 }
 0x8fa   :  { %v3950_v20 = vpop.permute.xlu1 %3949  ;;  %v3943_v35 = vpop.permute.xlu0 %3942 }
 0x8fb   :  { %v4243_v24 = vmax.f32 %v4227_v5, 0.0  ;;  %v4242_v39 = vmax.f32 %v4226_v21, 0.0  ;;  %v4014_v43 = vmul.f32 %v3950_v20, %v6180_v10  ;;  %v4013_v6 = vmul.f32 %v3943_v35, %v6164_v50 }
 0x8fd   :  { %4259 = vst.msk [vmem:[#allocation7 + $0x28] sm:$0xff] %vm2930_vm12, %v4243_v24  ;;  %4258 = vst.msk [vmem:[#allocation7 + $0x20] sm:$0xff] %vm2930_vm12, %v4242_v39  ;;  %v4229_v0 = vadd.f32 %v4213_v7, %v4014_v43  ;;  %v4228_v2 = vadd.f32 %v4212_v55, %v4013_v6 }
 0x8fe   :  { %v3964_v63 = vpop.permute.xlu1 %3963  ;;  %v3957_v10 = vpop.permute.xlu0 %3956 }
 0x8ff   :  { %v4245_v48 = vmax.f32 %v4229_v0, 0.0  ;;  %v4244_v50 = vmax.f32 %v4228_v2, 0.0  ;;  %v4016_v32 = vmul.f32 %v3964_v63, %v6064_v31  ;;  %v4015_v37 = vmul.f32 %v3957_v10, %v6067_v54 }
 0x901   :  { %4261 = vst.msk [vmem:[#allocation7 + $0x38] sm:$0xff] %vm2930_vm12, %v4245_v48  ;;  %4260 = vst.msk [vmem:[#allocation7 + $0x30] sm:$0xff] %vm2930_vm12, %v4244_v50  ;;  %v4231_v53 = vadd.f32 %v4215_v18, %v4016_v32  ;;  %v4230_v25 = vadd.f32 %v4214_v34, %v4015_v37 }
 0x902   :  { %v3978_v42 = vpop.permute.xlu1 %3977  ;;  %v3971_v31 = vpop.permute.xlu0 %3970 }
 0x903   :  { %v4247_v9 = vmax.f32 %v4231_v53, 0.0  ;;  %v4246_v54 = vmax.f32 %v4230_v25, 0.0  ;;  %v4018_v59 = vmul.f32 %v3978_v42, %v6100_v4  ;;  %v4017_v51 = vmul.f32 %v3971_v31, %v6077_v41 }
 0x905   :  { %4263 = vst.msk [vmem:[#allocation7 + $0x48] sm:$0xff] %vm2930_vm12, %v4247_v9  ;;  %4262 = vst.msk [vmem:[#allocation7 + $0x40] sm:$0xff] %vm2930_vm12, %v4246_v54  ;;  %v4233_v44 = vadd.f32 %v4217_v29, %v4018_v59  ;;  %v4232_v30 = vadd.f32 %v4216_v12, %v4017_v51 }
 0x906   :  { %v3992_v40 = vpop.permute.xlu1 %3991  ;;  %v3985_v4 = vpop.permute.xlu0 %3984 }
 0x907   :  { %v4249_v62 = vmax.f32 %v4233_v44, 0.0  ;;  %v4248_v41 = vmax.f32 %v4232_v30, 0.0  ;;  %v4020_v3 = vmul.f32 %v3992_v40, %v6126_v57  ;;  %v4019_v11 = vmul.f32 %v3985_v4, %v6107_v58 }
 0x909   :  { %4265 = vst.msk [vmem:[#allocation7 + $0x58] sm:$0xff] %vm2930_vm12, %v4249_v62  ;;  %4264 = vst.msk [vmem:[#allocation7 + $0x50] sm:$0xff] %vm2930_vm12, %v4248_v41  ;;  %v4235_v38 = vadd.f32 %v4219_v56, %v4020_v3  ;;  %v4234_v15 = vadd.f32 %v4218_v23, %v4019_v11 }
 0x90a   :  { %v4006_v16 = vpop.permute.xlu1 %4005  ;;  %v3999_v61 = vpop.permute.xlu0 %3998 }
 0x90b   :  { %v4251_v47 = vmax.f32 %v4235_v38, 0.0  ;;  %v4250_v60 = vmax.f32 %v4234_v15, 0.0  ;;  %v4022_v14 = vmul.f32 %v4006_v16, %v6156_v45  ;;  %v4021_v57 = vmul.f32 %v3999_v61, %v6141_v28 }
 0x90d   :  { %4267 = vst.msk [vmem:[#allocation7 + $0x68] sm:$0xff] %vm2930_vm12, %v4251_v47  ;;  %4266 = vst.msk [vmem:[#allocation7 + $0x60] sm:$0xff] %vm2930_vm12, %v4250_v60  ;;  %v4237_v58 = vadd.f32 %v4221_v19, %v4022_v14  ;;  %v4236_v8 = vadd.f32 %v4220_v1, %v4021_v57 }
 0x90f   :  { %v4253_v46 = vmax.f32 %v4237_v58, 0.0  ;;  %v4252_v5 = vmax.f32 %v4236_v8, 0.0 }
 0x911   :  { %4269 = vst.msk [vmem:[#allocation7 + $0x78] sm:$0xff] %vm2930_vm12, %v4253_v46  ;;  %4268 = vst.msk [vmem:[#allocation7 + $0x70] sm:$0xff] %vm2930_vm12, %v4252_v5 }
 0x912   :  { %4660 = shalt.err (!%p4657_p4)
}
 0x913   :  { %s4661_s1 = scalar_lea.hbm %s6575_s16, 2048 }
 0x914   :  { %p4662_p5 = scmp.ne.s32.totalorder %s6575_s16, %s4661_s1  ;;  %p4665_p6 = scmp.lt.u32.totalorder %s4661_s1, %s6575_s16 }
 0x916   :  { %p4667_p7 = pnand %p4665_p6, %p4662_p5 }
 0x918   :  { %4670 = shalt.err (!%p4667_p7)
}
 0x919   :  { %s4696_s7 = smov 128  }
 0x91a   :  { %4281 = dma.vmem_to_hbm [thread:$0]  %s4276_s15, 2048, %s6575_s16, [#allocation8], %s4696_s7, %s4696_s7, %s4676_s28  }
 0x91b   :  { %4671 = dma.done.wait [#allocation8], 2048  }
 0x91c   :  { %4672 = vsyncadd [#allocation8], 4294965248 }
 0x91d   :  { %4285 = vsyncpa [#allocation8], 1 }

</bundles_post_ra>
